<compile_context>
chip_gen: v7x
topology: tpu7x:2x2x1
jax: 0.10.0
libtpu: 0.0.40
codegen_flags: <defaults>
</compile_context>

<pallas_src>
import functools

import jax
import jax.numpy as jnp
from jax.experimental import pallas as pl
from jax.experimental.pallas import tpu as pltpu


# ----------------------------------------------------------------------------- kernel


def _bigru_fused_kernel(x_ref, wih0_ref, wihr_ref, whh_ref, bih_ref, bhn_ref,
                        h0_ref, o_ref, inter_ref, *, num_layers, hp):
    # x_ref    : (TB, S, Din)           layer-0 input (f32)
    # wih0_ref : (Din, 6*HP)            layer-0 input->gate weights, fused cols (bf16)
    # wihr_ref : (L-1|1, 2*HP, 6*HP)    layers>=1 input->gate weights (bf16)
    # whh_ref  : (L, 2*HP, 6*HP)        block-structured hidden->gate weights (bf16)
    # bih_ref  : (L, 1, 6*HP)           input bias with b_hr/b_hz folded in (f32)
    # bhn_ref  : (L, 1, 2*HP)           hidden bias of the n gate only (f32)
    # h0_ref   : (L, TB, 2*HP)          fused initial hidden [h_f | h_b] (f32)
    # o_ref    : (TB, S, 2*HP)          padded output (last layer)
    # inter_ref: (TB, S, 2*HP)          VMEM scratch: padded inter-layer activation
    TB, S, _ = x_ref.shape
    GP = 2 * hp           # fused width of one gate block (both directions)
    G6 = 3 * GP           # all three gates

    # Forward-direction column mask in the fused gate-major layout (hoisted once;
    # the backward direction reads the time-reversed input).
    col = jax.lax.broadcasted_iota(jnp.int32, (TB, G6), 1)
    fwd_mask = col < hp
    for g in range(1, 3):
        fwd_mask = fwd_mask | ((col >= g * GP) & (col < g * GP + hp))

    layer_in = x_ref[...]                                   # (TB, S, Din) f32
    for l in range(num_layers):
        din_l = layer_in.shape[-1]
        wih = wih0_ref[...] if l == 0 else wihr_ref[l - 1]  # (din_l, 6*HP) bf16

        # One MXU matmul projects every timestep of both directions; bias add once.
        xp = jnp.dot(layer_in.reshape(TB * S, din_l).astype(jnp.bfloat16),
                     wih, preferred_element_type=jnp.float32)
        xp = (xp + bih_ref[l]).reshape(TB, S, G6)

        whh = whh_ref[l]                                    # (2*HP, 6*HP) bf16
        bhn = jnp.broadcast_to(bhn_ref[l], (TB, GP))        # hoisted out of the unroll
        h = h0_ref[l].astype(jnp.float32)                   # fused [h_f | h_b], (TB, 2*HP)

        out_ref = o_ref if l == num_layers - 1 else inter_ref
        # Serial recurrence; statically unrolled (S is small here).
        # TODO(synk): switch to lax.fori_loop(..., unroll=2..4) once S grows past ~16.
        for t in range(S):
            # forward slots read timestep t, backward slots read timestep S-1-t
            gi = jnp.where(fwd_mask, xp[:, t, :], xp[:, S - 1 - t, :])
            # ONE fused recurrent matmul per step (both directions at once).
            gh = jnp.dot(h.astype(jnp.bfloat16), whh,
                         preferred_element_type=jnp.float32)
            r = jax.nn.sigmoid(gi[:, :GP] + gh[:, :GP])
            z = jax.nn.sigmoid(gi[:, GP:2 * GP] + gh[:, GP:2 * GP])
            n = jnp.tanh(gi[:, 2 * GP:] + r * (gh[:, 2 * GP:] + bhn))
            h = (1.0 - z) * n + z * h
            # forward half is the output at time t, backward half at time S-1-t
            out_ref[:, t, :hp] = h[:, :hp]
            out_ref[:, S - 1 - t, hp:] = h[:, hp:]

        if l < num_layers - 1:
            layer_in = inter_ref[...]                       # stays in VMEM


# ----------------------------------------------------------------------------- wrapper


def bigru_forward(x, packed, h0_fused, *, hidden_size, num_layers, batch_tile=None):
    """x: (B, S, input_size) -> (B, S, 2*hidden_size)."""
    B, S, Din = x.shape
    HP = packed["hp"]
    GP, G6 = 2 * HP, 6 * HP
    TB = B if batch_tile is None else batch_tile
    assert B % TB == 0 and (TB == B or TB % 8 == 0)
    n_b = B // TB

    flops = trans = 0
    for l in range(num_layers):
        din_l = Din if l == 0 else GP
        flops += 2 * B * S * din_l * G6 + 2 * S * B * GP * G6
        trans += S * B * 3 * GP
    bytes_accessed = int(x.size * 4 + packed["wih0"].size * 2 + packed["wihr"].size * 2
                         + packed["whh"].size * 2 + packed["bih"].size * 4
                         + packed["bhn"].size * 4 + h0_fused.size * 4 + B * S * GP * 4)

    kernel = functools.partial(_bigru_fused_kernel, num_layers=num_layers, hp=HP)
    out_pad = pl.pallas_call(
        kernel,
        out_shape=jax.ShapeDtypeStruct((B, S, GP), jnp.float32),
        grid_spec=pltpu.PrefetchScalarGridSpec(
            num_scalar_prefetch=0,
            grid=(n_b,),                                    # batch axis; 1 step at toy size
            in_specs=[
                pl.BlockSpec((TB, S, Din), lambda b: (b, 0, 0)),
                pl.BlockSpec(packed["wih0"].shape, lambda b: (0, 0)),
                pl.BlockSpec(packed["wihr"].shape, lambda b: (0, 0, 0)),
                pl.BlockSpec(packed["whh"].shape, lambda b: (0, 0, 0)),
                pl.BlockSpec(packed["bih"].shape, lambda b: (0, 0, 0)),
                pl.BlockSpec(packed["bhn"].shape, lambda b: (0, 0, 0)),
                pl.BlockSpec((num_layers, TB, GP), lambda b: (0, b, 0)),
            ],
            out_specs=pl.BlockSpec((TB, S, GP), lambda b: (b, 0, 0)),
            scratch_shapes=[pltpu.VMEM((TB, S, GP), jnp.float32)],
        ),
        compiler_params=pltpu.CompilerParams(
            dimension_semantics=("parallel",),
            vmem_limit_bytes=32 * 1024 * 1024,
        ),
        cost_estimate=pl.CostEstimate(
            flops=flops, transcendentals=trans, bytes_accessed=bytes_accessed),
    )(x, packed["wih0"], packed["wihr"], packed["whh"],
      packed["bih"], packed["bhn"], h0_fused)

    H = hidden_size
    # Strip the per-direction lane padding: fused per-step layout is [h_f(HP) | h_b(HP)].
    return jnp.concatenate([out_pad[..., :H], out_pad[..., HP:HP + H]], axis=-1)


# ----------------------------------------------------------------------------- packing (host side)


def _place_dir_cols(dst, src_t, H, HP, d):
    # dst: (rows, 6*HP); src_t: (rows, 3*H) = W^T with PyTorch gate order [r | z | n]
    for g in range(3):
        dst = dst.at[:, g * 2 * HP + d * HP: g * 2 * HP + d * HP + H].set(
            src_t[:, g * H:(g + 1) * H])
    return dst


def _place_dir_bias(dst, b, H, HP, d):
    for g in range(3):
        dst = dst.at[g * 2 * HP + d * HP: g * 2 * HP + d * HP + H].set(
            b[g * H:(g + 1) * H])
    return dst


def pack_bigru_params(raw_params, hidden_size):
    """Pack per-direction PyTorch-layout GRU weights into the fused, lane-aligned layout."""
    H = hidden_size
    HP = ((H + 63) // 64) * 64          # per-direction pad so one fused gate = 2*HP (mult of 128)
    GP, G6 = 2 * HP, 6 * HP
    f32, bf16 = jnp.float32, jnp.bfloat16
    wih_list, whh_list, bih_list, bhn_list = [], [], [], []

    for l, (w_ih_f, w_hh_f, b_ih_f, b_hh_f,
            w_ih_b, w_hh_b, b_ih_b, b_hh_b) in enumerate(raw_params):
        din_raw = w_ih_f.shape[1]
        # input -> gates, fused gate-major columns
        cols = jnp.zeros((din_raw, G6), f32)
        cols = _place_dir_cols(cols, w_ih_f.T, H, HP, 0)
        cols = _place_dir_cols(cols, w_ih_b.T, H, HP, 1)
        if l == 0:
            wih = cols                                      # (input_size, 6*HP)
        else:
            # previous layer's padded output features are [h_f (HP) | h_b (HP)]
            wih = jnp.zeros((GP, G6), f32)
            wih = wih.at[:H, :].set(cols[:H, :])
            wih = wih.at[HP:HP + H, :].set(cols[H:2 * H, :])
        # hidden -> gates, block structured over the fused hidden [h_f | h_b]
        whh = jnp.zeros((GP, G6), f32)
        whh = whh.at[:H, :].set(
            _place_dir_cols(jnp.zeros((H, G6), f32), w_hh_f.T, H, HP, 0)[:H])
        whh = whh.at[HP:HP + H, :].set(
            _place_dir_cols(jnp.zeros((H, G6), f32), w_hh_b.T, H, HP, 1)[:H])
        # biases: fold b_hr/b_hz into the input bias; keep b_hn separate (gated by r)
        b_hh_f_rz = b_hh_f.at[2 * H:].set(0.0)
        b_hh_b_rz = b_hh_b.at[2 * H:].set(0.0)
        bih = _place_dir_bias(jnp.zeros((G6,), f32), b_ih_f + b_hh_f_rz, H, HP, 0)
        bih = _place_dir_bias(bih, b_ih_b + b_hh_b_rz, H, HP, 1)
        bhn = jnp.zeros((GP,), f32).at[:H].set(b_hh_f[2 * H:]).at[HP:HP + H].set(b_hh_b[2 * H:])

        wih_list.append(wih.astype(bf16))
        whh_list.append(whh.astype(bf16))
        bih_list.append(bih[None, :])
        bhn_list.append(bhn[None, :])

    wihr = (jnp.stack(wih_list[1:], axis=0) if len(wih_list) > 1
            else jnp.zeros((1, GP, G6), bf16))              # dummy, unused for 1 layer
    return dict(hp=HP,
                wih0=wih_list[0],
                wihr=wihr,
                whh=jnp.stack(whh_list, axis=0),
                bih=jnp.stack(bih_list, axis=0),
                bhn=jnp.stack(bhn_list, axis=0))


def pack_h0(h0, hp):
    """(num_layers*2, B, H) PyTorch h0 -> (num_layers, B, 2*HP) fused/padded [h_f | h_b]."""
    L2, B, H = h0.shape
    L = L2 // 2
    out = jnp.zeros((L, B, 2 * hp), jnp.float32)
    for l in range(L):
        out = out.at[l, :, :H].set(h0[2 * l])
        out = out.at[l, :, hp:hp + H].set(h0[2 * l + 1])
    return out


def init_bigru_params(key, input_size, hidden_size, num_layers):
    """PyTorch-style uniform(-1/sqrt(H), 1/sqrt(H)) init, raw per-direction layout."""
    H = hidden_size
    bound = 1.0 / (H ** 0.5)
    params = []
    for l in range(num_layers):
        din = input_size if l == 0 else 2 * H
        key, *ks = jax.random.split(key, 9)
        u = lambda k, shape: jax.random.uniform(
            k, shape, minval=-bound, maxval=bound, dtype=jnp.float32)
        params.append((u(ks[0], (3 * H, din)), u(ks[1], (3 * H, H)),
                       u(ks[2], (3 * H,)), u(ks[3], (3 * H,)),
                       u(ks[4], (3 * H, din)), u(ks[5], (3 * H, H)),
                       u(ks[6], (3 * H,)), u(ks[7], (3 * H,))))
    return params


# ----------------------------------------------------------------------------- pure-JAX reference


def bigru_reference(x, raw_params, h0):
    """f32 reference implementing the exact PyTorch bidirectional multi-layer GRU math."""
    inp = x
    for l, (w_ih_f, w_hh_f, b_ih_f, b_hh_f,
            w_ih_b, w_hh_b, b_ih_b, b_hh_b) in enumerate(raw_params):
        B, S, _ = inp.shape
        H = w_hh_f.shape[1]

        def cell(x_t, h, w_ih, b_ih, w_hh, b_hh, H=H):
            gi = x_t @ w_ih.T + b_ih
            gh = h @ w_hh.T + b_hh
            r = jax.nn.sigmoid(gi[:, :H] + gh[:, :H])
            z = jax.nn.sigmoid(gi[:, H:2 * H] + gh[:, H:2 * H])
            n = jnp.tanh(gi[:, 2 * H:] + r * gh[:, 2 * H:])
            return (1.0 - z) * n + z * h

        h_f, h_b = h0[2 * l], h0[2 * l + 1]
        outs_f, outs_b = [], [None] * S
        for t in range(S):
            h_f = cell(inp[:, t], h_f, w_ih_f, b_ih_f, w_hh_f, b_hh_f)
            outs_f.append(h_f)
        for t in range(S - 1, -1, -1):
            h_b = cell(inp[:, t], h_b, w_ih_b, b_ih_b, w_hh_b, b_hh_b)
            outs_b[t] = h_b
        inp = jnp.stack(
            [jnp.concatenate([outs_f[t], outs_b[t]], axis=-1) for t in range(S)], axis=1)
    return inp


# ----------------------------------------------------------------------------- main


if __name__ == "__main__":
    # Small shapes consistent with the module: batch=2, seq=8, input=32, hidden=32, 2 layers.
    B, S, D_IN, H, NUM_LAYERS = 2, 8, 32, 32, 2

    key = jax.random.PRNGKey(0)
    kx, kh, kp = jax.random.split(key, 3)

    x = jax.random.normal(kx, (B, S, D_IN), dtype=jnp.float32)
    # TODO(synk): the module draws h0 = torch.randn(...) on every forward; the RNG draw itself is
    # not a kernel op, so a deterministic jax.random.normal h0 is passed in explicitly instead.
    h0 = jax.random.normal(kh, (NUM_LAYERS * 2, B, H), dtype=jnp.float32)

    raw_params = init_bigru_params(kp, D_IN, H, NUM_LAYERS)
    packed = pack_bigru_params(raw_params, H)
    h0_fused = pack_h0(h0, packed["hp"])

    out = bigru_forward(x, packed, h0_fused, hidden_size=H, num_layers=NUM_LAYERS)
    out = jax.block_until_ready(out)

    ref = bigru_reference(x, raw_params, h0)
    assert out.shape == (B, S, 2 * H), out.shape
    # bf16 MXU operands accumulate rounding over the S-step recurrence and 2 layers, hence the
    # loosened tolerance vs the f32 reference (structural errors would be O(1), not O(1e-2)).
    assert jnp.allclose(out, ref, atol=1e-1, rtol=1e-1), float(jnp.max(jnp.abs(out - ref)))

    print("KERNEL_OK")
</pallas_src>

<mosaic_0001>
module attributes {stable_mosaic.version = 11 : i64} {
  func.func @_bigru_fused_kernel(%arg0: i32, %arg1: memref<2x8x32xf32, #tpu.memory_space<vmem>>, %arg2: memref<32x384xbf16, #tpu.memory_space<vmem>>, %arg3: memref<1x128x384xbf16, #tpu.memory_space<vmem>>, %arg4: memref<2x128x384xbf16, #tpu.memory_space<vmem>>, %arg5: memref<2x1x384xf32, #tpu.memory_space<vmem>>, %arg6: memref<2x1x128xf32, #tpu.memory_space<vmem>>, %arg7: memref<2x2x128xf32, #tpu.memory_space<vmem>>, %arg8: memref<2x8x128xf32, #tpu.memory_space<vmem>>, %arg9: memref<2x8x128xf32, #tpu.memory_space<vmem>>) attributes {dimension_semantics = [#tpu.dimension_semantics<parallel>], iteration_bounds = array<i64: 1>, scalar_prefetch = 0 : i64, scratch_operands = 1 : i64, tpu.core_type = #tpu.core_type<tc>, window_params = [{transform_indices = @transform_0, window_bounds = array<i64: 2, 8, 32>}, {pipeline_mode = #tpu.pipeline_mode<synchronous>, transform_indices = @transform_1, window_bounds = array<i64: 32, 384>}, {pipeline_mode = #tpu.pipeline_mode<synchronous>, transform_indices = @transform_2, window_bounds = array<i64: 1, 128, 384>}, {pipeline_mode = #tpu.pipeline_mode<synchronous>, transform_indices = @transform_3, window_bounds = array<i64: 2, 128, 384>}, {pipeline_mode = #tpu.pipeline_mode<synchronous>, transform_indices = @transform_4, window_bounds = array<i64: 2, 1, 384>}, {pipeline_mode = #tpu.pipeline_mode<synchronous>, transform_indices = @transform_5, window_bounds = array<i64: 2, 1, 128>}, {transform_indices = @transform_6, window_bounds = array<i64: 2, 2, 128>}, {transform_indices = @transform_7, window_bounds = array<i64: 2, 8, 128>}]} {
    %0 = tpu.iota {dimensions = array<i32: 1>} : vector<2x384xi32>
    %c64_i32 = arith.constant 64 : i32
    %1 = vector.broadcast %c64_i32 : i32 to vector<2x384xi32>
    %2 = arith.cmpi slt, %0, %1 : vector<2x384xi32>
    %c128_i32 = arith.constant 128 : i32
    %3 = vector.broadcast %c128_i32 : i32 to vector<2x384xi32>
    %4 = arith.cmpi sge, %0, %3 : vector<2x384xi32>
    %c192_i32 = arith.constant 192 : i32
    %5 = vector.broadcast %c192_i32 : i32 to vector<2x384xi32>
    %6 = arith.cmpi slt, %0, %5 : vector<2x384xi32>
    %7 = arith.andi %4, %6 : vector<2x384xi1>
    %8 = arith.ori %2, %7 : vector<2x384xi1>
    %c256_i32 = arith.constant 256 : i32
    %9 = vector.broadcast %c256_i32 : i32 to vector<2x384xi32>
    %10 = arith.cmpi sge, %0, %9 : vector<2x384xi32>
    %c320_i32 = arith.constant 320 : i32
    %11 = vector.broadcast %c320_i32 : i32 to vector<2x384xi32>
    %12 = arith.cmpi slt, %0, %11 : vector<2x384xi32>
    %13 = arith.andi %10, %12 : vector<2x384xi1>
    %14 = arith.ori %8, %13 : vector<2x384xi1>
    %c0 = arith.constant 0 : index
    %c0_0 = arith.constant 0 : index
    %c0_1 = arith.constant 0 : index
    %15 = vector.load %arg1[%c0, %c0_0, %c0_1] : memref<2x8x32xf32, #tpu.memory_space<vmem>>, vector<2x8x32xf32>
    %c0_2 = arith.constant 0 : index
    %c0_3 = arith.constant 0 : index
    %16 = vector.load %arg2[%c0_2, %c0_3] : memref<32x384xbf16, #tpu.memory_space<vmem>>, vector<32x384xbf16>
    %17 = vector.shape_cast %15 : vector<2x8x32xf32> to vector<16x32xf32>
    %18 = arith.truncf %17 : vector<16x32xf32> to vector<16x32xbf16>
    %cst = arith.constant dense<0.000000e+00> : vector<16x384xf32>
    %19 = tpu.matmul %18, %16, %cst {dimension_numbers = #tpu.dot_dimension_numbers<[1], [0], [0], [1], [0, 0, 1, 1], [], []>} : vector<16x32xbf16>, vector<32x384xbf16>, vector<16x384xf32> -> vector<16x384xf32>
    %c0_4 = arith.constant 0 : index
    %c0_5 = arith.constant 0 : index
    %c0_6 = arith.constant 0 : index
    %20 = vector.load %arg5[%c0_4, %c0_5, %c0_6] : memref<2x1x384xf32, #tpu.memory_space<vmem>>, vector<1x1x384xf32>
    %21 = vector.shape_cast %20 : vector<1x1x384xf32> to vector<1x384xf32>
    %22 = vector.broadcast %21 : vector<1x384xf32> to vector<16x384xf32>
    %23 = arith.addf %19, %22 : vector<16x384xf32>
    %24 = vector.shape_cast %23 : vector<16x384xf32> to vector<2x8x384xf32>
    %c0_7 = arith.constant 0 : index
    %c0_8 = arith.constant 0 : index
    %c0_9 = arith.constant 0 : index
    %25 = vector.load %arg4[%c0_7, %c0_8, %c0_9] : memref<2x128x384xbf16, #tpu.memory_space<vmem>>, vector<1x128x384xbf16>
    %26 = vector.shape_cast %25 : vector<1x128x384xbf16> to vector<128x384xbf16>
    %c0_10 = arith.constant 0 : index
    %c0_11 = arith.constant 0 : index
    %c0_12 = arith.constant 0 : index
    %27 = vector.load %arg6[%c0_10, %c0_11, %c0_12] : memref<2x1x128xf32, #tpu.memory_space<vmem>>, vector<1x1x128xf32>
    %28 = vector.shape_cast %27 : vector<1x1x128xf32> to vector<1x128xf32>
    %29 = vector.shape_cast %28 : vector<1x128xf32> to vector<1x128xf32>
    %30 = vector.broadcast %29 : vector<1x128xf32> to vector<2x128xf32>
    %c0_13 = arith.constant 0 : index
    %c0_14 = arith.constant 0 : index
    %c0_15 = arith.constant 0 : index
    %31 = vector.load %arg7[%c0_13, %c0_14, %c0_15] : memref<2x2x128xf32, #tpu.memory_space<vmem>>, vector<1x2x128xf32>
    %32 = vector.shape_cast %31 : vector<1x2x128xf32> to vector<2x128xf32>
    %33 = vector.extract_strided_slice %24 {offsets = [0, 0, 0], sizes = [2, 1, 384], strides = [1, 1, 1]} : vector<2x8x384xf32> to vector<2x1x384xf32>
    %34 = vector.shape_cast %33 : vector<2x1x384xf32> to vector<2x384xf32>
    %35 = vector.extract_strided_slice %24 {offsets = [0, 7, 0], sizes = [2, 1, 384], strides = [1, 1, 1]} : vector<2x8x384xf32> to vector<2x1x384xf32>
    %36 = vector.shape_cast %35 : vector<2x1x384xf32> to vector<2x384xf32>
    %37 = arith.select %14, %34, %36 : vector<2x384xi1>, vector<2x384xf32>
    %38 = arith.truncf %32 : vector<2x128xf32> to vector<2x128xbf16>
    %cst_16 = arith.constant dense<0.000000e+00> : vector<2x384xf32>
    %39 = tpu.matmul %38, %26, %cst_16 {dimension_numbers = #tpu.dot_dimension_numbers<[1], [0], [0], [1], [0, 0, 1, 1], [], []>} : vector<2x128xbf16>, vector<128x384xbf16>, vector<2x384xf32> -> vector<2x384xf32>
    %40 = vector.extract_strided_slice %37 {offsets = [0, 0], sizes = [2, 128], strides = [1, 1]} : vector<2x384xf32> to vector<2x128xf32>
    %41 = vector.extract_strided_slice %39 {offsets = [0, 0], sizes = [2, 128], strides = [1, 1]} : vector<2x384xf32> to vector<2x128xf32>
    %42 = arith.addf %40, %41 : vector<2x128xf32>
    %43 = arith.negf %42 : vector<2x128xf32>
    %44 = math.exp %43 : vector<2x128xf32>
    %cst_17 = arith.constant 1.000000e+00 : f32
    %45 = vector.broadcast %cst_17 : f32 to vector<2x128xf32>
    %46 = arith.addf %45, %44 : vector<2x128xf32>
    %47 = arith.divf %45, %46 : vector<2x128xf32>
    %48 = vector.extract_strided_slice %37 {offsets = [0, 128], sizes = [2, 128], strides = [1, 1]} : vector<2x384xf32> to vector<2x128xf32>
    %49 = vector.extract_strided_slice %39 {offsets = [0, 128], sizes = [2, 128], strides = [1, 1]} : vector<2x384xf32> to vector<2x128xf32>
    %50 = arith.addf %48, %49 : vector<2x128xf32>
    %51 = arith.negf %50 : vector<2x128xf32>
    %52 = math.exp %51 : vector<2x128xf32>
    %cst_18 = arith.constant 1.000000e+00 : f32
    %53 = vector.broadcast %cst_18 : f32 to vector<2x128xf32>
    %54 = arith.addf %53, %52 : vector<2x128xf32>
    %55 = arith.divf %53, %54 : vector<2x128xf32>
    %56 = vector.extract_strided_slice %37 {offsets = [0, 256], sizes = [2, 128], strides = [1, 1]} : vector<2x384xf32> to vector<2x128xf32>
    %57 = vector.extract_strided_slice %39 {offsets = [0, 256], sizes = [2, 128], strides = [1, 1]} : vector<2x384xf32> to vector<2x128xf32>
    %58 = arith.addf %57, %30 : vector<2x128xf32>
    %59 = arith.mulf %47, %58 : vector<2x128xf32>
    %60 = arith.addf %56, %59 : vector<2x128xf32>
    %61 = math.tanh %60 : vector<2x128xf32>
    %cst_19 = arith.constant 1.000000e+00 : f32
    %62 = vector.broadcast %cst_19 : f32 to vector<2x128xf32>
    %63 = arith.subf %62, %55 : vector<2x128xf32>
    %64 = arith.mulf %63, %61 : vector<2x128xf32>
    %65 = arith.mulf %55, %32 : vector<2x128xf32>
    %66 = arith.addf %64, %65 : vector<2x128xf32>
    %67 = vector.extract_strided_slice %66 {offsets = [0, 0], sizes = [2, 64], strides = [1, 1]} : vector<2x128xf32> to vector<2x64xf32>
    %c0_20 = arith.constant 0 : index
    %c0_21 = arith.constant 0 : index
    %c0_22 = arith.constant 0 : index
    %68 = vector.load %arg9[%c0_20, %c0_21, %c0_22] : memref<2x8x128xf32, #tpu.memory_space<vmem>>, vector<2x1x64xf32>
    %69 = vector.shape_cast %68 : vector<2x1x64xf32> to vector<2x64xf32>
    %70 = vector.shape_cast %67 : vector<2x64xf32> to vector<2x1x64xf32>
    tpu.vector_store %arg9[%c0_20, %c0_21, %c0_22], %70 {strides = array<i32>} : memref<2x8x128xf32, #tpu.memory_space<vmem>>, vector<2x1x64xf32>,
    %71 = vector.extract_strided_slice %66 {offsets = [0, 64], sizes = [2, 64], strides = [1, 1]} : vector<2x128xf32> to vector<2x64xf32>
    %c0_23 = arith.constant 0 : index
    %c7 = arith.constant 7 : index
    %c64 = arith.constant 64 : index
    %72 = vector.load %arg9[%c0_23, %c7, %c64] : memref<2x8x128xf32, #tpu.memory_space<vmem>>, vector<2x1x64xf32>
    %73 = vector.shape_cast %72 : vector<2x1x64xf32> to vector<2x64xf32>
    %74 = vector.shape_cast %71 : vector<2x64xf32> to vector<2x1x64xf32>
    tpu.vector_store %arg9[%c0_23, %c7, %c64], %74 {strides = array<i32>} : memref<2x8x128xf32, #tpu.memory_space<vmem>>, vector<2x1x64xf32>,
    %75 = vector.extract_strided_slice %24 {offsets = [0, 1, 0], sizes = [2, 1, 384], strides = [1, 1, 1]} : vector<2x8x384xf32> to vector<2x1x384xf32>
    %76 = vector.shape_cast %75 : vector<2x1x384xf32> to vector<2x384xf32>
    %77 = vector.extract_strided_slice %24 {offsets = [0, 6, 0], sizes = [2, 1, 384], strides = [1, 1, 1]} : vector<2x8x384xf32> to vector<2x1x384xf32>
    %78 = vector.shape_cast %77 : vector<2x1x384xf32> to vector<2x384xf32>
    %79 = arith.select %14, %76, %78 : vector<2x384xi1>, vector<2x384xf32>
    %80 = arith.truncf %66 : vector<2x128xf32> to vector<2x128xbf16>
    %cst_24 = arith.constant dense<0.000000e+00> : vector<2x384xf32>
    %81 = tpu.matmul %80, %26, %cst_24 {dimension_numbers = #tpu.dot_dimension_numbers<[1], [0], [0], [1], [0, 0, 1, 1], [], []>} : vector<2x128xbf16>, vector<128x384xbf16>, vector<2x384xf32> -> vector<2x384xf32>
    %82 = vector.extract_strided_slice %79 {offsets = [0, 0], sizes = [2, 128], strides = [1, 1]} : vector<2x384xf32> to vector<2x128xf32>
    %83 = vector.extract_strided_slice %81 {offsets = [0, 0], sizes = [2, 128], strides = [1, 1]} : vector<2x384xf32> to vector<2x128xf32>
    %84 = arith.addf %82, %83 : vector<2x128xf32>
    %85 = arith.negf %84 : vector<2x128xf32>
    %86 = math.exp %85 : vector<2x128xf32>
    %cst_25 = arith.constant 1.000000e+00 : f32
    %87 = vector.broadcast %cst_25 : f32 to vector<2x128xf32>
    %88 = arith.addf %87, %86 : vector<2x128xf32>
    %89 = arith.divf %87, %88 : vector<2x128xf32>
    %90 = vector.extract_strided_slice %79 {offsets = [0, 128], sizes = [2, 128], strides = [1, 1]} : vector<2x384xf32> to vector<2x128xf32>
    %91 = vector.extract_strided_slice %81 {offsets = [0, 128], sizes = [2, 128], strides = [1, 1]} : vector<2x384xf32> to vector<2x128xf32>
    %92 = arith.addf %90, %91 : vector<2x128xf32>
    %93 = arith.negf %92 : vector<2x128xf32>
    %94 = math.exp %93 : vector<2x128xf32>
    %cst_26 = arith.constant 1.000000e+00 : f32
    %95 = vector.broadcast %cst_26 : f32 to vector<2x128xf32>
    %96 = arith.addf %95, %94 : vector<2x128xf32>
    %97 = arith.divf %95, %96 : vector<2x128xf32>
    %98 = vector.extract_strided_slice %79 {offsets = [0, 256], sizes = [2, 128], strides = [1, 1]} : vector<2x384xf32> to vector<2x128xf32>
    %99 = vector.extract_strided_slice %81 {offsets = [0, 256], sizes = [2, 128], strides = [1, 1]} : vector<2x384xf32> to vector<2x128xf32>
    %100 = arith.addf %99, %30 : vector<2x128xf32>
    %101 = arith.mulf %89, %100 : vector<2x128xf32>
    %102 = arith.addf %98, %101 : vector<2x128xf32>
    %103 = math.tanh %102 : vector<2x128xf32>
    %cst_27 = arith.constant 1.000000e+00 : f32
    %104 = vector.broadcast %cst_27 : f32 to vector<2x128xf32>
    %105 = arith.subf %104, %97 : vector<2x128xf32>
    %106 = arith.mulf %105, %103 : vector<2x128xf32>
    %107 = arith.mulf %97, %66 : vector<2x128xf32>
    %108 = arith.addf %106, %107 : vector<2x128xf32>
    %109 = vector.extract_strided_slice %108 {offsets = [0, 0], sizes = [2, 64], strides = [1, 1]} : vector<2x128xf32> to vector<2x64xf32>
    %c0_28 = arith.constant 0 : index
    %c1 = arith.constant 1 : index
    %c0_29 = arith.constant 0 : index
    %110 = vector.load %arg9[%c0_28, %c1, %c0_29] : memref<2x8x128xf32, #tpu.memory_space<vmem>>, vector<2x1x64xf32>
    %111 = vector.shape_cast %110 : vector<2x1x64xf32> to vector<2x64xf32>
    %112 = vector.shape_cast %109 : vector<2x64xf32> to vector<2x1x64xf32>
    tpu.vector_store %arg9[%c0_28, %c1, %c0_29], %112 {strides = array<i32>} : memref<2x8x128xf32, #tpu.memory_space<vmem>>, vector<2x1x64xf32>,
    %113 = vector.extract_strided_slice %108 {offsets = [0, 64], sizes = [2, 64], strides = [1, 1]} : vector<2x128xf32> to vector<2x64xf32>
    %c0_30 = arith.constant 0 : index
    %c6 = arith.constant 6 : index
    %c64_31 = arith.constant 64 : index
    %114 = vector.load %arg9[%c0_30, %c6, %c64_31] : memref<2x8x128xf32, #tpu.memory_space<vmem>>, vector<2x1x64xf32>
    %115 = vector.shape_cast %114 : vector<2x1x64xf32> to vector<2x64xf32>
    %116 = vector.shape_cast %113 : vector<2x64xf32> to vector<2x1x64xf32>
    tpu.vector_store %arg9[%c0_30, %c6, %c64_31], %116 {strides = array<i32>} : memref<2x8x128xf32, #tpu.memory_space<vmem>>, vector<2x1x64xf32>,
    %117 = vector.extract_strided_slice %24 {offsets = [0, 2, 0], sizes = [2, 1, 384], strides = [1, 1, 1]} : vector<2x8x384xf32> to vector<2x1x384xf32>
    %118 = vector.shape_cast %117 : vector<2x1x384xf32> to vector<2x384xf32>
    %119 = vector.extract_strided_slice %24 {offsets = [0, 5, 0], sizes = [2, 1, 384], strides = [1, 1, 1]} : vector<2x8x384xf32> to vector<2x1x384xf32>
    %120 = vector.shape_cast %119 : vector<2x1x384xf32> to vector<2x384xf32>
    %121 = arith.select %14, %118, %120 : vector<2x384xi1>, vector<2x384xf32>
    %122 = arith.truncf %108 : vector<2x128xf32> to vector<2x128xbf16>
    %cst_32 = arith.constant dense<0.000000e+00> : vector<2x384xf32>
    %123 = tpu.matmul %122, %26, %cst_32 {dimension_numbers = #tpu.dot_dimension_numbers<[1], [0], [0], [1], [0, 0, 1, 1], [], []>} : vector<2x128xbf16>, vector<128x384xbf16>, vector<2x384xf32> -> vector<2x384xf32>
    %124 = vector.extract_strided_slice %121 {offsets = [0, 0], sizes = [2, 128], strides = [1, 1]} : vector<2x384xf32> to vector<2x128xf32>
    %125 = vector.extract_strided_slice %123 {offsets = [0, 0], sizes = [2, 128], strides = [1, 1]} : vector<2x384xf32> to vector<2x128xf32>
    %126 = arith.addf %124, %125 : vector<2x128xf32>
    %127 = arith.negf %126 : vector<2x128xf32>
    %128 = math.exp %127 : vector<2x128xf32>
    %cst_33 = arith.constant 1.000000e+00 : f32
    %129 = vector.broadcast %cst_33 : f32 to vector<2x128xf32>
    %130 = arith.addf %129, %128 : vector<2x128xf32>
    %131 = arith.divf %129, %130 : vector<2x128xf32>
    %132 = vector.extract_strided_slice %121 {offsets = [0, 128], sizes = [2, 128], strides = [1, 1]} : vector<2x384xf32> to vector<2x128xf32>
    %133 = vector.extract_strided_slice %123 {offsets = [0, 128], sizes = [2, 128], strides = [1, 1]} : vector<2x384xf32> to vector<2x128xf32>
    %134 = arith.addf %132, %133 : vector<2x128xf32>
    %135 = arith.negf %134 : vector<2x128xf32>
    %136 = math.exp %135 : vector<2x128xf32>
    %cst_34 = arith.constant 1.000000e+00 : f32
    %137 = vector.broadcast %cst_34 : f32 to vector<2x128xf32>
    %138 = arith.addf %137, %136 : vector<2x128xf32>
    %139 = arith.divf %137, %138 : vector<2x128xf32>
    %140 = vector.extract_strided_slice %121 {offsets = [0, 256], sizes = [2, 128], strides = [1, 1]} : vector<2x384xf32> to vector<2x128xf32>
    %141 = vector.extract_strided_slice %123 {offsets = [0, 256], sizes = [2, 128], strides = [1, 1]} : vector<2x384xf32> to vector<2x128xf32>
    %142 = arith.addf %141, %30 : vector<2x128xf32>
    %143 = arith.mulf %131, %142 : vector<2x128xf32>
    %144 = arith.addf %140, %143 : vector<2x128xf32>
    %145 = math.tanh %144 : vector<2x128xf32>
    %cst_35 = arith.constant 1.000000e+00 : f32
    %146 = vector.broadcast %cst_35 : f32 to vector<2x128xf32>
    %147 = arith.subf %146, %139 : vector<2x128xf32>
    %148 = arith.mulf %147, %145 : vector<2x128xf32>
    %149 = arith.mulf %139, %108 : vector<2x128xf32>
    %150 = arith.addf %148, %149 : vector<2x128xf32>
    %151 = vector.extract_strided_slice %150 {offsets = [0, 0], sizes = [2, 64], strides = [1, 1]} : vector<2x128xf32> to vector<2x64xf32>
    %c0_36 = arith.constant 0 : index
    %c2 = arith.constant 2 : index
    %c0_37 = arith.constant 0 : index
    %152 = vector.load %arg9[%c0_36, %c2, %c0_37] : memref<2x8x128xf32, #tpu.memory_space<vmem>>, vector<2x1x64xf32>
    %153 = vector.shape_cast %152 : vector<2x1x64xf32> to vector<2x64xf32>
    %154 = vector.shape_cast %151 : vector<2x64xf32> to vector<2x1x64xf32>
    tpu.vector_store %arg9[%c0_36, %c2, %c0_37], %154 {strides = array<i32>} : memref<2x8x128xf32, #tpu.memory_space<vmem>>, vector<2x1x64xf32>,
    %155 = vector.extract_strided_slice %150 {offsets = [0, 64], sizes = [2, 64], strides = [1, 1]} : vector<2x128xf32> to vector<2x64xf32>
    %c0_38 = arith.constant 0 : index
    %c5 = arith.constant 5 : index
    %c64_39 = arith.constant 64 : index
    %156 = vector.load %arg9[%c0_38, %c5, %c64_39] : memref<2x8x128xf32, #tpu.memory_space<vmem>>, vector<2x1x64xf32>
    %157 = vector.shape_cast %156 : vector<2x1x64xf32> to vector<2x64xf32>
    %158 = vector.shape_cast %155 : vector<2x64xf32> to vector<2x1x64xf32>
    tpu.vector_store %arg9[%c0_38, %c5, %c64_39], %158 {strides = array<i32>} : memref<2x8x128xf32, #tpu.memory_space<vmem>>, vector<2x1x64xf32>,
    %159 = vector.extract_strided_slice %24 {offsets = [0, 3, 0], sizes = [2, 1, 384], strides = [1, 1, 1]} : vector<2x8x384xf32> to vector<2x1x384xf32>
    %160 = vector.shape_cast %159 : vector<2x1x384xf32> to vector<2x384xf32>
    %161 = vector.extract_strided_slice %24 {offsets = [0, 4, 0], sizes = [2, 1, 384], strides = [1, 1, 1]} : vector<2x8x384xf32> to vector<2x1x384xf32>
    %162 = vector.shape_cast %161 : vector<2x1x384xf32> to vector<2x384xf32>
    %163 = arith.select %14, %160, %162 : vector<2x384xi1>, vector<2x384xf32>
    %164 = arith.truncf %150 : vector<2x128xf32> to vector<2x128xbf16>
    %cst_40 = arith.constant dense<0.000000e+00> : vector<2x384xf32>
    %165 = tpu.matmul %164, %26, %cst_40 {dimension_numbers = #tpu.dot_dimension_numbers<[1], [0], [0], [1], [0, 0, 1, 1], [], []>} : vector<2x128xbf16>, vector<128x384xbf16>, vector<2x384xf32> -> vector<2x384xf32>
    %166 = vector.extract_strided_slice %163 {offsets = [0, 0], sizes = [2, 128], strides = [1, 1]} : vector<2x384xf32> to vector<2x128xf32>
    %167 = vector.extract_strided_slice %165 {offsets = [0, 0], sizes = [2, 128], strides = [1, 1]} : vector<2x384xf32> to vector<2x128xf32>
    %168 = arith.addf %166, %167 : vector<2x128xf32>
    %169 = arith.negf %168 : vector<2x128xf32>
    %170 = math.exp %169 : vector<2x128xf32>
    %cst_41 = arith.constant 1.000000e+00 : f32
    %171 = vector.broadcast %cst_41 : f32 to vector<2x128xf32>
    %172 = arith.addf %171, %170 : vector<2x128xf32>
    %173 = arith.divf %171, %172 : vector<2x128xf32>
    %174 = vector.extract_strided_slice %163 {offsets = [0, 128], sizes = [2, 128], strides = [1, 1]} : vector<2x384xf32> to vector<2x128xf32>
    %175 = vector.extract_strided_slice %165 {offsets = [0, 128], sizes = [2, 128], strides = [1, 1]} : vector<2x384xf32> to vector<2x128xf32>
    %176 = arith.addf %174, %175 : vector<2x128xf32>
    %177 = arith.negf %176 : vector<2x128xf32>
    %178 = math.exp %177 : vector<2x128xf32>
    %cst_42 = arith.constant 1.000000e+00 : f32
    %179 = vector.broadcast %cst_42 : f32 to vector<2x128xf32>
    %180 = arith.addf %179, %178 : vector<2x128xf32>
    %181 = arith.divf %179, %180 : vector<2x128xf32>
    %182 = vector.extract_strided_slice %163 {offsets = [0, 256], sizes = [2, 128], strides = [1, 1]} : vector<2x384xf32> to vector<2x128xf32>
    %183 = vector.extract_strided_slice %165 {offsets = [0, 256], sizes = [2, 128], strides = [1, 1]} : vector<2x384xf32> to vector<2x128xf32>
    %184 = arith.addf %183, %30 : vector<2x128xf32>
    %185 = arith.mulf %173, %184 : vector<2x128xf32>
    %186 = arith.addf %182, %185 : vector<2x128xf32>
    %187 = math.tanh %186 : vector<2x128xf32>
    %cst_43 = arith.constant 1.000000e+00 : f32
    %188 = vector.broadcast %cst_43 : f32 to vector<2x128xf32>
    %189 = arith.subf %188, %181 : vector<2x128xf32>
    %190 = arith.mulf %189, %187 : vector<2x128xf32>
    %191 = arith.mulf %181, %150 : vector<2x128xf32>
    %192 = arith.addf %190, %191 : vector<2x128xf32>
    %193 = vector.extract_strided_slice %192 {offsets = [0, 0], sizes = [2, 64], strides = [1, 1]} : vector<2x128xf32> to vector<2x64xf32>
    %c0_44 = arith.constant 0 : index
    %c3 = arith.constant 3 : index
    %c0_45 = arith.constant 0 : index
    %194 = vector.load %arg9[%c0_44, %c3, %c0_45] : memref<2x8x128xf32, #tpu.memory_space<vmem>>, vector<2x1x64xf32>
    %195 = vector.shape_cast %194 : vector<2x1x64xf32> to vector<2x64xf32>
    %196 = vector.shape_cast %193 : vector<2x64xf32> to vector<2x1x64xf32>
    tpu.vector_store %arg9[%c0_44, %c3, %c0_45], %196 {strides = array<i32>} : memref<2x8x128xf32, #tpu.memory_space<vmem>>, vector<2x1x64xf32>,
    %197 = vector.extract_strided_slice %192 {offsets = [0, 64], sizes = [2, 64], strides = [1, 1]} : vector<2x128xf32> to vector<2x64xf32>
    %c0_46 = arith.constant 0 : index
    %c4 = arith.constant 4 : index
    %c64_47 = arith.constant 64 : index
    %198 = vector.load %arg9[%c0_46, %c4, %c64_47] : memref<2x8x128xf32, #tpu.memory_space<vmem>>, vector<2x1x64xf32>
    %199 = vector.shape_cast %198 : vector<2x1x64xf32> to vector<2x64xf32>
    %200 = vector.shape_cast %197 : vector<2x64xf32> to vector<2x1x64xf32>
    tpu.vector_store %arg9[%c0_46, %c4, %c64_47], %200 {strides = array<i32>} : memref<2x8x128xf32, #tpu.memory_space<vmem>>, vector<2x1x64xf32>,
    %201 = vector.extract_strided_slice %24 {offsets = [0, 4, 0], sizes = [2, 1, 384], strides = [1, 1, 1]} : vector<2x8x384xf32> to vector<2x1x384xf32>
    %202 = vector.shape_cast %201 : vector<2x1x384xf32> to vector<2x384xf32>
    %203 = vector.extract_strided_slice %24 {offsets = [0, 3, 0], sizes = [2, 1, 384], strides = [1, 1, 1]} : vector<2x8x384xf32> to vector<2x1x384xf32>
    %204 = vector.shape_cast %203 : vector<2x1x384xf32> to vector<2x384xf32>
    %205 = arith.select %14, %202, %204 : vector<2x384xi1>, vector<2x384xf32>
    %206 = arith.truncf %192 : vector<2x128xf32> to vector<2x128xbf16>
    %cst_48 = arith.constant dense<0.000000e+00> : vector<2x384xf32>
    %207 = tpu.matmul %206, %26, %cst_48 {dimension_numbers = #tpu.dot_dimension_numbers<[1], [0], [0], [1], [0, 0, 1, 1], [], []>} : vector<2x128xbf16>, vector<128x384xbf16>, vector<2x384xf32> -> vector<2x384xf32>
    %208 = vector.extract_strided_slice %205 {offsets = [0, 0], sizes = [2, 128], strides = [1, 1]} : vector<2x384xf32> to vector<2x128xf32>
    %209 = vector.extract_strided_slice %207 {offsets = [0, 0], sizes = [2, 128], strides = [1, 1]} : vector<2x384xf32> to vector<2x128xf32>
    %210 = arith.addf %208, %209 : vector<2x128xf32>
    %211 = arith.negf %210 : vector<2x128xf32>
    %212 = math.exp %211 : vector<2x128xf32>
    %cst_49 = arith.constant 1.000000e+00 : f32
    %213 = vector.broadcast %cst_49 : f32 to vector<2x128xf32>
    %214 = arith.addf %213, %212 : vector<2x128xf32>
    %215 = arith.divf %213, %214 : vector<2x128xf32>
    %216 = vector.extract_strided_slice %205 {offsets = [0, 128], sizes = [2, 128], strides = [1, 1]} : vector<2x384xf32> to vector<2x128xf32>
    %217 = vector.extract_strided_slice %207 {offsets = [0, 128], sizes = [2, 128], strides = [1, 1]} : vector<2x384xf32> to vector<2x128xf32>
    %218 = arith.addf %216, %217 : vector<2x128xf32>
    %219 = arith.negf %218 : vector<2x128xf32>
    %220 = math.exp %219 : vector<2x128xf32>
    %cst_50 = arith.constant 1.000000e+00 : f32
    %221 = vector.broadcast %cst_50 : f32 to vector<2x128xf32>
    %222 = arith.addf %221, %220 : vector<2x128xf32>
    %223 = arith.divf %221, %222 : vector<2x128xf32>
    %224 = vector.extract_strided_slice %205 {offsets = [0, 256], sizes = [2, 128], strides = [1, 1]} : vector<2x384xf32> to vector<2x128xf32>
    %225 = vector.extract_strided_slice %207 {offsets = [0, 256], sizes = [2, 128], strides = [1, 1]} : vector<2x384xf32> to vector<2x128xf32>
    %226 = arith.addf %225, %30 : vector<2x128xf32>
    %227 = arith.mulf %215, %226 : vector<2x128xf32>
    %228 = arith.addf %224, %227 : vector<2x128xf32>
    %229 = math.tanh %228 : vector<2x128xf32>
    %cst_51 = arith.constant 1.000000e+00 : f32
    %230 = vector.broadcast %cst_51 : f32 to vector<2x128xf32>
    %231 = arith.subf %230, %223 : vector<2x128xf32>
    %232 = arith.mulf %231, %229 : vector<2x128xf32>
    %233 = arith.mulf %223, %192 : vector<2x128xf32>
    %234 = arith.addf %232, %233 : vector<2x128xf32>
    %235 = vector.extract_strided_slice %234 {offsets = [0, 0], sizes = [2, 64], strides = [1, 1]} : vector<2x128xf32> to vector<2x64xf32>
    %c0_52 = arith.constant 0 : index
    %c4_53 = arith.constant 4 : index
    %c0_54 = arith.constant 0 : index
    %236 = vector.load %arg9[%c0_52, %c4_53, %c0_54] : memref<2x8x128xf32, #tpu.memory_space<vmem>>, vector<2x1x64xf32>
    %237 = vector.shape_cast %236 : vector<2x1x64xf32> to vector<2x64xf32>
    %238 = vector.shape_cast %235 : vector<2x64xf32> to vector<2x1x64xf32>
    tpu.vector_store %arg9[%c0_52, %c4_53, %c0_54], %238 {strides = array<i32>} : memref<2x8x128xf32, #tpu.memory_space<vmem>>, vector<2x1x64xf32>,
    %239 = vector.extract_strided_slice %234 {offsets = [0, 64], sizes = [2, 64], strides = [1, 1]} : vector<2x128xf32> to vector<2x64xf32>
    %c0_55 = arith.constant 0 : index
    %c3_56 = arith.constant 3 : index
    %c64_57 = arith.constant 64 : index
    %240 = vector.load %arg9[%c0_55, %c3_56, %c64_57] : memref<2x8x128xf32, #tpu.memory_space<vmem>>, vector<2x1x64xf32>
    %241 = vector.shape_cast %240 : vector<2x1x64xf32> to vector<2x64xf32>
    %242 = vector.shape_cast %239 : vector<2x64xf32> to vector<2x1x64xf32>
    tpu.vector_store %arg9[%c0_55, %c3_56, %c64_57], %242 {strides = array<i32>} : memref<2x8x128xf32, #tpu.memory_space<vmem>>, vector<2x1x64xf32>,
    %243 = vector.extract_strided_slice %24 {offsets = [0, 5, 0], sizes = [2, 1, 384], strides = [1, 1, 1]} : vector<2x8x384xf32> to vector<2x1x384xf32>
    %244 = vector.shape_cast %243 : vector<2x1x384xf32> to vector<2x384xf32>
    %245 = vector.extract_strided_slice %24 {offsets = [0, 2, 0], sizes = [2, 1, 384], strides = [1, 1, 1]} : vector<2x8x384xf32> to vector<2x1x384xf32>
    %246 = vector.shape_cast %245 : vector<2x1x384xf32> to vector<2x384xf32>
    %247 = arith.select %14, %244, %246 : vector<2x384xi1>, vector<2x384xf32>
    %248 = arith.truncf %234 : vector<2x128xf32> to vector<2x128xbf16>
    %cst_58 = arith.constant dense<0.000000e+00> : vector<2x384xf32>
    %249 = tpu.matmul %248, %26, %cst_58 {dimension_numbers = #tpu.dot_dimension_numbers<[1], [0], [0], [1], [0, 0, 1, 1], [], []>} : vector<2x128xbf16>, vector<128x384xbf16>, vector<2x384xf32> -> vector<2x384xf32>
    %250 = vector.extract_strided_slice %247 {offsets = [0, 0], sizes = [2, 128], strides = [1, 1]} : vector<2x384xf32> to vector<2x128xf32>
    %251 = vector.extract_strided_slice %249 {offsets = [0, 0], sizes = [2, 128], strides = [1, 1]} : vector<2x384xf32> to vector<2x128xf32>
    %252 = arith.addf %250, %251 : vector<2x128xf32>
    %253 = arith.negf %252 : vector<2x128xf32>
    %254 = math.exp %253 : vector<2x128xf32>
    %cst_59 = arith.constant 1.000000e+00 : f32
    %255 = vector.broadcast %cst_59 : f32 to vector<2x128xf32>
    %256 = arith.addf %255, %254 : vector<2x128xf32>
    %257 = arith.divf %255, %256 : vector<2x128xf32>
    %258 = vector.extract_strided_slice %247 {offsets = [0, 128], sizes = [2, 128], strides = [1, 1]} : vector<2x384xf32> to vector<2x128xf32>
    %259 = vector.extract_strided_slice %249 {offsets = [0, 128], sizes = [2, 128], strides = [1, 1]} : vector<2x384xf32> to vector<2x128xf32>
    %260 = arith.addf %258, %259 : vector<2x128xf32>
    %261 = arith.negf %260 : vector<2x128xf32>
    %262 = math.exp %261 : vector<2x128xf32>
    %cst_60 = arith.constant 1.000000e+00 : f32
    %263 = vector.broadcast %cst_60 : f32 to vector<2x128xf32>
    %264 = arith.addf %263, %262 : vector<2x128xf32>
    %265 = arith.divf %263, %264 : vector<2x128xf32>
    %266 = vector.extract_strided_slice %247 {offsets = [0, 256], sizes = [2, 128], strides = [1, 1]} : vector<2x384xf32> to vector<2x128xf32>
    %267 = vector.extract_strided_slice %249 {offsets = [0, 256], sizes = [2, 128], strides = [1, 1]} : vector<2x384xf32> to vector<2x128xf32>
    %268 = arith.addf %267, %30 : vector<2x128xf32>
    %269 = arith.mulf %257, %268 : vector<2x128xf32>
    %270 = arith.addf %266, %269 : vector<2x128xf32>
    %271 = math.tanh %270 : vector<2x128xf32>
    %cst_61 = arith.constant 1.000000e+00 : f32
    %272 = vector.broadcast %cst_61 : f32 to vector<2x128xf32>
    %273 = arith.subf %272, %265 : vector<2x128xf32>
    %274 = arith.mulf %273, %271 : vector<2x128xf32>
    %275 = arith.mulf %265, %234 : vector<2x128xf32>
    %276 = arith.addf %274, %275 : vector<2x128xf32>
    %277 = vector.extract_strided_slice %276 {offsets = [0, 0], sizes = [2, 64], strides = [1, 1]} : vector<2x128xf32> to vector<2x64xf32>
    %c0_62 = arith.constant 0 : index
    %c5_63 = arith.constant 5 : index
    %c0_64 = arith.constant 0 : index
    %278 = vector.load %arg9[%c0_62, %c5_63, %c0_64] : memref<2x8x128xf32, #tpu.memory_space<vmem>>, vector<2x1x64xf32>
    %279 = vector.shape_cast %278 : vector<2x1x64xf32> to vector<2x64xf32>
    %280 = vector.shape_cast %277 : vector<2x64xf32> to vector<2x1x64xf32>
    tpu.vector_store %arg9[%c0_62, %c5_63, %c0_64], %280 {strides = array<i32>} : memref<2x8x128xf32, #tpu.memory_space<vmem>>, vector<2x1x64xf32>,
    %281 = vector.extract_strided_slice %276 {offsets = [0, 64], sizes = [2, 64], strides = [1, 1]} : vector<2x128xf32> to vector<2x64xf32>
    %c0_65 = arith.constant 0 : index
    %c2_66 = arith.constant 2 : index
    %c64_67 = arith.constant 64 : index
    %282 = vector.load %arg9[%c0_65, %c2_66, %c64_67] : memref<2x8x128xf32, #tpu.memory_space<vmem>>, vector<2x1x64xf32>
    %283 = vector.shape_cast %282 : vector<2x1x64xf32> to vector<2x64xf32>
    %284 = vector.shape_cast %281 : vector<2x64xf32> to vector<2x1x64xf32>
    tpu.vector_store %arg9[%c0_65, %c2_66, %c64_67], %284 {strides = array<i32>} : memref<2x8x128xf32, #tpu.memory_space<vmem>>, vector<2x1x64xf32>,
    %285 = vector.extract_strided_slice %24 {offsets = [0, 6, 0], sizes = [2, 1, 384], strides = [1, 1, 1]} : vector<2x8x384xf32> to vector<2x1x384xf32>
    %286 = vector.shape_cast %285 : vector<2x1x384xf32> to vector<2x384xf32>
    %287 = vector.extract_strided_slice %24 {offsets = [0, 1, 0], sizes = [2, 1, 384], strides = [1, 1, 1]} : vector<2x8x384xf32> to vector<2x1x384xf32>
    %288 = vector.shape_cast %287 : vector<2x1x384xf32> to vector<2x384xf32>
    %289 = arith.select %14, %286, %288 : vector<2x384xi1>, vector<2x384xf32>
    %290 = arith.truncf %276 : vector<2x128xf32> to vector<2x128xbf16>
    %cst_68 = arith.constant dense<0.000000e+00> : vector<2x384xf32>
    %291 = tpu.matmul %290, %26, %cst_68 {dimension_numbers = #tpu.dot_dimension_numbers<[1], [0], [0], [1], [0, 0, 1, 1], [], []>} : vector<2x128xbf16>, vector<128x384xbf16>, vector<2x384xf32> -> vector<2x384xf32>
    %292 = vector.extract_strided_slice %289 {offsets = [0, 0], sizes = [2, 128], strides = [1, 1]} : vector<2x384xf32> to vector<2x128xf32>
    %293 = vector.extract_strided_slice %291 {offsets = [0, 0], sizes = [2, 128], strides = [1, 1]} : vector<2x384xf32> to vector<2x128xf32>
    %294 = arith.addf %292, %293 : vector<2x128xf32>
    %295 = arith.negf %294 : vector<2x128xf32>
    %296 = math.exp %295 : vector<2x128xf32>
    %cst_69 = arith.constant 1.000000e+00 : f32
    %297 = vector.broadcast %cst_69 : f32 to vector<2x128xf32>
    %298 = arith.addf %297, %296 : vector<2x128xf32>
    %299 = arith.divf %297, %298 : vector<2x128xf32>
    %300 = vector.extract_strided_slice %289 {offsets = [0, 128], sizes = [2, 128], strides = [1, 1]} : vector<2x384xf32> to vector<2x128xf32>
    %301 = vector.extract_strided_slice %291 {offsets = [0, 128], sizes = [2, 128], strides = [1, 1]} : vector<2x384xf32> to vector<2x128xf32>
    %302 = arith.addf %300, %301 : vector<2x128xf32>
    %303 = arith.negf %302 : vector<2x128xf32>
    %304 = math.exp %303 : vector<2x128xf32>
    %cst_70 = arith.constant 1.000000e+00 : f32
    %305 = vector.broadcast %cst_70 : f32 to vector<2x128xf32>
    %306 = arith.addf %305, %304 : vector<2x128xf32>
    %307 = arith.divf %305, %306 : vector<2x128xf32>
    %308 = vector.extract_strided_slice %289 {offsets = [0, 256], sizes = [2, 128], strides = [1, 1]} : vector<2x384xf32> to vector<2x128xf32>
    %309 = vector.extract_strided_slice %291 {offsets = [0, 256], sizes = [2, 128], strides = [1, 1]} : vector<2x384xf32> to vector<2x128xf32>
    %310 = arith.addf %309, %30 : vector<2x128xf32>
    %311 = arith.mulf %299, %310 : vector<2x128xf32>
    %312 = arith.addf %308, %311 : vector<2x128xf32>
    %313 = math.tanh %312 : vector<2x128xf32>
    %cst_71 = arith.constant 1.000000e+00 : f32
    %314 = vector.broadcast %cst_71 : f32 to vector<2x128xf32>
    %315 = arith.subf %314, %307 : vector<2x128xf32>
    %316 = arith.mulf %315, %313 : vector<2x128xf32>
    %317 = arith.mulf %307, %276 : vector<2x128xf32>
    %318 = arith.addf %316, %317 : vector<2x128xf32>
    %319 = vector.extract_strided_slice %318 {offsets = [0, 0], sizes = [2, 64], strides = [1, 1]} : vector<2x128xf32> to vector<2x64xf32>
    %c0_72 = arith.constant 0 : index
    %c6_73 = arith.constant 6 : index
    %c0_74 = arith.constant 0 : index
    %320 = vector.load %arg9[%c0_72, %c6_73, %c0_74] : memref<2x8x128xf32, #tpu.memory_space<vmem>>, vector<2x1x64xf32>
    %321 = vector.shape_cast %320 : vector<2x1x64xf32> to vector<2x64xf32>
    %322 = vector.shape_cast %319 : vector<2x64xf32> to vector<2x1x64xf32>
    tpu.vector_store %arg9[%c0_72, %c6_73, %c0_74], %322 {strides = array<i32>} : memref<2x8x128xf32, #tpu.memory_space<vmem>>, vector<2x1x64xf32>,
    %323 = vector.extract_strided_slice %318 {offsets = [0, 64], sizes = [2, 64], strides = [1, 1]} : vector<2x128xf32> to vector<2x64xf32>
    %c0_75 = arith.constant 0 : index
    %c1_76 = arith.constant 1 : index
    %c64_77 = arith.constant 64 : index
    %324 = vector.load %arg9[%c0_75, %c1_76, %c64_77] : memref<2x8x128xf32, #tpu.memory_space<vmem>>, vector<2x1x64xf32>
    %325 = vector.shape_cast %324 : vector<2x1x64xf32> to vector<2x64xf32>
    %326 = vector.shape_cast %323 : vector<2x64xf32> to vector<2x1x64xf32>
    tpu.vector_store %arg9[%c0_75, %c1_76, %c64_77], %326 {strides = array<i32>} : memref<2x8x128xf32, #tpu.memory_space<vmem>>, vector<2x1x64xf32>,
    %327 = vector.extract_strided_slice %24 {offsets = [0, 7, 0], sizes = [2, 1, 384], strides = [1, 1, 1]} : vector<2x8x384xf32> to vector<2x1x384xf32>
    %328 = vector.shape_cast %327 : vector<2x1x384xf32> to vector<2x384xf32>
    %329 = vector.extract_strided_slice %24 {offsets = [0, 0, 0], sizes = [2, 1, 384], strides = [1, 1, 1]} : vector<2x8x384xf32> to vector<2x1x384xf32>
    %330 = vector.shape_cast %329 : vector<2x1x384xf32> to vector<2x384xf32>
    %331 = arith.select %14, %328, %330 : vector<2x384xi1>, vector<2x384xf32>
    %332 = arith.truncf %318 : vector<2x128xf32> to vector<2x128xbf16>
    %cst_78 = arith.constant dense<0.000000e+00> : vector<2x384xf32>
    %333 = tpu.matmul %332, %26, %cst_78 {dimension_numbers = #tpu.dot_dimension_numbers<[1], [0], [0], [1], [0, 0, 1, 1], [], []>} : vector<2x128xbf16>, vector<128x384xbf16>, vector<2x384xf32> -> vector<2x384xf32>
    %334 = vector.extract_strided_slice %331 {offsets = [0, 0], sizes = [2, 128], strides = [1, 1]} : vector<2x384xf32> to vector<2x128xf32>
    %335 = vector.extract_strided_slice %333 {offsets = [0, 0], sizes = [2, 128], strides = [1, 1]} : vector<2x384xf32> to vector<2x128xf32>
    %336 = arith.addf %334, %335 : vector<2x128xf32>
    %337 = arith.negf %336 : vector<2x128xf32>
    %338 = math.exp %337 : vector<2x128xf32>
    %cst_79 = arith.constant 1.000000e+00 : f32
    %339 = vector.broadcast %cst_79 : f32 to vector<2x128xf32>
    %340 = arith.addf %339, %338 : vector<2x128xf32>
    %341 = arith.divf %339, %340 : vector<2x128xf32>
    %342 = vector.extract_strided_slice %331 {offsets = [0, 128], sizes = [2, 128], strides = [1, 1]} : vector<2x384xf32> to vector<2x128xf32>
    %343 = vector.extract_strided_slice %333 {offsets = [0, 128], sizes = [2, 128], strides = [1, 1]} : vector<2x384xf32> to vector<2x128xf32>
    %344 = arith.addf %342, %343 : vector<2x128xf32>
    %345 = arith.negf %344 : vector<2x128xf32>
    %346 = math.exp %345 : vector<2x128xf32>
    %cst_80 = arith.constant 1.000000e+00 : f32
    %347 = vector.broadcast %cst_80 : f32 to vector<2x128xf32>
    %348 = arith.addf %347, %346 : vector<2x128xf32>
    %349 = arith.divf %347, %348 : vector<2x128xf32>
    %350 = vector.extract_strided_slice %331 {offsets = [0, 256], sizes = [2, 128], strides = [1, 1]} : vector<2x384xf32> to vector<2x128xf32>
    %351 = vector.extract_strided_slice %333 {offsets = [0, 256], sizes = [2, 128], strides = [1, 1]} : vector<2x384xf32> to vector<2x128xf32>
    %352 = arith.addf %351, %30 : vector<2x128xf32>
    %353 = arith.mulf %341, %352 : vector<2x128xf32>
    %354 = arith.addf %350, %353 : vector<2x128xf32>
    %355 = math.tanh %354 : vector<2x128xf32>
    %cst_81 = arith.constant 1.000000e+00 : f32
    %356 = vector.broadcast %cst_81 : f32 to vector<2x128xf32>
    %357 = arith.subf %356, %349 : vector<2x128xf32>
    %358 = arith.mulf %357, %355 : vector<2x128xf32>
    %359 = arith.mulf %349, %318 : vector<2x128xf32>
    %360 = arith.addf %358, %359 : vector<2x128xf32>
    %361 = vector.extract_strided_slice %360 {offsets = [0, 0], sizes = [2, 64], strides = [1, 1]} : vector<2x128xf32> to vector<2x64xf32>
    %c0_82 = arith.constant 0 : index
    %c7_83 = arith.constant 7 : index
    %c0_84 = arith.constant 0 : index
    %362 = vector.load %arg9[%c0_82, %c7_83, %c0_84] : memref<2x8x128xf32, #tpu.memory_space<vmem>>, vector<2x1x64xf32>
    %363 = vector.shape_cast %362 : vector<2x1x64xf32> to vector<2x64xf32>
    %364 = vector.shape_cast %361 : vector<2x64xf32> to vector<2x1x64xf32>
    tpu.vector_store %arg9[%c0_82, %c7_83, %c0_84], %364 {strides = array<i32>} : memref<2x8x128xf32, #tpu.memory_space<vmem>>, vector<2x1x64xf32>,
    %365 = vector.extract_strided_slice %360 {offsets = [0, 64], sizes = [2, 64], strides = [1, 1]} : vector<2x128xf32> to vector<2x64xf32>
    %c0_85 = arith.constant 0 : index
    %c0_86 = arith.constant 0 : index
    %c64_87 = arith.constant 64 : index
    %366 = vector.load %arg9[%c0_85, %c0_86, %c64_87] : memref<2x8x128xf32, #tpu.memory_space<vmem>>, vector<2x1x64xf32>
    %367 = vector.shape_cast %366 : vector<2x1x64xf32> to vector<2x64xf32>
    %368 = vector.shape_cast %365 : vector<2x64xf32> to vector<2x1x64xf32>
    tpu.vector_store %arg9[%c0_85, %c0_86, %c64_87], %368 {strides = array<i32>} : memref<2x8x128xf32, #tpu.memory_space<vmem>>, vector<2x1x64xf32>,
    %c0_88 = arith.constant 0 : index
    %c0_89 = arith.constant 0 : index
    %c0_90 = arith.constant 0 : index
    %369 = vector.load %arg9[%c0_88, %c0_89, %c0_90] : memref<2x8x128xf32, #tpu.memory_space<vmem>>, vector<2x8x128xf32>
    %c0_91 = arith.constant 0 : index
    %c0_92 = arith.constant 0 : index
    %c0_93 = arith.constant 0 : index
    %370 = vector.load %arg3[%c0_91, %c0_92, %c0_93] : memref<1x128x384xbf16, #tpu.memory_space<vmem>>, vector<1x128x384xbf16>
    %371 = vector.shape_cast %370 : vector<1x128x384xbf16> to vector<128x384xbf16>
    %372 = vector.shape_cast %369 : vector<2x8x128xf32> to vector<16x128xf32>
    %373 = arith.truncf %372 : vector<16x128xf32> to vector<16x128xbf16>
    %cst_94 = arith.constant dense<0.000000e+00> : vector<16x384xf32>
    %374 = tpu.matmul %373, %371, %cst_94 {dimension_numbers = #tpu.dot_dimension_numbers<[1], [0], [0], [1], [0, 0, 1, 1], [], []>} : vector<16x128xbf16>, vector<128x384xbf16>, vector<16x384xf32> -> vector<16x384xf32>
    %c1_95 = arith.constant 1 : index
    %c0_96 = arith.constant 0 : index
    %c0_97 = arith.constant 0 : index
    %375 = vector.load %arg5[%c1_95, %c0_96, %c0_97] : memref<2x1x384xf32, #tpu.memory_space<vmem>>, vector<1x1x384xf32>
    %376 = vector.shape_cast %375 : vector<1x1x384xf32> to vector<1x384xf32>
    %377 = vector.broadcast %376 : vector<1x384xf32> to vector<16x384xf32>
    %378 = arith.addf %374, %377 : vector<16x384xf32>
    %379 = vector.shape_cast %378 : vector<16x384xf32> to vector<2x8x384xf32>
    %c1_98 = arith.constant 1 : index
    %c0_99 = arith.constant 0 : index
    %c0_100 = arith.constant 0 : index
    %380 = vector.load %arg4[%c1_98, %c0_99, %c0_100] : memref<2x128x384xbf16, #tpu.memory_space<vmem>>, vector<1x128x384xbf16>
    %381 = vector.shape_cast %380 : vector<1x128x384xbf16> to vector<128x384xbf16>
    %c1_101 = arith.constant 1 : index
    %c0_102 = arith.constant 0 : index
    %c0_103 = arith.constant 0 : index
    %382 = vector.load %arg6[%c1_101, %c0_102, %c0_103] : memref<2x1x128xf32, #tpu.memory_space<vmem>>, vector<1x1x128xf32>
    %383 = vector.shape_cast %382 : vector<1x1x128xf32> to vector<1x128xf32>
    %384 = vector.shape_cast %383 : vector<1x128xf32> to vector<1x128xf32>
    %385 = vector.broadcast %384 : vector<1x128xf32> to vector<2x128xf32>
    %c1_104 = arith.constant 1 : index
    %c0_105 = arith.constant 0 : index
    %c0_106 = arith.constant 0 : index
    %386 = vector.load %arg7[%c1_104, %c0_105, %c0_106] : memref<2x2x128xf32, #tpu.memory_space<vmem>>, vector<1x2x128xf32>
    %387 = vector.shape_cast %386 : vector<1x2x128xf32> to vector<2x128xf32>
    %388 = vector.extract_strided_slice %379 {offsets = [0, 0, 0], sizes = [2, 1, 384], strides = [1, 1, 1]} : vector<2x8x384xf32> to vector<2x1x384xf32>
    %389 = vector.shape_cast %388 : vector<2x1x384xf32> to vector<2x384xf32>
    %390 = vector.extract_strided_slice %379 {offsets = [0, 7, 0], sizes = [2, 1, 384], strides = [1, 1, 1]} : vector<2x8x384xf32> to vector<2x1x384xf32>
    %391 = vector.shape_cast %390 : vector<2x1x384xf32> to vector<2x384xf32>
    %392 = arith.select %14, %389, %391 : vector<2x384xi1>, vector<2x384xf32>
    %393 = arith.truncf %387 : vector<2x128xf32> to vector<2x128xbf16>
    %cst_107 = arith.constant dense<0.000000e+00> : vector<2x384xf32>
    %394 = tpu.matmul %393, %381, %cst_107 {dimension_numbers = #tpu.dot_dimension_numbers<[1], [0], [0], [1], [0, 0, 1, 1], [], []>} : vector<2x128xbf16>, vector<128x384xbf16>, vector<2x384xf32> -> vector<2x384xf32>
    %395 = vector.extract_strided_slice %392 {offsets = [0, 0], sizes = [2, 128], strides = [1, 1]} : vector<2x384xf32> to vector<2x128xf32>
    %396 = vector.extract_strided_slice %394 {offsets = [0, 0], sizes = [2, 128], strides = [1, 1]} : vector<2x384xf32> to vector<2x128xf32>
    %397 = arith.addf %395, %396 : vector<2x128xf32>
    %398 = arith.negf %397 : vector<2x128xf32>
    %399 = math.exp %398 : vector<2x128xf32>
    %cst_108 = arith.constant 1.000000e+00 : f32
    %400 = vector.broadcast %cst_108 : f32 to vector<2x128xf32>
    %401 = arith.addf %400, %399 : vector<2x128xf32>
    %402 = arith.divf %400, %401 : vector<2x128xf32>
    %403 = vector.extract_strided_slice %392 {offsets = [0, 128], sizes = [2, 128], strides = [1, 1]} : vector<2x384xf32> to vector<2x128xf32>
    %404 = vector.extract_strided_slice %394 {offsets = [0, 128], sizes = [2, 128], strides = [1, 1]} : vector<2x384xf32> to vector<2x128xf32>
    %405 = arith.addf %403, %404 : vector<2x128xf32>
    %406 = arith.negf %405 : vector<2x128xf32>
    %407 = math.exp %406 : vector<2x128xf32>
    %cst_109 = arith.constant 1.000000e+00 : f32
    %408 = vector.broadcast %cst_109 : f32 to vector<2x128xf32>
    %409 = arith.addf %408, %407 : vector<2x128xf32>
    %410 = arith.divf %408, %409 : vector<2x128xf32>
    %411 = vector.extract_strided_slice %392 {offsets = [0, 256], sizes = [2, 128], strides = [1, 1]} : vector<2x384xf32> to vector<2x128xf32>
    %412 = vector.extract_strided_slice %394 {offsets = [0, 256], sizes = [2, 128], strides = [1, 1]} : vector<2x384xf32> to vector<2x128xf32>
    %413 = arith.addf %412, %385 : vector<2x128xf32>
    %414 = arith.mulf %402, %413 : vector<2x128xf32>
    %415 = arith.addf %411, %414 : vector<2x128xf32>
    %416 = math.tanh %415 : vector<2x128xf32>
    %cst_110 = arith.constant 1.000000e+00 : f32
    %417 = vector.broadcast %cst_110 : f32 to vector<2x128xf32>
    %418 = arith.subf %417, %410 : vector<2x128xf32>
    %419 = arith.mulf %418, %416 : vector<2x128xf32>
    %420 = arith.mulf %410, %387 : vector<2x128xf32>
    %421 = arith.addf %419, %420 : vector<2x128xf32>
    %422 = vector.extract_strided_slice %421 {offsets = [0, 0], sizes = [2, 64], strides = [1, 1]} : vector<2x128xf32> to vector<2x64xf32>
    %c0_111 = arith.constant 0 : index
    %c0_112 = arith.constant 0 : index
    %c0_113 = arith.constant 0 : index
    %423 = vector.load %arg8[%c0_111, %c0_112, %c0_113] : memref<2x8x128xf32, #tpu.memory_space<vmem>>, vector<2x1x64xf32>
    %424 = vector.shape_cast %423 : vector<2x1x64xf32> to vector<2x64xf32>
    %425 = vector.shape_cast %422 : vector<2x64xf32> to vector<2x1x64xf32>
    tpu.vector_store %arg8[%c0_111, %c0_112, %c0_113], %425 {strides = array<i32>} : memref<2x8x128xf32, #tpu.memory_space<vmem>>, vector<2x1x64xf32>,
    %426 = vector.extract_strided_slice %421 {offsets = [0, 64], sizes = [2, 64], strides = [1, 1]} : vector<2x128xf32> to vector<2x64xf32>
    %c0_114 = arith.constant 0 : index
    %c7_115 = arith.constant 7 : index
    %c64_116 = arith.constant 64 : index
    %427 = vector.load %arg8[%c0_114, %c7_115, %c64_116] : memref<2x8x128xf32, #tpu.memory_space<vmem>>, vector<2x1x64xf32>
    %428 = vector.shape_cast %427 : vector<2x1x64xf32> to vector<2x64xf32>
    %429 = vector.shape_cast %426 : vector<2x64xf32> to vector<2x1x64xf32>
    tpu.vector_store %arg8[%c0_114, %c7_115, %c64_116], %429 {strides = array<i32>} : memref<2x8x128xf32, #tpu.memory_space<vmem>>, vector<2x1x64xf32>,
    %430 = vector.extract_strided_slice %379 {offsets = [0, 1, 0], sizes = [2, 1, 384], strides = [1, 1, 1]} : vector<2x8x384xf32> to vector<2x1x384xf32>
    %431 = vector.shape_cast %430 : vector<2x1x384xf32> to vector<2x384xf32>
    %432 = vector.extract_strided_slice %379 {offsets = [0, 6, 0], sizes = [2, 1, 384], strides = [1, 1, 1]} : vector<2x8x384xf32> to vector<2x1x384xf32>
    %433 = vector.shape_cast %432 : vector<2x1x384xf32> to vector<2x384xf32>
    %434 = arith.select %14, %431, %433 : vector<2x384xi1>, vector<2x384xf32>
    %435 = arith.truncf %421 : vector<2x128xf32> to vector<2x128xbf16>
    %cst_117 = arith.constant dense<0.000000e+00> : vector<2x384xf32>
    %436 = tpu.matmul %435, %381, %cst_117 {dimension_numbers = #tpu.dot_dimension_numbers<[1], [0], [0], [1], [0, 0, 1, 1], [], []>} : vector<2x128xbf16>, vector<128x384xbf16>, vector<2x384xf32> -> vector<2x384xf32>
    %437 = vector.extract_strided_slice %434 {offsets = [0, 0], sizes = [2, 128], strides = [1, 1]} : vector<2x384xf32> to vector<2x128xf32>
    %438 = vector.extract_strided_slice %436 {offsets = [0, 0], sizes = [2, 128], strides = [1, 1]} : vector<2x384xf32> to vector<2x128xf32>
    %439 = arith.addf %437, %438 : vector<2x128xf32>
    %440 = arith.negf %439 : vector<2x128xf32>
    %441 = math.exp %440 : vector<2x128xf32>
    %cst_118 = arith.constant 1.000000e+00 : f32
    %442 = vector.broadcast %cst_118 : f32 to vector<2x128xf32>
    %443 = arith.addf %442, %441 : vector<2x128xf32>
    %444 = arith.divf %442, %443 : vector<2x128xf32>
    %445 = vector.extract_strided_slice %434 {offsets = [0, 128], sizes = [2, 128], strides = [1, 1]} : vector<2x384xf32> to vector<2x128xf32>
    %446 = vector.extract_strided_slice %436 {offsets = [0, 128], sizes = [2, 128], strides = [1, 1]} : vector<2x384xf32> to vector<2x128xf32>
    %447 = arith.addf %445, %446 : vector<2x128xf32>
    %448 = arith.negf %447 : vector<2x128xf32>
    %449 = math.exp %448 : vector<2x128xf32>
    %cst_119 = arith.constant 1.000000e+00 : f32
    %450 = vector.broadcast %cst_119 : f32 to vector<2x128xf32>
    %451 = arith.addf %450, %449 : vector<2x128xf32>
    %452 = arith.divf %450, %451 : vector<2x128xf32>
    %453 = vector.extract_strided_slice %434 {offsets = [0, 256], sizes = [2, 128], strides = [1, 1]} : vector<2x384xf32> to vector<2x128xf32>
    %454 = vector.extract_strided_slice %436 {offsets = [0, 256], sizes = [2, 128], strides = [1, 1]} : vector<2x384xf32> to vector<2x128xf32>
    %455 = arith.addf %454, %385 : vector<2x128xf32>
    %456 = arith.mulf %444, %455 : vector<2x128xf32>
    %457 = arith.addf %453, %456 : vector<2x128xf32>
    %458 = math.tanh %457 : vector<2x128xf32>
    %cst_120 = arith.constant 1.000000e+00 : f32
    %459 = vector.broadcast %cst_120 : f32 to vector<2x128xf32>
    %460 = arith.subf %459, %452 : vector<2x128xf32>
    %461 = arith.mulf %460, %458 : vector<2x128xf32>
    %462 = arith.mulf %452, %421 : vector<2x128xf32>
    %463 = arith.addf %461, %462 : vector<2x128xf32>
    %464 = vector.extract_strided_slice %463 {offsets = [0, 0], sizes = [2, 64], strides = [1, 1]} : vector<2x128xf32> to vector<2x64xf32>
    %c0_121 = arith.constant 0 : index
    %c1_122 = arith.constant 1 : index
    %c0_123 = arith.constant 0 : index
    %465 = vector.load %arg8[%c0_121, %c1_122, %c0_123] : memref<2x8x128xf32, #tpu.memory_space<vmem>>, vector<2x1x64xf32>
    %466 = vector.shape_cast %465 : vector<2x1x64xf32> to vector<2x64xf32>
    %467 = vector.shape_cast %464 : vector<2x64xf32> to vector<2x1x64xf32>
    tpu.vector_store %arg8[%c0_121, %c1_122, %c0_123], %467 {strides = array<i32>} : memref<2x8x128xf32, #tpu.memory_space<vmem>>, vector<2x1x64xf32>,
    %468 = vector.extract_strided_slice %463 {offsets = [0, 64], sizes = [2, 64], strides = [1, 1]} : vector<2x128xf32> to vector<2x64xf32>
    %c0_124 = arith.constant 0 : index
    %c6_125 = arith.constant 6 : index
    %c64_126 = arith.constant 64 : index
    %469 = vector.load %arg8[%c0_124, %c6_125, %c64_126] : memref<2x8x128xf32, #tpu.memory_space<vmem>>, vector<2x1x64xf32>
    %470 = vector.shape_cast %469 : vector<2x1x64xf32> to vector<2x64xf32>
    %471 = vector.shape_cast %468 : vector<2x64xf32> to vector<2x1x64xf32>
    tpu.vector_store %arg8[%c0_124, %c6_125, %c64_126], %471 {strides = array<i32>} : memref<2x8x128xf32, #tpu.memory_space<vmem>>, vector<2x1x64xf32>,
    %472 = vector.extract_strided_slice %379 {offsets = [0, 2, 0], sizes = [2, 1, 384], strides = [1, 1, 1]} : vector<2x8x384xf32> to vector<2x1x384xf32>
    %473 = vector.shape_cast %472 : vector<2x1x384xf32> to vector<2x384xf32>
    %474 = vector.extract_strided_slice %379 {offsets = [0, 5, 0], sizes = [2, 1, 384], strides = [1, 1, 1]} : vector<2x8x384xf32> to vector<2x1x384xf32>
    %475 = vector.shape_cast %474 : vector<2x1x384xf32> to vector<2x384xf32>
    %476 = arith.select %14, %473, %475 : vector<2x384xi1>, vector<2x384xf32>
    %477 = arith.truncf %463 : vector<2x128xf32> to vector<2x128xbf16>
    %cst_127 = arith.constant dense<0.000000e+00> : vector<2x384xf32>
    %478 = tpu.matmul %477, %381, %cst_127 {dimension_numbers = #tpu.dot_dimension_numbers<[1], [0], [0], [1], [0, 0, 1, 1], [], []>} : vector<2x128xbf16>, vector<128x384xbf16>, vector<2x384xf32> -> vector<2x384xf32>
    %479 = vector.extract_strided_slice %476 {offsets = [0, 0], sizes = [2, 128], strides = [1, 1]} : vector<2x384xf32> to vector<2x128xf32>
    %480 = vector.extract_strided_slice %478 {offsets = [0, 0], sizes = [2, 128], strides = [1, 1]} : vector<2x384xf32> to vector<2x128xf32>
    %481 = arith.addf %479, %480 : vector<2x128xf32>
    %482 = arith.negf %481 : vector<2x128xf32>
    %483 = math.exp %482 : vector<2x128xf32>
    %cst_128 = arith.constant 1.000000e+00 : f32
    %484 = vector.broadcast %cst_128 : f32 to vector<2x128xf32>
    %485 = arith.addf %484, %483 : vector<2x128xf32>
    %486 = arith.divf %484, %485 : vector<2x128xf32>
    %487 = vector.extract_strided_slice %476 {offsets = [0, 128], sizes = [2, 128], strides = [1, 1]} : vector<2x384xf32> to vector<2x128xf32>
    %488 = vector.extract_strided_slice %478 {offsets = [0, 128], sizes = [2, 128], strides = [1, 1]} : vector<2x384xf32> to vector<2x128xf32>
    %489 = arith.addf %487, %488 : vector<2x128xf32>
    %490 = arith.negf %489 : vector<2x128xf32>
    %491 = math.exp %490 : vector<2x128xf32>
    %cst_129 = arith.constant 1.000000e+00 : f32
    %492 = vector.broadcast %cst_129 : f32 to vector<2x128xf32>
    %493 = arith.addf %492, %491 : vector<2x128xf32>
    %494 = arith.divf %492, %493 : vector<2x128xf32>
    %495 = vector.extract_strided_slice %476 {offsets = [0, 256], sizes = [2, 128], strides = [1, 1]} : vector<2x384xf32> to vector<2x128xf32>
    %496 = vector.extract_strided_slice %478 {offsets = [0, 256], sizes = [2, 128], strides = [1, 1]} : vector<2x384xf32> to vector<2x128xf32>
    %497 = arith.addf %496, %385 : vector<2x128xf32>
    %498 = arith.mulf %486, %497 : vector<2x128xf32>
    %499 = arith.addf %495, %498 : vector<2x128xf32>
    %500 = math.tanh %499 : vector<2x128xf32>
    %cst_130 = arith.constant 1.000000e+00 : f32
    %501 = vector.broadcast %cst_130 : f32 to vector<2x128xf32>
    %502 = arith.subf %501, %494 : vector<2x128xf32>
    %503 = arith.mulf %502, %500 : vector<2x128xf32>
    %504 = arith.mulf %494, %463 : vector<2x128xf32>
    %505 = arith.addf %503, %504 : vector<2x128xf32>
    %506 = vector.extract_strided_slice %505 {offsets = [0, 0], sizes = [2, 64], strides = [1, 1]} : vector<2x128xf32> to vector<2x64xf32>
    %c0_131 = arith.constant 0 : index
    %c2_132 = arith.constant 2 : index
    %c0_133 = arith.constant 0 : index
    %507 = vector.load %arg8[%c0_131, %c2_132, %c0_133] : memref<2x8x128xf32, #tpu.memory_space<vmem>>, vector<2x1x64xf32>
    %508 = vector.shape_cast %507 : vector<2x1x64xf32> to vector<2x64xf32>
    %509 = vector.shape_cast %506 : vector<2x64xf32> to vector<2x1x64xf32>
    tpu.vector_store %arg8[%c0_131, %c2_132, %c0_133], %509 {strides = array<i32>} : memref<2x8x128xf32, #tpu.memory_space<vmem>>, vector<2x1x64xf32>,
    %510 = vector.extract_strided_slice %505 {offsets = [0, 64], sizes = [2, 64], strides = [1, 1]} : vector<2x128xf32> to vector<2x64xf32>
    %c0_134 = arith.constant 0 : index
    %c5_135 = arith.constant 5 : index
    %c64_136 = arith.constant 64 : index
    %511 = vector.load %arg8[%c0_134, %c5_135, %c64_136] : memref<2x8x128xf32, #tpu.memory_space<vmem>>, vector<2x1x64xf32>
    %512 = vector.shape_cast %511 : vector<2x1x64xf32> to vector<2x64xf32>
    %513 = vector.shape_cast %510 : vector<2x64xf32> to vector<2x1x64xf32>
    tpu.vector_store %arg8[%c0_134, %c5_135, %c64_136], %513 {strides = array<i32>} : memref<2x8x128xf32, #tpu.memory_space<vmem>>, vector<2x1x64xf32>,
    %514 = vector.extract_strided_slice %379 {offsets = [0, 3, 0], sizes = [2, 1, 384], strides = [1, 1, 1]} : vector<2x8x384xf32> to vector<2x1x384xf32>
    %515 = vector.shape_cast %514 : vector<2x1x384xf32> to vector<2x384xf32>
    %516 = vector.extract_strided_slice %379 {offsets = [0, 4, 0], sizes = [2, 1, 384], strides = [1, 1, 1]} : vector<2x8x384xf32> to vector<2x1x384xf32>
    %517 = vector.shape_cast %516 : vector<2x1x384xf32> to vector<2x384xf32>
    %518 = arith.select %14, %515, %517 : vector<2x384xi1>, vector<2x384xf32>
    %519 = arith.truncf %505 : vector<2x128xf32> to vector<2x128xbf16>
    %cst_137 = arith.constant dense<0.000000e+00> : vector<2x384xf32>
    %520 = tpu.matmul %519, %381, %cst_137 {dimension_numbers = #tpu.dot_dimension_numbers<[1], [0], [0], [1], [0, 0, 1, 1], [], []>} : vector<2x128xbf16>, vector<128x384xbf16>, vector<2x384xf32> -> vector<2x384xf32>
    %521 = vector.extract_strided_slice %518 {offsets = [0, 0], sizes = [2, 128], strides = [1, 1]} : vector<2x384xf32> to vector<2x128xf32>
    %522 = vector.extract_strided_slice %520 {offsets = [0, 0], sizes = [2, 128], strides = [1, 1]} : vector<2x384xf32> to vector<2x128xf32>
    %523 = arith.addf %521, %522 : vector<2x128xf32>
    %524 = arith.negf %523 : vector<2x128xf32>
    %525 = math.exp %524 : vector<2x128xf32>
    %cst_138 = arith.constant 1.000000e+00 : f32
    %526 = vector.broadcast %cst_138 : f32 to vector<2x128xf32>
    %527 = arith.addf %526, %525 : vector<2x128xf32>
    %528 = arith.divf %526, %527 : vector<2x128xf32>
    %529 = vector.extract_strided_slice %518 {offsets = [0, 128], sizes = [2, 128], strides = [1, 1]} : vector<2x384xf32> to vector<2x128xf32>
    %530 = vector.extract_strided_slice %520 {offsets = [0, 128], sizes = [2, 128], strides = [1, 1]} : vector<2x384xf32> to vector<2x128xf32>
    %531 = arith.addf %529, %530 : vector<2x128xf32>
    %532 = arith.negf %531 : vector<2x128xf32>
    %533 = math.exp %532 : vector<2x128xf32>
    %cst_139 = arith.constant 1.000000e+00 : f32
    %534 = vector.broadcast %cst_139 : f32 to vector<2x128xf32>
    %535 = arith.addf %534, %533 : vector<2x128xf32>
    %536 = arith.divf %534, %535 : vector<2x128xf32>
    %537 = vector.extract_strided_slice %518 {offsets = [0, 256], sizes = [2, 128], strides = [1, 1]} : vector<2x384xf32> to vector<2x128xf32>
    %538 = vector.extract_strided_slice %520 {offsets = [0, 256], sizes = [2, 128], strides = [1, 1]} : vector<2x384xf32> to vector<2x128xf32>
    %539 = arith.addf %538, %385 : vector<2x128xf32>
    %540 = arith.mulf %528, %539 : vector<2x128xf32>
    %541 = arith.addf %537, %540 : vector<2x128xf32>
    %542 = math.tanh %541 : vector<2x128xf32>
    %cst_140 = arith.constant 1.000000e+00 : f32
    %543 = vector.broadcast %cst_140 : f32 to vector<2x128xf32>
    %544 = arith.subf %543, %536 : vector<2x128xf32>
    %545 = arith.mulf %544, %542 : vector<2x128xf32>
    %546 = arith.mulf %536, %505 : vector<2x128xf32>
    %547 = arith.addf %545, %546 : vector<2x128xf32>
    %548 = vector.extract_strided_slice %547 {offsets = [0, 0], sizes = [2, 64], strides = [1, 1]} : vector<2x128xf32> to vector<2x64xf32>
    %c0_141 = arith.constant 0 : index
    %c3_142 = arith.constant 3 : index
    %c0_143 = arith.constant 0 : index
    %549 = vector.load %arg8[%c0_141, %c3_142, %c0_143] : memref<2x8x128xf32, #tpu.memory_space<vmem>>, vector<2x1x64xf32>
    %550 = vector.shape_cast %549 : vector<2x1x64xf32> to vector<2x64xf32>
    %551 = vector.shape_cast %548 : vector<2x64xf32> to vector<2x1x64xf32>
    tpu.vector_store %arg8[%c0_141, %c3_142, %c0_143], %551 {strides = array<i32>} : memref<2x8x128xf32, #tpu.memory_space<vmem>>, vector<2x1x64xf32>,
    %552 = vector.extract_strided_slice %547 {offsets = [0, 64], sizes = [2, 64], strides = [1, 1]} : vector<2x128xf32> to vector<2x64xf32>
    %c0_144 = arith.constant 0 : index
    %c4_145 = arith.constant 4 : index
    %c64_146 = arith.constant 64 : index
    %553 = vector.load %arg8[%c0_144, %c4_145, %c64_146] : memref<2x8x128xf32, #tpu.memory_space<vmem>>, vector<2x1x64xf32>
    %554 = vector.shape_cast %553 : vector<2x1x64xf32> to vector<2x64xf32>
    %555 = vector.shape_cast %552 : vector<2x64xf32> to vector<2x1x64xf32>
    tpu.vector_store %arg8[%c0_144, %c4_145, %c64_146], %555 {strides = array<i32>} : memref<2x8x128xf32, #tpu.memory_space<vmem>>, vector<2x1x64xf32>,
    %556 = vector.extract_strided_slice %379 {offsets = [0, 4, 0], sizes = [2, 1, 384], strides = [1, 1, 1]} : vector<2x8x384xf32> to vector<2x1x384xf32>
    %557 = vector.shape_cast %556 : vector<2x1x384xf32> to vector<2x384xf32>
    %558 = vector.extract_strided_slice %379 {offsets = [0, 3, 0], sizes = [2, 1, 384], strides = [1, 1, 1]} : vector<2x8x384xf32> to vector<2x1x384xf32>
    %559 = vector.shape_cast %558 : vector<2x1x384xf32> to vector<2x384xf32>
    %560 = arith.select %14, %557, %559 : vector<2x384xi1>, vector<2x384xf32>
    %561 = arith.truncf %547 : vector<2x128xf32> to vector<2x128xbf16>
    %cst_147 = arith.constant dense<0.000000e+00> : vector<2x384xf32>
    %562 = tpu.matmul %561, %381, %cst_147 {dimension_numbers = #tpu.dot_dimension_numbers<[1], [0], [0], [1], [0, 0, 1, 1], [], []>} : vector<2x128xbf16>, vector<128x384xbf16>, vector<2x384xf32> -> vector<2x384xf32>
    %563 = vector.extract_strided_slice %560 {offsets = [0, 0], sizes = [2, 128], strides = [1, 1]} : vector<2x384xf32> to vector<2x128xf32>
    %564 = vector.extract_strided_slice %562 {offsets = [0, 0], sizes = [2, 128], strides = [1, 1]} : vector<2x384xf32> to vector<2x128xf32>
    %565 = arith.addf %563, %564 : vector<2x128xf32>
    %566 = arith.negf %565 : vector<2x128xf32>
    %567 = math.exp %566 : vector<2x128xf32>
    %cst_148 = arith.constant 1.000000e+00 : f32
    %568 = vector.broadcast %cst_148 : f32 to vector<2x128xf32>
    %569 = arith.addf %568, %567 : vector<2x128xf32>
    %570 = arith.divf %568, %569 : vector<2x128xf32>
    %571 = vector.extract_strided_slice %560 {offsets = [0, 128], sizes = [2, 128], strides = [1, 1]} : vector<2x384xf32> to vector<2x128xf32>
    %572 = vector.extract_strided_slice %562 {offsets = [0, 128], sizes = [2, 128], strides = [1, 1]} : vector<2x384xf32> to vector<2x128xf32>
    %573 = arith.addf %571, %572 : vector<2x128xf32>
    %574 = arith.negf %573 : vector<2x128xf32>
    %575 = math.exp %574 : vector<2x128xf32>
    %cst_149 = arith.constant 1.000000e+00 : f32
    %576 = vector.broadcast %cst_149 : f32 to vector<2x128xf32>
    %577 = arith.addf %576, %575 : vector<2x128xf32>
    %578 = arith.divf %576, %577 : vector<2x128xf32>
    %579 = vector.extract_strided_slice %560 {offsets = [0, 256], sizes = [2, 128], strides = [1, 1]} : vector<2x384xf32> to vector<2x128xf32>
    %580 = vector.extract_strided_slice %562 {offsets = [0, 256], sizes = [2, 128], strides = [1, 1]} : vector<2x384xf32> to vector<2x128xf32>
    %581 = arith.addf %580, %385 : vector<2x128xf32>
    %582 = arith.mulf %570, %581 : vector<2x128xf32>
    %583 = arith.addf %579, %582 : vector<2x128xf32>
    %584 = math.tanh %583 : vector<2x128xf32>
    %cst_150 = arith.constant 1.000000e+00 : f32
    %585 = vector.broadcast %cst_150 : f32 to vector<2x128xf32>
    %586 = arith.subf %585, %578 : vector<2x128xf32>
    %587 = arith.mulf %586, %584 : vector<2x128xf32>
    %588 = arith.mulf %578, %547 : vector<2x128xf32>
    %589 = arith.addf %587, %588 : vector<2x128xf32>
    %590 = vector.extract_strided_slice %589 {offsets = [0, 0], sizes = [2, 64], strides = [1, 1]} : vector<2x128xf32> to vector<2x64xf32>
    %c0_151 = arith.constant 0 : index
    %c4_152 = arith.constant 4 : index
    %c0_153 = arith.constant 0 : index
    %591 = vector.load %arg8[%c0_151, %c4_152, %c0_153] : memref<2x8x128xf32, #tpu.memory_space<vmem>>, vector<2x1x64xf32>
    %592 = vector.shape_cast %591 : vector<2x1x64xf32> to vector<2x64xf32>
    %593 = vector.shape_cast %590 : vector<2x64xf32> to vector<2x1x64xf32>
    tpu.vector_store %arg8[%c0_151, %c4_152, %c0_153], %593 {strides = array<i32>} : memref<2x8x128xf32, #tpu.memory_space<vmem>>, vector<2x1x64xf32>,
    %594 = vector.extract_strided_slice %589 {offsets = [0, 64], sizes = [2, 64], strides = [1, 1]} : vector<2x128xf32> to vector<2x64xf32>
    %c0_154 = arith.constant 0 : index
    %c3_155 = arith.constant 3 : index
    %c64_156 = arith.constant 64 : index
    %595 = vector.load %arg8[%c0_154, %c3_155, %c64_156] : memref<2x8x128xf32, #tpu.memory_space<vmem>>, vector<2x1x64xf32>
    %596 = vector.shape_cast %595 : vector<2x1x64xf32> to vector<2x64xf32>
    %597 = vector.shape_cast %594 : vector<2x64xf32> to vector<2x1x64xf32>
    tpu.vector_store %arg8[%c0_154, %c3_155, %c64_156], %597 {strides = array<i32>} : memref<2x8x128xf32, #tpu.memory_space<vmem>>, vector<2x1x64xf32>,
    %598 = vector.extract_strided_slice %379 {offsets = [0, 5, 0], sizes = [2, 1, 384], strides = [1, 1, 1]} : vector<2x8x384xf32> to vector<2x1x384xf32>
    %599 = vector.shape_cast %598 : vector<2x1x384xf32> to vector<2x384xf32>
    %600 = vector.extract_strided_slice %379 {offsets = [0, 2, 0], sizes = [2, 1, 384], strides = [1, 1, 1]} : vector<2x8x384xf32> to vector<2x1x384xf32>
    %601 = vector.shape_cast %600 : vector<2x1x384xf32> to vector<2x384xf32>
    %602 = arith.select %14, %599, %601 : vector<2x384xi1>, vector<2x384xf32>
    %603 = arith.truncf %589 : vector<2x128xf32> to vector<2x128xbf16>
    %cst_157 = arith.constant dense<0.000000e+00> : vector<2x384xf32>
    %604 = tpu.matmul %603, %381, %cst_157 {dimension_numbers = #tpu.dot_dimension_numbers<[1], [0], [0], [1], [0, 0, 1, 1], [], []>} : vector<2x128xbf16>, vector<128x384xbf16>, vector<2x384xf32> -> vector<2x384xf32>
    %605 = vector.extract_strided_slice %602 {offsets = [0, 0], sizes = [2, 128], strides = [1, 1]} : vector<2x384xf32> to vector<2x128xf32>
    %606 = vector.extract_strided_slice %604 {offsets = [0, 0], sizes = [2, 128], strides = [1, 1]} : vector<2x384xf32> to vector<2x128xf32>
    %607 = arith.addf %605, %606 : vector<2x128xf32>
    %608 = arith.negf %607 : vector<2x128xf32>
    %609 = math.exp %608 : vector<2x128xf32>
    %cst_158 = arith.constant 1.000000e+00 : f32
    %610 = vector.broadcast %cst_158 : f32 to vector<2x128xf32>
    %611 = arith.addf %610, %609 : vector<2x128xf32>
    %612 = arith.divf %610, %611 : vector<2x128xf32>
    %613 = vector.extract_strided_slice %602 {offsets = [0, 128], sizes = [2, 128], strides = [1, 1]} : vector<2x384xf32> to vector<2x128xf32>
    %614 = vector.extract_strided_slice %604 {offsets = [0, 128], sizes = [2, 128], strides = [1, 1]} : vector<2x384xf32> to vector<2x128xf32>
    %615 = arith.addf %613, %614 : vector<2x128xf32>
    %616 = arith.negf %615 : vector<2x128xf32>
    %617 = math.exp %616 : vector<2x128xf32>
    %cst_159 = arith.constant 1.000000e+00 : f32
    %618 = vector.broadcast %cst_159 : f32 to vector<2x128xf32>
    %619 = arith.addf %618, %617 : vector<2x128xf32>
    %620 = arith.divf %618, %619 : vector<2x128xf32>
    %621 = vector.extract_strided_slice %602 {offsets = [0, 256], sizes = [2, 128], strides = [1, 1]} : vector<2x384xf32> to vector<2x128xf32>
    %622 = vector.extract_strided_slice %604 {offsets = [0, 256], sizes = [2, 128], strides = [1, 1]} : vector<2x384xf32> to vector<2x128xf32>
    %623 = arith.addf %622, %385 : vector<2x128xf32>
    %624 = arith.mulf %612, %623 : vector<2x128xf32>
    %625 = arith.addf %621, %624 : vector<2x128xf32>
    %626 = math.tanh %625 : vector<2x128xf32>
    %cst_160 = arith.constant 1.000000e+00 : f32
    %627 = vector.broadcast %cst_160 : f32 to vector<2x128xf32>
    %628 = arith.subf %627, %620 : vector<2x128xf32>
    %629 = arith.mulf %628, %626 : vector<2x128xf32>
    %630 = arith.mulf %620, %589 : vector<2x128xf32>
    %631 = arith.addf %629, %630 : vector<2x128xf32>
    %632 = vector.extract_strided_slice %631 {offsets = [0, 0], sizes = [2, 64], strides = [1, 1]} : vector<2x128xf32> to vector<2x64xf32>
    %c0_161 = arith.constant 0 : index
    %c5_162 = arith.constant 5 : index
    %c0_163 = arith.constant 0 : index
    %633 = vector.load %arg8[%c0_161, %c5_162, %c0_163] : memref<2x8x128xf32, #tpu.memory_space<vmem>>, vector<2x1x64xf32>
    %634 = vector.shape_cast %633 : vector<2x1x64xf32> to vector<2x64xf32>
    %635 = vector.shape_cast %632 : vector<2x64xf32> to vector<2x1x64xf32>
    tpu.vector_store %arg8[%c0_161, %c5_162, %c0_163], %635 {strides = array<i32>} : memref<2x8x128xf32, #tpu.memory_space<vmem>>, vector<2x1x64xf32>,
    %636 = vector.extract_strided_slice %631 {offsets = [0, 64], sizes = [2, 64], strides = [1, 1]} : vector<2x128xf32> to vector<2x64xf32>
    %c0_164 = arith.constant 0 : index
    %c2_165 = arith.constant 2 : index
    %c64_166 = arith.constant 64 : index
    %637 = vector.load %arg8[%c0_164, %c2_165, %c64_166] : memref<2x8x128xf32, #tpu.memory_space<vmem>>, vector<2x1x64xf32>
    %638 = vector.shape_cast %637 : vector<2x1x64xf32> to vector<2x64xf32>
    %639 = vector.shape_cast %636 : vector<2x64xf32> to vector<2x1x64xf32>
    tpu.vector_store %arg8[%c0_164, %c2_165, %c64_166], %639 {strides = array<i32>} : memref<2x8x128xf32, #tpu.memory_space<vmem>>, vector<2x1x64xf32>,
    %640 = vector.extract_strided_slice %379 {offsets = [0, 6, 0], sizes = [2, 1, 384], strides = [1, 1, 1]} : vector<2x8x384xf32> to vector<2x1x384xf32>
    %641 = vector.shape_cast %640 : vector<2x1x384xf32> to vector<2x384xf32>
    %642 = vector.extract_strided_slice %379 {offsets = [0, 1, 0], sizes = [2, 1, 384], strides = [1, 1, 1]} : vector<2x8x384xf32> to vector<2x1x384xf32>
    %643 = vector.shape_cast %642 : vector<2x1x384xf32> to vector<2x384xf32>
    %644 = arith.select %14, %641, %643 : vector<2x384xi1>, vector<2x384xf32>
    %645 = arith.truncf %631 : vector<2x128xf32> to vector<2x128xbf16>
    %cst_167 = arith.constant dense<0.000000e+00> : vector<2x384xf32>
    %646 = tpu.matmul %645, %381, %cst_167 {dimension_numbers = #tpu.dot_dimension_numbers<[1], [0], [0], [1], [0, 0, 1, 1], [], []>} : vector<2x128xbf16>, vector<128x384xbf16>, vector<2x384xf32> -> vector<2x384xf32>
    %647 = vector.extract_strided_slice %644 {offsets = [0, 0], sizes = [2, 128], strides = [1, 1]} : vector<2x384xf32> to vector<2x128xf32>
    %648 = vector.extract_strided_slice %646 {offsets = [0, 0], sizes = [2, 128], strides = [1, 1]} : vector<2x384xf32> to vector<2x128xf32>
    %649 = arith.addf %647, %648 : vector<2x128xf32>
    %650 = arith.negf %649 : vector<2x128xf32>
    %651 = math.exp %650 : vector<2x128xf32>
    %cst_168 = arith.constant 1.000000e+00 : f32
    %652 = vector.broadcast %cst_168 : f32 to vector<2x128xf32>
    %653 = arith.addf %652, %651 : vector<2x128xf32>
    %654 = arith.divf %652, %653 : vector<2x128xf32>
    %655 = vector.extract_strided_slice %644 {offsets = [0, 128], sizes = [2, 128], strides = [1, 1]} : vector<2x384xf32> to vector<2x128xf32>
    %656 = vector.extract_strided_slice %646 {offsets = [0, 128], sizes = [2, 128], strides = [1, 1]} : vector<2x384xf32> to vector<2x128xf32>
    %657 = arith.addf %655, %656 : vector<2x128xf32>
    %658 = arith.negf %657 : vector<2x128xf32>
    %659 = math.exp %658 : vector<2x128xf32>
    %cst_169 = arith.constant 1.000000e+00 : f32
    %660 = vector.broadcast %cst_169 : f32 to vector<2x128xf32>
    %661 = arith.addf %660, %659 : vector<2x128xf32>
    %662 = arith.divf %660, %661 : vector<2x128xf32>
    %663 = vector.extract_strided_slice %644 {offsets = [0, 256], sizes = [2, 128], strides = [1, 1]} : vector<2x384xf32> to vector<2x128xf32>
    %664 = vector.extract_strided_slice %646 {offsets = [0, 256], sizes = [2, 128], strides = [1, 1]} : vector<2x384xf32> to vector<2x128xf32>
    %665 = arith.addf %664, %385 : vector<2x128xf32>
    %666 = arith.mulf %654, %665 : vector<2x128xf32>
    %667 = arith.addf %663, %666 : vector<2x128xf32>
    %668 = math.tanh %667 : vector<2x128xf32>
    %cst_170 = arith.constant 1.000000e+00 : f32
    %669 = vector.broadcast %cst_170 : f32 to vector<2x128xf32>
    %670 = arith.subf %669, %662 : vector<2x128xf32>
    %671 = arith.mulf %670, %668 : vector<2x128xf32>
    %672 = arith.mulf %662, %631 : vector<2x128xf32>
    %673 = arith.addf %671, %672 : vector<2x128xf32>
    %674 = vector.extract_strided_slice %673 {offsets = [0, 0], sizes = [2, 64], strides = [1, 1]} : vector<2x128xf32> to vector<2x64xf32>
    %c0_171 = arith.constant 0 : index
    %c6_172 = arith.constant 6 : index
    %c0_173 = arith.constant 0 : index
    %675 = vector.load %arg8[%c0_171, %c6_172, %c0_173] : memref<2x8x128xf32, #tpu.memory_space<vmem>>, vector<2x1x64xf32>
    %676 = vector.shape_cast %675 : vector<2x1x64xf32> to vector<2x64xf32>
    %677 = vector.shape_cast %674 : vector<2x64xf32> to vector<2x1x64xf32>
    tpu.vector_store %arg8[%c0_171, %c6_172, %c0_173], %677 {strides = array<i32>} : memref<2x8x128xf32, #tpu.memory_space<vmem>>, vector<2x1x64xf32>,
    %678 = vector.extract_strided_slice %673 {offsets = [0, 64], sizes = [2, 64], strides = [1, 1]} : vector<2x128xf32> to vector<2x64xf32>
    %c0_174 = arith.constant 0 : index
    %c1_175 = arith.constant 1 : index
    %c64_176 = arith.constant 64 : index
    %679 = vector.load %arg8[%c0_174, %c1_175, %c64_176] : memref<2x8x128xf32, #tpu.memory_space<vmem>>, vector<2x1x64xf32>
    %680 = vector.shape_cast %679 : vector<2x1x64xf32> to vector<2x64xf32>
    %681 = vector.shape_cast %678 : vector<2x64xf32> to vector<2x1x64xf32>
    tpu.vector_store %arg8[%c0_174, %c1_175, %c64_176], %681 {strides = array<i32>} : memref<2x8x128xf32, #tpu.memory_space<vmem>>, vector<2x1x64xf32>,
    %682 = vector.extract_strided_slice %379 {offsets = [0, 7, 0], sizes = [2, 1, 384], strides = [1, 1, 1]} : vector<2x8x384xf32> to vector<2x1x384xf32>
    %683 = vector.shape_cast %682 : vector<2x1x384xf32> to vector<2x384xf32>
    %684 = vector.extract_strided_slice %379 {offsets = [0, 0, 0], sizes = [2, 1, 384], strides = [1, 1, 1]} : vector<2x8x384xf32> to vector<2x1x384xf32>
    %685 = vector.shape_cast %684 : vector<2x1x384xf32> to vector<2x384xf32>
    %686 = arith.select %14, %683, %685 : vector<2x384xi1>, vector<2x384xf32>
    %687 = arith.truncf %673 : vector<2x128xf32> to vector<2x128xbf16>
    %cst_177 = arith.constant dense<0.000000e+00> : vector<2x384xf32>
    %688 = tpu.matmul %687, %381, %cst_177 {dimension_numbers = #tpu.dot_dimension_numbers<[1], [0], [0], [1], [0, 0, 1, 1], [], []>} : vector<2x128xbf16>, vector<128x384xbf16>, vector<2x384xf32> -> vector<2x384xf32>
    %689 = vector.extract_strided_slice %686 {offsets = [0, 0], sizes = [2, 128], strides = [1, 1]} : vector<2x384xf32> to vector<2x128xf32>
    %690 = vector.extract_strided_slice %688 {offsets = [0, 0], sizes = [2, 128], strides = [1, 1]} : vector<2x384xf32> to vector<2x128xf32>
    %691 = arith.addf %689, %690 : vector<2x128xf32>
    %692 = arith.negf %691 : vector<2x128xf32>
    %693 = math.exp %692 : vector<2x128xf32>
    %cst_178 = arith.constant 1.000000e+00 : f32
    %694 = vector.broadcast %cst_178 : f32 to vector<2x128xf32>
    %695 = arith.addf %694, %693 : vector<2x128xf32>
    %696 = arith.divf %694, %695 : vector<2x128xf32>
    %697 = vector.extract_strided_slice %686 {offsets = [0, 128], sizes = [2, 128], strides = [1, 1]} : vector<2x384xf32> to vector<2x128xf32>
    %698 = vector.extract_strided_slice %688 {offsets = [0, 128], sizes = [2, 128], strides = [1, 1]} : vector<2x384xf32> to vector<2x128xf32>
    %699 = arith.addf %697, %698 : vector<2x128xf32>
    %700 = arith.negf %699 : vector<2x128xf32>
    %701 = math.exp %700 : vector<2x128xf32>
    %cst_179 = arith.constant 1.000000e+00 : f32
    %702 = vector.broadcast %cst_179 : f32 to vector<2x128xf32>
    %703 = arith.addf %702, %701 : vector<2x128xf32>
    %704 = arith.divf %702, %703 : vector<2x128xf32>
    %705 = vector.extract_strided_slice %686 {offsets = [0, 256], sizes = [2, 128], strides = [1, 1]} : vector<2x384xf32> to vector<2x128xf32>
    %706 = vector.extract_strided_slice %688 {offsets = [0, 256], sizes = [2, 128], strides = [1, 1]} : vector<2x384xf32> to vector<2x128xf32>
    %707 = arith.addf %706, %385 : vector<2x128xf32>
    %708 = arith.mulf %696, %707 : vector<2x128xf32>
    %709 = arith.addf %705, %708 : vector<2x128xf32>
    %710 = math.tanh %709 : vector<2x128xf32>
    %cst_180 = arith.constant 1.000000e+00 : f32
    %711 = vector.broadcast %cst_180 : f32 to vector<2x128xf32>
    %712 = arith.subf %711, %704 : vector<2x128xf32>
    %713 = arith.mulf %712, %710 : vector<2x128xf32>
    %714 = arith.mulf %704, %673 : vector<2x128xf32>
    %715 = arith.addf %713, %714 : vector<2x128xf32>
    %716 = vector.extract_strided_slice %715 {offsets = [0, 0], sizes = [2, 64], strides = [1, 1]} : vector<2x128xf32> to vector<2x64xf32>
    %c0_181 = arith.constant 0 : index
    %c7_182 = arith.constant 7 : index
    %c0_183 = arith.constant 0 : index
    %717 = vector.load %arg8[%c0_181, %c7_182, %c0_183] : memref<2x8x128xf32, #tpu.memory_space<vmem>>, vector<2x1x64xf32>
    %718 = vector.shape_cast %717 : vector<2x1x64xf32> to vector<2x64xf32>
    %719 = vector.shape_cast %716 : vector<2x64xf32> to vector<2x1x64xf32>
    tpu.vector_store %arg8[%c0_181, %c7_182, %c0_183], %719 {strides = array<i32>} : memref<2x8x128xf32, #tpu.memory_space<vmem>>, vector<2x1x64xf32>,
    %720 = vector.extract_strided_slice %715 {offsets = [0, 64], sizes = [2, 64], strides = [1, 1]} : vector<2x128xf32> to vector<2x64xf32>
    %c0_184 = arith.constant 0 : index
    %c0_185 = arith.constant 0 : index
    %c64_186 = arith.constant 64 : index
    %721 = vector.load %arg8[%c0_184, %c0_185, %c64_186] : memref<2x8x128xf32, #tpu.memory_space<vmem>>, vector<2x1x64xf32>
    %722 = vector.shape_cast %721 : vector<2x1x64xf32> to vector<2x64xf32>
    %723 = vector.shape_cast %720 : vector<2x64xf32> to vector<2x1x64xf32>
    tpu.vector_store %arg8[%c0_184, %c0_185, %c64_186], %723 {strides = array<i32>} : memref<2x8x128xf32, #tpu.memory_space<vmem>>, vector<2x1x64xf32>,
    return
  }
  func.func @transform_0(%arg0: i32) -> (i32, i32, i32) {
    %c0_i32 = arith.constant 0 : i32
    %c0_i32_0 = arith.constant 0 : i32
    %c0_i32_1 = arith.constant 0 : i32
    return %arg0, %c0_i32, %c0_i32_0 : i32, i32, i32
  }
  func.func @transform_1(%arg0: i32) -> (i32, i32) {
    %c0_i32 = arith.constant 0 : i32
    %c0_i32_0 = arith.constant 0 : i32
    %c0_i32_1 = arith.constant 0 : i32
    return %c0_i32, %c0_i32_0 : i32, i32
  }
  func.func @transform_2(%arg0: i32) -> (i32, i32, i32) {
    %c0_i32 = arith.constant 0 : i32
    %c0_i32_0 = arith.constant 0 : i32
    %c0_i32_1 = arith.constant 0 : i32
    %c0_i32_2 = arith.constant 0 : i32
    return %c0_i32, %c0_i32_0, %c0_i32_1 : i32, i32, i32
  }
  func.func @transform_3(%arg0: i32) -> (i32, i32, i32) {
    %c0_i32 = arith.constant 0 : i32
    %c0_i32_0 = arith.constant 0 : i32
    %c0_i32_1 = arith.constant 0 : i32
    %c0_i32_2 = arith.constant 0 : i32
    return %c0_i32, %c0_i32_0, %c0_i32_1 : i32, i32, i32
  }
  func.func @transform_4(%arg0: i32) -> (i32, i32, i32) {
    %c0_i32 = arith.constant 0 : i32
    %c0_i32_0 = arith.constant 0 : i32
    %c0_i32_1 = arith.constant 0 : i32
    %c0_i32_2 = arith.constant 0 : i32
    return %c0_i32, %c0_i32_0, %c0_i32_1 : i32, i32, i32
  }
  func.func @transform_5(%arg0: i32) -> (i32, i32, i32) {
    %c0_i32 = arith.constant 0 : i32
    %c0_i32_0 = arith.constant 0 : i32
    %c0_i32_1 = arith.constant 0 : i32
    %c0_i32_2 = arith.constant 0 : i32
    return %c0_i32, %c0_i32_0, %c0_i32_1 : i32, i32, i32
  }
  func.func @transform_6(%arg0: i32) -> (i32, i32, i32) {
    %c0_i32 = arith.constant 0 : i32
    %c0_i32_0 = arith.constant 0 : i32
    %c0_i32_1 = arith.constant 0 : i32
    return %c0_i32, %arg0, %c0_i32_0 : i32, i32, i32
  }
  func.func @transform_7(%arg0: i32) -> (i32, i32, i32) {
    %c0_i32 = arith.constant 0 : i32
    %c0_i32_0 = arith.constant 0 : i32
    %c0_i32_1 = arith.constant 0 : i32
    return %arg0, %c0_i32, %c0_i32_0 : i32, i32, i32
  }
}

</mosaic_0001>

<bundles_post_ra>
// kernel: tpu_custom_call.1
= control target key start
LH: loop header
LB: loop body
LE: loop exit
PB: predicated region body
PF: predicated region fallthrough
CT: control target
= control target key end

     0   :  { %12 = vsyncpa [#allocation4], 0  ;;  %s5949_s0 = inlined_call_operand.hbm [shape: f32[2,8,32], index: 0, kind: input, shape index: {}]   ;;  %s5950_s1 = inlined_call_operand.hbm [shape: bf16[32,384], index: 1, kind: input, shape index: {}]   ;;  %s5951_s2 = inlined_call_operand.hbm [shape: bf16[1,128,384], index: 2, kind: input, shape index: {}]   ;;  %s5952_s3 = inlined_call_operand.hbm [shape: bf16[2,128,384], index: 3, kind: input, shape index: {}]   ;;  %s5953_s4 = inlined_call_operand.vmem [shape: f32[2,1,384], index: 4, kind: input, shape index: {}]   ;;  %s5954_s5 = inlined_call_operand.vmem [shape: f32[2,1,128], index: 5, kind: input, shape index: {}]   ;;  %s5955_s6 = inlined_call_operand.vmem [shape: f32[2,2,128], index: 6, kind: input, shape index: {}]   ;;  %s5956_s7 = inlined_call_operand.hbm [shape: f32[2,8,128], index: 7, kind: output, shape index: {}]  }
   0x1   :  { %13 = vsyncpa [#allocation7], 0 }
   0x2   :  { %14 = vsyncpa [#allocation10], 0 }
   0x3   :  { %15 = vsyncpa [#allocation5], 0  ;;  %s4321_s24 = smov [#allocation6]   ;;  %s4203_s28 = scalar_lea.hbm %s5950_s1, 768 }
   0x4   :  { %s33_s25 = sshll.u32 %s4321_s24, 4  ;;  %p4204_p0 = scmp.ne.s32.totalorder %s5950_s1, %s4203_s28  ;;  %s34_s25 = int_to_ptr.vmem [resolvable:$true] %s33_s25 }
   0x5   :  { %p4207_p1 = scmp.lt.u32.totalorder %s4203_s28, %s5950_s1 }
   0x7   :  { %p4209_p2 = pnand %p4207_p1, %p4204_p0 }
   0x9   :  { %4212 = shalt.err (!%p4209_p2)
}
   0xa   :  { %s4213_s10 = scalar_lea.vmem %s34_s25, 768  ;;  %p4218_p4 = scmp.lt.s32.totalorder %s34_s25, %s34_s25 }
   0xb   :  { %p4214_p3 = scmp.ne.s32.totalorder %s34_s25, %s4213_s10  ;;  %p4219_p5 = scmp.lt.s32.totalorder %s4213_s10, %s4213_s10 }
   0xd   :  { %p4220_p6 = por %p4219_p5, %p4218_p4 }
   0xf   :  { %p4221_p7 = pnand %p4220_p6, %p4214_p3 }
  0x11   :  { %4224 = shalt.err (!%p4221_p7)
}
  0x12   :  { %s4322_s11 = smov 192   ;;  %s4323_s12 = smov 12  }
  0x13   :  { %39 = dma.hbm_to_vmem [thread:$0]  %s5950_s1, 768, %s34_s25, [#allocation7], %s4322_s11, %s4322_s11, %s4323_s12  }
  0x14   :  { %s4324_s15 = smov [#allocation3]   ;;  %s4225_s19 = scalar_lea.hbm %s5949_s0, 256 }
  0x15   :  { %s21_s16 = sshll.u32 %s4324_s15, 4  ;;  %p4226_p8 = scmp.ne.s32.totalorder %s5949_s0, %s4225_s19  ;;  %s22_s16 = int_to_ptr.vmem [resolvable:$true] %s21_s16 }
  0x16   :  { %p4229_p9 = scmp.lt.u32.totalorder %s4225_s19, %s5949_s0 }
  0x18   :  { %p4231_p10 = pnand %p4229_p9, %p4226_p8 }
  0x1a   :  { %4234 = shalt.err (!%p4231_p10)
}
  0x1b   :  { %s4235_s24 = scalar_lea.vmem %s22_s16, 256  ;;  %p4240_p12 = scmp.lt.s32.totalorder %s22_s16, %s22_s16 }
  0x1c   :  { %p4236_p11 = scmp.ne.s32.totalorder %s22_s16, %s4235_s24  ;;  %p4241_p13 = scmp.lt.s32.totalorder %s4235_s24, %s4235_s24 }
  0x1e   :  { %p4242_p0 = por %p4241_p13, %p4240_p12 }
  0x20   :  { %p4243_p1 = pnand %p4242_p0, %p4236_p11 }
  0x22   :  { %4246 = shalt.err (!%p4243_p1)
}
  0x23   :  { %s4325_s1 = smov 128   ;;  %s4326_s25 = smov 8  }
  0x24   :  { %27 = dma.hbm_to_vmem [thread:$0]  %s5949_s0, 256, %s22_s16, [#allocation4], %s4325_s1, %s4325_s1, %s4326_s25  }
  0x25   :  { %s4327_s28 = smov [#allocation8]   ;;  %s4328_s30 = smov [#allocation9]  }
  0x26   :  { %s45_s29 = sshll.u32 %s4327_s28, 4  ;;  %s57_s8 = sshll.u32 %s4328_s30, 4  ;;  %s46_s29 = int_to_ptr.vmem [resolvable:$true] %s45_s29  ;;  %s4404_s8 = int_to_ptr.vmem [resolvable:$true] %s57_s8 }
  0x27   :  { %s4247_s13 = scalar_lea.hbm %s5951_s2, 3072 }
  0x28   :  { %p4248_p2 = scmp.ne.s32.totalorder %s5951_s2, %s4247_s13  ;;  %p4251_p3 = scmp.lt.u32.totalorder %s4247_s13, %s5951_s2 }
  0x2a   :  { %p4253_p4 = pnand %p4251_p3, %p4248_p2 }
  0x2c   :  { %4256 = shalt.err (!%p4253_p4)
}
  0x2d   :  { %s4257_s0 = scalar_lea.vmem %s46_s29, 3072  ;;  %p4262_p6 = scmp.lt.s32.totalorder %s46_s29, %s46_s29 }
  0x2e   :  { %p4258_p5 = scmp.ne.s32.totalorder %s46_s29, %s4257_s0  ;;  %p4263_p7 = scmp.lt.s32.totalorder %s4257_s0, %s4257_s0 }
  0x30   :  { %p4264_p8 = por %p4263_p7, %p4262_p6 }
  0x32   :  { %p4265_p9 = pnand %p4264_p8, %p4258_p5 }
  0x34   :  { %4268 = shalt.err (!%p4265_p9)
}
  0x35   :  { %51 = dma.hbm_to_vmem [thread:$0]  %s5951_s2, 3072, %s46_s29, [#allocation7], %s4322_s11, %s4322_s11, %s4323_s12  }
  0x36   :  { %s4269_s22 = scalar_lea.hbm %s5952_s3, 6144 }
  0x37   :  { %p4270_p10 = scmp.ne.s32.totalorder %s5952_s3, %s4269_s22  ;;  %p4273_p11 = scmp.lt.u32.totalorder %s4269_s22, %s5952_s3 }
  0x39   :  { %p4275_p12 = pnand %p4273_p11, %p4270_p10 }
  0x3b   :  { %4278 = shalt.err (!%p4275_p12)
}
  0x3c   :  { %s4279_s28 = scalar_lea.vmem %s4404_s8, 6144  ;;  %p4284_p0 = scmp.lt.s32.totalorder %s4404_s8, %s4404_s8 }
  0x3d   :  { %p4280_p13 = scmp.ne.s32.totalorder %s4404_s8, %s4279_s28  ;;  %p4285_p1 = scmp.lt.s32.totalorder %s4279_s28, %s4279_s28 }
  0x3f   :  { %p4286_p2 = por %p4285_p1, %p4284_p0 }
  0x41   :  { %p4287_p3 = pnand %p4286_p2, %p4280_p13 }
  0x43   :  { %4290 = shalt.err (!%p4287_p3)
}
  0x44   :  { %63 = dma.hbm_to_vmem [thread:$0]  %s5952_s3, 6144, %s4404_s8, [#allocation10], %s4322_s11, %s4322_s11, %s4323_s12  }
  0x45   :  { %4313 = dma.done.wait [#allocation4], 256  }
  0x46   :  { %4314 = vsyncadd [#allocation4], 4294967040 }
  0x47   :  { %4315 = dma.done.wait [#allocation7], 3840  }
  0x48   :  { %4316 = vsyncadd [#allocation7], 4294963456 }
  0x49   :  { %4317 = dma.done.wait [#allocation10], 6144  }
  0x4a   :  { %4318 = vsyncadd [#allocation10], 4294961152  ;;  %v5960_v0 = vmov 0   ;;  %v5962_v1 = vmov 0.0   ;;  %vm4331_vm0 = vmmov 0   ;;  %v114_v6 = vld [vmem:[#allocation3] sm:$0xff]  ;;  %v83_v37 = vlaneseq }
  0x4b   :  { %210 = vmatprep.mubr.bf16.mxu0 %v5960_v0  ;;  %3529 = vmatprep.subr.bf16.mxu1 %v5962_v1  ;;  %v3890_v2 = vld [vmem:[#allocation6 + $0x4] ss:$12 sps:$4 sm:$0xff]   ;;  %v3892_v3 = vld [vmem:[#allocation6] ss:$12 sps:$4 sm:$0xff]   ;;  %v3893_v4 = vld [vmem:[#allocation6 + $0x1c] ss:$12 sps:$4 sm:$0xff]  }
  0x4c   :  { %3533 = vmatprep.mubr.msk.bf16.mxu1 %vm4331_vm0, %v5962_v1  ;;  %178 = vmatprep.subr.bf16.mxu0 %v3890_v2  ;;  %v3895_v5 = vld [vmem:[#allocation6 + $0x18] ss:$12 sps:$4 sm:$0xff]   ;;  %v4445_v8 = vld [vmem:[#allocation9 + $0x4] ss:$12 sps:$4 sm:$0xff]   ;;  %vm174_vm1 = vcmask 261120   ;;  %v4575_v38 = vshrl.u32 %v83_v37, 7 }
  0x4d   :  { %179 = vmatpush1.bf16.msra.mxu0 %v3892_v3  ;;  %v115_v7 = vld [vmem:[#allocation3 + $0x8] sm:$0xff]  ;;  %5998 = vst [vmem:[#allocation16_spill] sm:$0xff] %v4445_v8  ;;  %v3908_v12 = vld [vmem:[#allocation6 + $0x8] ss:$12 sps:$4 sm:$0xff]   ;;  %v3912_v14 = vld [vmem:[#allocation6 + $0x20] ss:$12 sps:$4 sm:$0xff]  }
  0x4e   :  { %180 = vmatprep.subr.bf16.mxu0 %v3893_v4  ;;  %v124_v9 = vpack.c.bf16 %v115_v7, %v114_v6  ;;  %v4447_v10 = vld [vmem:[#allocation9] ss:$12 sps:$4 sm:$0xff]   ;;  %v4450_v11 = vld [vmem:[#allocation9 + $0x1c] ss:$12 sps:$4 sm:$0xff]   ;;  %v4453_v13 = vld [vmem:[#allocation9 + $0x18] ss:$12 sps:$4 sm:$0xff]   ;;  %3530 = vmatpush3.bf16.msra.mxu1 %v3908_v12 }
  0x4f   :  { %v4457_v15 = vld [vmem:[#allocation9 + $0x34] ss:$12 sps:$4 sm:$0xff]   ;;  %3531 = vmatprep.subr.bf16.mxu1 %v5962_v1  ;;  %v4462_v16 = vld [vmem:[#allocation9 + $0x30] ss:$12 sps:$4 sm:$0xff]   ;;  %v4467_v18 = vld [vmem:[#allocation9 + $0x4c] ss:$12 sps:$4 sm:$0xff]  }
  0x50   :  { %v4464_v17 = vld [vmem:[#allocation9 + $0x8] ss:$12 sps:$4 sm:$0xff]   ;;  %v4475_v20 = vld [vmem:[#allocation9 + $0x20] ss:$12 sps:$4 sm:$0xff]   ;;  %v4478_v21 = vld [vmem:[#allocation9 + $0x64] ss:$12 sps:$4 sm:$0xff]  }
  0x51   :  { %181 = vmatpush1.bf16.msra.mxu0 %v3895_v5  ;;  %v4470_v19 = vld [vmem:[#allocation9 + $0x48] ss:$12 sps:$4 sm:$0xff]   ;;  %v4483_v22 = vld [vmem:[#allocation9 + $0x60] ss:$12 sps:$4 sm:$0xff]   ;;  %v4487_v23 = vld [vmem:[#allocation9 + $0x38] ss:$12 sps:$4 sm:$0xff]  }
  0x52   :  { %462 = vmatprep.subr.bf16.mxu0 %v4445_v8  ;;  %3532 = vmatpush3.bf16.msra.mxu1 %v3912_v14  ;;  %v4490_v24 = vld [vmem:[#allocation9 + $0x7c] ss:$12 sps:$4 sm:$0xff]   ;;  %v4493_v25 = vld [vmem:[#allocation9 + $0x78] ss:$12 sps:$4 sm:$0xff]   ;;  %v4497_v27 = vld [vmem:[#allocation9 + $0x94] ss:$12 sps:$4 sm:$0xff]  }
  0x53   :  { %3537 = vmatprep.subr.bf16.mxu1 %v5962_v1  ;;  %v4495_v26 = vld [vmem:[#allocation9 + $0x50] ss:$12 sps:$4 sm:$0xff]   ;;  %v4505_v29 = vld [vmem:[#allocation9 + $0x68] ss:$12 sps:$4 sm:$0xff]   ;;  %v4507_v30 = vld [vmem:[#allocation9 + $0xac] ss:$12 sps:$4 sm:$0xff]  }
  0x54   :  { %3262 = vmatmul.mubr.msk.bf16.vlgmr.msra.gmra.mrb[0].mxu0 %vm174_vm1, %v124_v9  ;;  %v4503_v28 = vld [vmem:[#allocation9 + $0x90] ss:$12 sps:$4 sm:$0xff]   ;;  %6000 = vst [vmem:[#allocation18_spill] sm:$0xff] %v4507_v30  ;;  %v4513_v31 = vld [vmem:[#allocation9 + $0xa8] ss:$12 sps:$4 sm:$0xff]   ;;  %6004 = vst [vmem:[#allocation22_spill] sm:$0xff] %v4575_v38 }
  0x55   :  { %463 = vmatpush1.bf16.msra.mxu0 %v4447_v10  ;;  %494 = vmatprep.mubr.bf16.mxu0 %v5960_v0  ;;  %5999 = vst [vmem:[#allocation17_spill] sm:$0xff] %v4503_v28  ;;  %6001 = vst [vmem:[#allocation19_spill] sm:$0xff] %v4513_v31  ;;  %v4518_v32 = vld [vmem:[%s5955_s6] sm:$0x3]  ;;  %v4520_v33 = vld [vmem:[#allocation9 + $0x80] ss:$12 sps:$4 sm:$0xff]  }
  0x56   :  { %464 = vmatprep.subr.bf16.mxu0 %v4450_v11  ;;  %3534 = vmatmul.mubr.msk.bf16.vlgmr.msra.gmra.mrb[0].mxu1 %vm174_vm1, %v124_v9  ;;  %v4526_v34 = vld [vmem:[#allocation9 + $0x98] ss:$12 sps:$4 sm:$0xff]   ;;  %v333_v35 = vpack.c.bf16 %v4518_v32, %v4518_v32  ;;  %v4534_v36 = vld [vmem:[#allocation9 + $0xb0] ss:$12 sps:$4 sm:$0xff]   ;;  %v5959_v39 = vsub.s32 0, %v4575_v38  ;;  %v4578_v40 = vand.u32 127, %v83_v37 }
  0x57   :  { %3538 = vmatpush3.bf16.msra.mxu1 %v4464_v17  ;;  %3553 = vmatprep.mubr.msk.bf16.mxu1 %vm4331_vm0, %v5962_v1  ;;  %6002 = vst [vmem:[#allocation20_spill] sm:$0xff] %v4526_v34  ;;  %6003 = vst [vmem:[#allocation21_spill] sm:$0xff] %v4534_v36  ;;  %v125_v41 = vld [vmem:[%s5953_s4] sm:$0x7]  ;;  %v5957_v42 = vsub.s32 1, %v4575_v38  ;;  %v5958_v46 = vsub.s32 2, %v4575_v38 }
  0x58   :  { %3539 = vmatprep.subr.bf16.mxu1 %v5962_v1  ;;  %6005 = vst [vmem:[#allocation23_spill] sm:$0xff] %v4578_v40  ;;  %v130_v43 = vrot.slane %v125_v41, %v5959_v39  ;;  %v4587_v44 = vadd.s32 128, %v4578_v40  ;;  %v4593_v48 = vadd.s32 256, %v4578_v40  ;;  %vm87_vm2 = vcmp.lt.s32.totalorder %v4578_v40, 64 }
  0x59   :  { %465 = vmatpush1.bf16.msra.mxu0 %v4453_v13  ;;  %v134_v45 = vrot.slane %v125_v41, %v5957_v42  ;;  %v138_v53 = vrot.slane %v125_v41, %v5958_v46  ;;  %vm309_vm4 = vcmask 1041409   ;;  %vm590_vm6 = vcmask 516096  }
  0x5a   :  { %466 = vmatprep.subr.bf16.mxu0 %v4457_v15  ;;  %6006 = vst [vmem:[#allocation24_spill] sm:$0xff] %v4587_v44  ;;  %6007 = vst [vmem:[#allocation25_spill] sm:$0xff] %v4593_v48  ;;  %vm94_vm3 = vcmp.lt.s32.totalorder %v4587_v44, 192  ;;  %vm107_vm5 = vcmp.lt.s32.totalorder %v4593_v48, 320  ;;  %vm593_vm7 = vcmask 1040896  }
  0x5b   :  { %3540 = vmatpush3.bf16.msra.mxu1 %v4475_v20 }
  0x5c   :  { %3541 = vmatprep.subr.bf16.mxu1 %v5962_v1 }
  0x5d   :  { %467 = vmatpush1.bf16.msra.mxu0 %v4462_v16 }
  0x5e   :  { %468 = vmatprep.subr.bf16.mxu0 %v4467_v18 }
  0x5f   :  { %3542 = vmatpush3.bf16.msra.mxu1 %v4487_v23 }
  0x60   :  { %3543 = vmatprep.subr.bf16.mxu1 %v5962_v1 }
  0x61   :  { %469 = vmatpush1.bf16.msra.mxu0 %v4470_v19 }
  0x62   :  { %470 = vmatprep.subr.bf16.mxu0 %v4478_v21 }
  0x63   :  { %3544 = vmatpush3.bf16.msra.mxu1 %v4495_v26 }
  0x64   :  { %3545 = vmatprep.subr.bf16.mxu1 %v5962_v1 }
  0x65   :  { %471 = vmatpush1.bf16.msra.mxu0 %v4483_v22 }
  0x66   :  { %472 = vmatprep.subr.bf16.mxu0 %v4490_v24 }
  0x67   :  { %3546 = vmatpush3.bf16.msra.mxu1 %v4505_v29 }
  0x68   :  { %3547 = vmatprep.subr.bf16.mxu1 %v5962_v1 }
  0x69   :  { %473 = vmatpush1.bf16.msra.mxu0 %v4493_v25 }
  0x6a   :  { %474 = vmatprep.subr.bf16.mxu0 %v4497_v27 }
  0x6b   :  { %3548 = vmatpush3.bf16.msra.mxu1 %v4520_v33 }
  0x6c   :  { %3549 = vmatprep.subr.bf16.mxu1 %v5962_v1 }
  0x6d   :  { %475 = vmatpush1.bf16.msra.mxu0 %v4503_v28 }
  0x6e   :  { %476 = vmatprep.subr.bf16.mxu0 %v4507_v30 }
  0x6f   :  { %3550 = vmatpush3.bf16.msra.mxu1 %v4526_v34 }
  0x70   :  { %3551 = vmatprep.subr.bf16.mxu1 %v5962_v1 }
  0x71   :  { %477 = vmatpush1.bf16.msra.mxu0 %v4513_v31 }
  0x72   :  { %621 = vmatprep.subr.bf16.mxu0 %v4445_v8 }
  0x73   :  { %3552 = vmatpush3.bf16.msra.mxu1 %v4534_v36 }
  0x74   :  { %495 = vmatmul.mubr.bf16.vlgmr.msra.gmra.mrb[4].mxu0 %v333_v35  ;;  %3557 = vmatprep.subr.bf16.mxu1 %v5962_v1 }
  0x75   :  { %622 = vmatpush1.bf16.msra.mxu0 %v4447_v10  ;;  %653 = vmatprep.mubr.bf16.mxu0 %v5960_v0 }
  0x76   :  { %623 = vmatprep.subr.bf16.mxu0 %v4450_v11  ;;  %3554 = vmatmul.mubr.bf16.vlgmr.msra.gmra.mrb[4].mxu1 %v333_v35 }
  0x77   :  { %3558 = vmatpush3.bf16.msra.mxu1 %v4464_v17  ;;  %3573 = vmatprep.mubr.msk.bf16.mxu1 %vm4331_vm0, %v5962_v1 }
  0x78   :  { %3559 = vmatprep.subr.bf16.mxu1 %v5962_v1 }
  0x79   :  { %624 = vmatpush1.bf16.msra.mxu0 %v4453_v13 }
  0x7a   :  { %625 = vmatprep.subr.bf16.mxu0 %v4457_v15 }
  0x7b   :  { %3560 = vmatpush3.bf16.msra.mxu1 %v4475_v20 }
  0x7c   :  { %3561 = vmatprep.subr.bf16.mxu1 %v5962_v1 }
  0x7d   :  { %626 = vmatpush1.bf16.msra.mxu0 %v4462_v16 }
  0x7e   :  { %627 = vmatprep.subr.bf16.mxu0 %v4467_v18 }
  0x7f   :  { %3562 = vmatpush3.bf16.msra.mxu1 %v4487_v23 }
  0x80   :  { %3563 = vmatprep.subr.bf16.mxu1 %v5962_v1 }
  0x81   :  { %628 = vmatpush1.bf16.msra.mxu0 %v4470_v19 }
  0x82   :  { %629 = vmatprep.subr.bf16.mxu0 %v4478_v21 }
  0x83   :  { %3564 = vmatpush3.bf16.msra.mxu1 %v4495_v26 }
  0x84   :  { %3565 = vmatprep.subr.bf16.mxu1 %v5962_v1 }
  0x85   :  { %630 = vmatpush1.bf16.msra.mxu0 %v4483_v22 }
  0x86   :  { %631 = vmatprep.subr.bf16.mxu0 %v4490_v24 }
  0x87   :  { %3566 = vmatpush3.bf16.msra.mxu1 %v4505_v29 }
  0x88   :  { %3567 = vmatprep.subr.bf16.mxu1 %v5962_v1 }
  0x89   :  { %632 = vmatpush1.bf16.msra.mxu0 %v4493_v25 }
  0x8a   :  { %633 = vmatprep.subr.bf16.mxu0 %v4497_v27 }
  0x8b   :  { %3568 = vmatpush3.bf16.msra.mxu1 %v4520_v33 }
  0x8c   :  { %3569 = vmatprep.subr.bf16.mxu1 %v5962_v1 }
  0x8d   :  { %634 = vmatpush1.bf16.msra.mxu0 %v4503_v28 }
  0x8e   :  { %635 = vmatprep.subr.bf16.mxu0 %v4507_v30 }
  0x8f   :  { %3570 = vmatpush3.bf16.msra.mxu1 %v4526_v34 }
  0x90   :  { %3571 = vmatprep.subr.bf16.mxu1 %v5962_v1 }
  0x91   :  { %636 = vmatpush1.bf16.msra.mxu0 %v4513_v31 }
  0x92   :  { %781 = vmatprep.subr.bf16.mxu0 %v4445_v8 }
  0x93   :  { %3572 = vmatpush3.bf16.msra.mxu1 %v4534_v36 }
  0x94   :  { %3577 = vmatprep.subr.bf16.mxu1 %v5962_v1 }
 0x127   :  { %v212_v47 = vpop.f32.mrb[0].mxu0 }
 0x128   :  { %v4596_v49 = vadd.f32 %v212_v47, %v130_v43  ;;  %v214_v50 = vpop.f32.mrb[1].mxu0 }
 0x129   :  { %v4599_v51 = vadd.f32 %v214_v50, %v134_v45  ;;  %v216_v52 = vpop.f32.mrb[2].mxu0  ;;  %v255_v41 = vpop.f32.mrb[0].mxu1 }
 0x12a   :  { %v4603_v54 = vadd.f32 %v216_v52, %v130_v43  ;;  %v218_v55 = vpop.f32.mrb[3].mxu0  ;;  %v318_v56 = vrot.slane %v4596_v49, 7  ;;  %v596_v57 = vrot.slane %v4596_v49, 1  ;;  %v605_v58 = vrot.slane %v4596_v49, 6 }
 0x12b   :  { %v4608_v59 = vadd.f32 %v218_v55, %v134_v45  ;;  %v321_v60 = vrot.slane %v4599_v51, 7  ;;  %v598_v61 = vrot.slane %v4599_v51, 1  ;;  %v608_v62 = vrot.slane %v4599_v51, 6  ;;  %v3535_v55 = vpop.f32.mrb[1].mxu1 }
 0x12c   :  { %v308_v63 = vrot.slane %v4603_v54, 7  ;;  %v319_v2 = vrot.slane %v4603_v54, 6  ;;  %v4618_v3 = vsel %vm309_vm4, %v4603_v54, %v596_v57  ;;  %v606_v4 = vrot.slane %v4603_v54, 5 }
 0x12d   :  { %v311_v5 = vrot.slane %v4608_v59, 7  ;;  %v322_v6 = vrot.slane %v4608_v59, 6  ;;  %v4625_v7 = vsel %vm309_vm4, %v4608_v59, %v598_v61  ;;  %v609_v9 = vrot.slane %v4608_v59, 5 }
 0x12e   :  { %v4630_v12 = vsel %vm309_vm4, %v308_v63, %v4596_v49  ;;  %v4633_v14 = vsel %vm309_vm4, %v319_v2, %v318_v56  ;;  %v4636_v35 = vsel %vm309_vm4, %v606_v4, %v605_v58  ;;  %v753_v37 = vrot.slane %v4596_v49, 2 }
 0x12f   :  { %v4643_v43 = vsel %vm87_vm2, %v4630_v12, %v4633_v14  ;;  %v4647_v45 = vsel %vm309_vm4, %v311_v5, %v4599_v51  ;;  %v4650_v47 = vsel %vm309_vm4, %v322_v6, %v321_v60  ;;  %v4656_v50 = vsel %vm87_vm2, %v4618_v3, %v4636_v35  ;;  %v258_v60 = vpop.f32.mrb[2].mxu1 }
 0x130   :  { %6008 = vst [vmem:[#allocation26_spill] sm:$0xff] %v4656_v50  ;;  %v256_v52 = vadd.f32 %v255_v41, %v138_v53  ;;  %v4662_v56 = vsel %vm94_vm3, %v4647_v45, %v4650_v47  ;;  %v4665_v57 = vsel %vm309_vm4, %v609_v9, %v608_v62  ;;  %v754_v58 = vrot.slane %v4603_v54, 1  ;;  %v3536_v6 = vpop.f32.mrb[3].mxu1 }
 0x131   :  { %v4672_v61 = vsel %vm94_vm3, %v4625_v7, %v4665_v57  ;;  %v765_v63 = vrot.slane %v4596_v49, 5  ;;  %v766_v2 = vrot.slane %v4603_v54, 4  ;;  %v756_v4 = vrot.slane %v4599_v51, 2 }
 0x132   :  { %6009 = vst [vmem:[#allocation27_spill] sm:$0xff] %v4672_v61  ;;  %v259_v5 = vadd.f32 %v258_v60, %v138_v53  ;;  %v324_v41 = vrot.slane %v256_v52, 7  ;;  %v600_v62 = vrot.slane %v256_v52, 1  ;;  %v611_v9 = vrot.slane %v256_v52, 6 }
 0x133   :  { %v755_v55 = vsel %vm309_vm4, %v754_v58, %v753_v37  ;;  %v767_v42 = vsel %vm309_vm4, %v766_v2, %v765_v63  ;;  %v759_v46 = vrot.slane %v256_v52, 2  ;;  %v771_v39 = vrot.slane %v256_v52, 5 }
 0x134   :  { %v313_v0 = vrot.slane %v259_v5, 7  ;;  %v325_v1 = vrot.slane %v259_v5, 6  ;;  %v601_v61 = vsel %vm309_vm4, %v259_v5, %v600_v62  ;;  %v612_v50 = vrot.slane %v259_v5, 5 }
 0x135   :  { %v4682_v8 = vsel %vm87_vm2, %v755_v55, %v767_v42  ;;  %v760_v53 = vrot.slane %v259_v5, 1  ;;  %v772_v60 = vrot.slane %v259_v5, 4  ;;  %v757_v6 = vrot.slane %v4608_v59, 1 }
 0x136   :  { %6010 = vst [vmem:[#allocation28_spill] sm:$0xff] %v4682_v8  ;;  %v314_v36 = vsel %vm309_vm4, %v313_v0, %v256_v52  ;;  %v326_v37 = vsel %vm309_vm4, %v325_v1, %v324_v41  ;;  %v613_v58 = vsel %vm309_vm4, %v612_v50, %v611_v9  ;;  %v768_v63 = vrot.slane %v4599_v51, 5 }
 0x137   :  { %v4691_v2 = vsel %vm107_vm5, %v314_v36, %v326_v37  ;;  %v4695_v62 = vsel %vm107_vm5, %v601_v61, %v613_v58  ;;  %v761_v8 = vsel %vm309_vm4, %v760_v53, %v759_v46  ;;  %v773_v31 = vsel %vm309_vm4, %v772_v60, %v771_v39 }
 0x138   :  { %6011 = vst [vmem:[#allocation29_spill] sm:$0xff] %v4695_v62  ;;  %v4701_v0 = vsel %vm107_vm5, %v761_v8, %v773_v31  ;;  %v758_v1 = vsel %vm309_vm4, %v757_v6, %v756_v4  ;;  %v769_v50 = vrot.slane %v4608_v59, 4  ;;  %v913_v41 = vrot.slane %v4596_v49, 3 }
 0x139   :  { %6012 = vst [vmem:[#allocation30_spill] sm:$0xff] %v4701_v0  ;;  %v914_v9 = vrot.slane %v4603_v54, 2  ;;  %v925_v30 = vrot.slane %v4596_v49, 4  ;;  %v926_v62 = vrot.slane %v4603_v54, 3  ;;  %v919_v34 = vrot.slane %v256_v52, 3 }
 0x13a   :  { %v770_v46 = vsel %vm309_vm4, %v769_v50, %v768_v63  ;;  %v920_v39 = vrot.slane %v259_v5, 2  ;;  %v931_v53 = vrot.slane %v256_v52, 4  ;;  %v932_v60 = vrot.slane %v259_v5, 3 }
 0x13b   :  { %v4712_v0 = vsel %vm94_vm3, %v758_v1, %v770_v46  ;;  %v915_v4 = vsel %vm309_vm4, %v914_v9, %v913_v41  ;;  %v927_v6 = vsel %vm309_vm4, %v926_v62, %v925_v30  ;;  %v916_v28 = vrot.slane %v4599_v51, 3 }
 0x13c   :  { %v4719_v49 = vsel %vm87_vm2, %v915_v4, %v927_v6  ;;  %v921_v54 = vsel %vm309_vm4, %v920_v39, %v919_v34  ;;  %v933_v63 = vsel %vm309_vm4, %v932_v60, %v931_v53  ;;  %v917_v52 = vrot.slane %v4608_v59, 2 }
 0x13d   :  { %v4726_v5 = vsel %vm107_vm5, %v921_v54, %v933_v63  ;;  %v928_v50 = vrot.slane %v4599_v51, 4  ;;  %v929_v30 = vrot.slane %v4608_v59, 3  ;;  %v4732_v62 = vsel %vm87_vm2, %v927_v6, %v915_v4 }
 0x13e   :  { %v918_v41 = vsel %vm309_vm4, %v917_v52, %v916_v28  ;;  %v4737_v34 = vsel %vm107_vm5, %v933_v63, %v921_v54  ;;  %v4741_v9 = vsel %vm87_vm2, %v767_v42, %v755_v55  ;;  %v4745_v39 = vsel %vm107_vm5, %v773_v31, %v761_v8 }
 0x13f   :  { %v930_v51 = vsel %vm309_vm4, %v929_v30, %v928_v50  ;;  %v4750_v59 = vsel %vm94_vm3, %v770_v46, %v758_v1  ;;  %v4756_v28 = vsel %vm87_vm2, %v4636_v35, %v4618_v3  ;;  %v4760_v42 = vsel %vm107_vm5, %v613_v58, %v601_v61 }
 0x140   :  { %v4764_v8 = vsel %vm94_vm3, %v918_v41, %v930_v51  ;;  %v4768_v31 = vsel %vm94_vm3, %v930_v51, %v918_v41  ;;  %v4774_v55 = vsel %vm94_vm3, %v4665_v57, %v4625_v7  ;;  %v4780_v3 = vsel %vm87_vm2, %v4633_v14, %v4630_v12 }
 0x141   :  { %v4784_v35 = vsel %vm107_vm5, %v326_v37, %v314_v36  ;;  %v4790_v61 = vsel %vm94_vm3, %v4650_v47, %v4647_v45  ;;  %v4332_v30 = vmov 1966171168  }
 0x142   :  { %v567_v41 = vunpack.c.l.s4 %v4332_v30  ;;  %v6021_v30 = vld [vmem:[#allocation26_spill] sm:$0xff] }
 0x147   :  { %v496_v58 = vpop.f32.mrb[4].mxu0 }
 0x148   :  { %v543_v7 = vadd.f32 %v496_v58, %v4643_v43  ;;  %v498_v57 = vpop.f32.mrb[5].mxu0  ;;  %v4797_v43 = vld [vmem:[%s5954_s5] ss:$0 sm:$0xff]  ;;  %v568_v58 = vunpack.c.0.s8 %v567_v41 }
 0x149   :  { %v550_v1 = vadd.f32 %v498_v57, %v4662_v56  ;;  %v500_v46 = vpop.f32.mrb[6].mxu0  ;;  %v537_v60 = vpop.f32.mrb[4].mxu1 }
 0x14a   :  { %v3289_v53 = vmul.f32 -1.442695, %v543_v7  ;;  %v501_v12 = vpop.f32.mrb[7].mxu0  ;;  %v3555_v36 = vpop.f32.mrb[5].mxu1  ;;  %v557_v56 = vadd.f32 %v4797_v43, %v537_v60 }
 0x14b   :  { %v3290_v14 = vmul.f32 -1.442695, %v550_v1  ;;  %v540_v37 = vpop.f32.mrb[6].mxu1  ;;  %v4802_v1 = vsub.s32 %v568_v58, %v4575_v38 }
 0x14c   :  { %3994 = vpow2.f32 %v3289_v53  ;;  %v3556_v4 = vpop.f32.mrb[7].mxu1  ;;  %v6013_v37 = vmov 0.0  }
 0x14d   :  { %3996 = vpow2.f32 %v3290_v14  ;;  %v6014_v4 = vmov 0  }
 0x156   :  { %v3995_v6 = vpop.eup %3994 }
 0x157   :  { %v547_v54 = vadd.f32 1.0, %v3995_v6  ;;  %v3997_v45 = vpop.eup %3996  ;;  %v6015_v6 = vld [vmem:[#allocation17_spill] sm:$0xff] }
 0x158   :  { %v554_v47 = vadd.f32 1.0, %v3997_v45  ;;  %v6017_v45 = vld [vmem:[#allocation18_spill] sm:$0xff] }
 0x159   :  { %3998 = vrcp.f32 %v547_v54  ;;  %v6016_v54 = vld [vmem:[#allocation20_spill] sm:$0xff] }
 0x15a   :  { %4000 = vrcp.f32 %v554_v47  ;;  %v6018_v47 = vld [vmem:[#allocation19_spill] sm:$0xff] }
 0x163   :  { %v3999_v63 = vpop.eup %3998 }
 0x164   :  { %v558_v52 = vmul.f32 %v3999_v63, %v557_v56  ;;  %v4001_v51 = vpop.eup %4000  ;;  %v6019_v56 = vld [vmem:[#allocation21_spill] sm:$0xff]  ;;  %v6020_v63 = vld [vmem:[#allocation16_spill] sm:$0xff] }
 0x165   :  { %v561_v7 = vsub.f32 1.0, %v4001_v51  ;;  %v563_v53 = vmul.f32 %v4001_v51, %v4518_v32 }
 0x166   :  { %v559_v50 = vadd.f32 %v558_v52, %v4691_v2 }
 0x168   :  { %4002 = vtanh.f32 %v559_v50 }
 0x172   :  { %v4003_v57 = vpop.eup %4002 }
 0x173   :  { %v562_v46 = vmul.f32 %v4003_v57, %v561_v7  ;;  %v6022_v7 = vld [vmem:[#allocation27_spill] sm:$0xff] }
 0x175   :  { %v4805_v12 = vadd.f32 %v563_v53, %v562_v46 }
 0x177   :  { %v572_v14 = vrot.slane %v4805_v12, %v4802_v1  ;;  %v620_v2 = vpack.c.bf16 %v4805_v12, %v4805_v12 }
 0x179   :  { %v573_v60 = vcombine.high %v572_v14, %v572_v14  ;;  %v580_v36 = vrot.slane %v572_v14, %v4802_v1  ;;  %654 = vmatmul.mubr.bf16.vlgmr.msra.gmra.mrb[8].mxu0 %v620_v2  ;;  %3574 = vmatmul.mubr.bf16.vlgmr.msra.gmra.mrb[8].mxu1 %v620_v2 }
 0x17a   :  { %782 = vmatpush1.bf16.msra.mxu0 %v4447_v10  ;;  %3578 = vmatpush3.bf16.msra.mxu1 %v4464_v17 }
 0x17b   :  { %v587_v32 = vrot.slane %v573_v60, %v4802_v1  ;;  %591 = vst.msk [vmem:[#allocation2] sm:$0x1] %vm590_vm6, %v580_v36  ;;  %783 = vmatprep.subr.bf16.mxu0 %v4450_v11  ;;  %3579 = vmatprep.subr.bf16.mxu1 %v6013_v37 }
 0x17c   :  { %594 = vst.msk [vmem:[#allocation2 + $0x7] sm:$0x1] %vm593_vm7, %v580_v36  ;;  %813 = vmatprep.mubr.bf16.mxu0 %v6014_v4  ;;  %3593 = vmatprep.mubr.msk.bf16.mxu1 %vm4331_vm0, %v6013_v37 }
 0x17d   :  { %592 = vst.msk [vmem:[#allocation2 + $0x8] sm:$0x1] %vm590_vm6, %v587_v32 }
 0x17e   :  { %595 = vst.msk [vmem:[#allocation2 + $0xf] sm:$0x1] %vm593_vm7, %v587_v32  ;;  %784 = vmatpush1.bf16.msra.mxu0 %v4453_v13  ;;  %3580 = vmatpush3.bf16.msra.mxu1 %v4475_v20 }
 0x17f   :  { %785 = vmatprep.subr.bf16.mxu0 %v4457_v15  ;;  %3581 = vmatprep.subr.bf16.mxu1 %v6013_v37 }
 0x182   :  { %786 = vmatpush1.bf16.msra.mxu0 %v4462_v16  ;;  %3582 = vmatpush3.bf16.msra.mxu1 %v4487_v23 }
 0x183   :  { %787 = vmatprep.subr.bf16.mxu0 %v4467_v18  ;;  %3583 = vmatprep.subr.bf16.mxu1 %v6013_v37 }
 0x186   :  { %788 = vmatpush1.bf16.msra.mxu0 %v4470_v19  ;;  %3584 = vmatpush3.bf16.msra.mxu1 %v4495_v26 }
 0x187   :  { %789 = vmatprep.subr.bf16.mxu0 %v4478_v21  ;;  %3585 = vmatprep.subr.bf16.mxu1 %v6013_v37 }
 0x18a   :  { %790 = vmatpush1.bf16.msra.mxu0 %v4483_v22  ;;  %3586 = vmatpush3.bf16.msra.mxu1 %v4505_v29 }
 0x18b   :  { %791 = vmatprep.subr.bf16.mxu0 %v4490_v24  ;;  %3587 = vmatprep.subr.bf16.mxu1 %v6013_v37 }
 0x18e   :  { %792 = vmatpush1.bf16.msra.mxu0 %v4493_v25  ;;  %3588 = vmatpush3.bf16.msra.mxu1 %v4520_v33 }
 0x18f   :  { %793 = vmatprep.subr.bf16.mxu0 %v4497_v27  ;;  %3589 = vmatprep.subr.bf16.mxu1 %v6013_v37 }
 0x192   :  { %794 = vmatpush1.bf16.msra.mxu0 %v6015_v6  ;;  %3590 = vmatpush3.bf16.msra.mxu1 %v6016_v54 }
 0x193   :  { %795 = vmatprep.subr.bf16.mxu0 %v6017_v45  ;;  %3591 = vmatprep.subr.bf16.mxu1 %v6013_v37 }
 0x196   :  { %796 = vmatpush1.bf16.msra.mxu0 %v6018_v47  ;;  %3592 = vmatpush3.bf16.msra.mxu1 %v6019_v56 }
 0x197   :  { %941 = vmatprep.subr.bf16.mxu0 %v6020_v63  ;;  %3597 = vmatprep.subr.bf16.mxu1 %v6013_v37 }
 0x24c   :  { %v655_v52 = vpop.f32.mrb[8].mxu0  ;;  %v696_v50 = vpop.f32.mrb[8].mxu1 }
 0x24d   :  { %v702_v41 = vadd.f32 %v655_v52, %v6021_v30  ;;  %v657_v51 = vpop.f32.mrb[9].mxu0  ;;  %v3575_v58 = vpop.f32.mrb[9].mxu1  ;;  %v716_v38 = vadd.f32 %v4797_v43, %v696_v50 }
 0x24e   :  { %v709_v57 = vadd.f32 %v657_v51, %v6022_v7  ;;  %v659_v46 = vpop.f32.mrb[10].mxu0  ;;  %v699_v53 = vpop.f32.mrb[10].mxu1  ;;  %v6023_v58 = vld [vmem:[#allocation29_spill] sm:$0xff] }
 0x24f   :  { %v3291_v14 = vmul.f32 -1.442695, %v702_v41  ;;  %v660_v2 = vpop.f32.mrb[11].mxu0  ;;  %v3576_v60 = vpop.f32.mrb[11].mxu1 }
 0x250   :  { %v3292_v36 = vmul.f32 -1.442695, %v709_v57 }
 0x251   :  { %4004 = vpow2.f32 %v3291_v14 }
 0x252   :  { %4006 = vpow2.f32 %v3292_v36 }
 0x25b   :  { %v4005_v32 = vpop.eup %4004 }
 0x25c   :  { %v706_v44 = vadd.f32 1.0, %v4005_v32  ;;  %v4007_v48 = vpop.eup %4006 }
 0x25d   :  { %v713_v40 = vadd.f32 1.0, %v4007_v48 }
 0x25e   :  { %4008 = vrcp.f32 %v706_v44 }
 0x25f   :  { %4010 = vrcp.f32 %v713_v40 }
 0x268   :  { %v4009_v52 = vpop.eup %4008 }
 0x269   :  { %v717_v30 = vmul.f32 %v4009_v52, %v716_v38  ;;  %v4011_v7 = vpop.eup %4010 }
 0x26a   :  { %v720_v41 = vsub.f32 1.0, %v4011_v7  ;;  %v722_v57 = vmul.f32 %v4011_v7, %v4805_v12 }
 0x26b   :  { %v718_v51 = vadd.f32 %v717_v30, %v6023_v58 }
 0x26d   :  { %4012 = vtanh.f32 %v718_v51 }
 0x277   :  { %v4013_v46 = vpop.eup %4012 }
 0x278   :  { %v721_v53 = vmul.f32 %v4013_v46, %v720_v41 }
 0x27a   :  { %v4857_v14 = vadd.f32 %v722_v57, %v721_v53 }
 0x27c   :  { %v731_v44 = vrot.slane %v4857_v14, %v4802_v1  ;;  %v780_v48 = vpack.c.bf16 %v4857_v14, %v4857_v14 }
 0x27e   :  { %v732_v50 = vcombine.high %v731_v44, %v731_v44  ;;  %v739_v38 = vrot.slane %v731_v44, %v4802_v1  ;;  %814 = vmatmul.mubr.bf16.vlgmr.msra.gmra.mrb[12].mxu0 %v780_v48  ;;  %3594 = vmatmul.mubr.bf16.vlgmr.msra.gmra.mrb[12].mxu1 %v780_v48 }
 0x27f   :  { %942 = vmatpush1.bf16.msra.mxu0 %v4447_v10  ;;  %3598 = vmatpush3.bf16.msra.mxu1 %v4464_v17 }
 0x280   :  { %v746_v40 = vrot.slane %v732_v50, %v4802_v1  ;;  %749 = vst.msk [vmem:[#allocation2 + $0x1] sm:$0x1] %vm590_vm6, %v739_v38  ;;  %943 = vmatprep.subr.bf16.mxu0 %v4450_v11  ;;  %3599 = vmatprep.subr.bf16.mxu1 %v6013_v37  ;;  %v6025_v50 = vld [vmem:[#allocation30_spill] sm:$0xff] }
 0x281   :  { %751 = vst.msk [vmem:[#allocation2 + $0x6] sm:$0x1] %vm593_vm7, %v739_v38  ;;  %973 = vmatprep.mubr.bf16.mxu0 %v6014_v4  ;;  %3613 = vmatprep.mubr.msk.bf16.mxu1 %vm4331_vm0, %v6013_v37 }
 0x282   :  { %750 = vst.msk [vmem:[#allocation2 + $0x9] sm:$0x1] %vm590_vm6, %v746_v40 }
 0x283   :  { %752 = vst.msk [vmem:[#allocation2 + $0xe] sm:$0x1] %vm593_vm7, %v746_v40  ;;  %944 = vmatpush1.bf16.msra.mxu0 %v4453_v13  ;;  %3600 = vmatpush3.bf16.msra.mxu1 %v4475_v20  ;;  %v6024_v13 = vld [vmem:[#allocation28_spill] sm:$0xff] }
 0x284   :  { %945 = vmatprep.subr.bf16.mxu0 %v4457_v15  ;;  %3601 = vmatprep.subr.bf16.mxu1 %v6013_v37 }
 0x287   :  { %946 = vmatpush1.bf16.msra.mxu0 %v4462_v16  ;;  %3602 = vmatpush3.bf16.msra.mxu1 %v4487_v23 }
 0x288   :  { %947 = vmatprep.subr.bf16.mxu0 %v4467_v18  ;;  %3603 = vmatprep.subr.bf16.mxu1 %v6013_v37 }
 0x28b   :  { %948 = vmatpush1.bf16.msra.mxu0 %v4470_v19  ;;  %3604 = vmatpush3.bf16.msra.mxu1 %v4495_v26 }
 0x28c   :  { %949 = vmatprep.subr.bf16.mxu0 %v4478_v21  ;;  %3605 = vmatprep.subr.bf16.mxu1 %v6013_v37 }
 0x28f   :  { %950 = vmatpush1.bf16.msra.mxu0 %v4483_v22  ;;  %3606 = vmatpush3.bf16.msra.mxu1 %v4505_v29 }
 0x290   :  { %951 = vmatprep.subr.bf16.mxu0 %v4490_v24  ;;  %3607 = vmatprep.subr.bf16.mxu1 %v6013_v37 }
 0x293   :  { %952 = vmatpush1.bf16.msra.mxu0 %v4493_v25  ;;  %3608 = vmatpush3.bf16.msra.mxu1 %v4520_v33 }
 0x294   :  { %953 = vmatprep.subr.bf16.mxu0 %v4497_v27  ;;  %3609 = vmatprep.subr.bf16.mxu1 %v6013_v37 }
 0x297   :  { %954 = vmatpush1.bf16.msra.mxu0 %v6015_v6  ;;  %3610 = vmatpush3.bf16.msra.mxu1 %v6016_v54 }
 0x298   :  { %955 = vmatprep.subr.bf16.mxu0 %v6017_v45  ;;  %3611 = vmatprep.subr.bf16.mxu1 %v6013_v37 }
 0x29b   :  { %956 = vmatpush1.bf16.msra.mxu0 %v6018_v47  ;;  %3612 = vmatpush3.bf16.msra.mxu1 %v6019_v56 }
 0x29c   :  { %1077 = vmatprep.subr.bf16.mxu0 %v6020_v63  ;;  %3617 = vmatprep.subr.bf16.mxu1 %v6013_v37 }
 0x351   :  { %v815_v10 = vpop.f32.mrb[12].mxu0  ;;  %v856_v11 = vpop.f32.mrb[12].mxu1 }
 0x352   :  { %v862_v12 = vadd.f32 %v815_v10, %v6024_v13  ;;  %v817_v2 = vpop.f32.mrb[13].mxu0  ;;  %v3595_v60 = vpop.f32.mrb[13].mxu1  ;;  %v876_v57 = vadd.f32 %v4797_v43, %v856_v11 }
 0x353   :  { %v869_v36 = vadd.f32 %v817_v2, %v4712_v0  ;;  %v819_v32 = vpop.f32.mrb[14].mxu0  ;;  %v859_v52 = vpop.f32.mrb[14].mxu1 }
 0x354   :  { %v3293_v30 = vmul.f32 -1.442695, %v862_v12  ;;  %v820_v58 = vpop.f32.mrb[15].mxu0  ;;  %v3596_v51 = vpop.f32.mrb[15].mxu1  ;;  %v4916_v52 = vld [vmem:[#allocation9] ss:$12 sps:$4 sm:$0xff]  }
 0x355   :  { %v3294_v7 = vmul.f32 -1.442695, %v869_v36 }
 0x356   :  { %4014 = vpow2.f32 %v3293_v30  ;;  %v4923_v30 = vld [vmem:[#allocation9 + $0x1c] ss:$12 sps:$4 sm:$0xff]  }
 0x357   :  { %4016 = vpow2.f32 %v3294_v7 }
 0x360   :  { %v4015_v41 = vpop.eup %4014 }
 0x361   :  { %v866_v63 = vadd.f32 1.0, %v4015_v41  ;;  %v4017_v46 = vpop.eup %4016 }
 0x362   :  { %v873_v53 = vadd.f32 1.0, %v4017_v46 }
 0x363   :  { %4018 = vrcp.f32 %v866_v63 }
 0x364   :  { %4020 = vrcp.f32 %v873_v53 }
 0x36d   :  { %v4019_v44 = vpop.eup %4018 }
 0x36e   :  { %v877_v48 = vmul.f32 %v4019_v44, %v876_v57  ;;  %v4021_v38 = vpop.eup %4020 }
 0x36f   :  { %v880_v40 = vsub.f32 1.0, %v4021_v38  ;;  %v882_v12 = vmul.f32 %v4021_v38, %v4857_v14 }
 0x370   :  { %v878_v0 = vadd.f32 %v877_v48, %v6025_v50 }
 0x372   :  { %4022 = vtanh.f32 %v878_v0 }
 0x37c   :  { %v4023_v10 = vpop.eup %4022 }
 0x37d   :  { %v881_v13 = vmul.f32 %v4023_v10, %v880_v40  ;;  %v4991_v10 = vld [vmem:[#allocation9 + $0x20] ss:$12 sps:$4 sm:$0xff]  }
 0x37f   :  { %v4909_v2 = vadd.f32 %v882_v12, %v881_v13  ;;  %v4994_v13 = vld [vmem:[#allocation9 + $0x34] ss:$12 sps:$4 sm:$0xff]   ;;  %v4998_v12 = vld [vmem:[#allocation9 + $0x30] ss:$12 sps:$4 sm:$0xff]  }
 0x381   :  { %v891_v60 = vrot.slane %v4909_v2, %v4802_v1  ;;  %v940_v11 = vpack.c.bf16 %v4909_v2, %v4909_v2 }
 0x383   :  { %v892_v36 = vcombine.high %v891_v60, %v891_v60  ;;  %v899_v32 = vrot.slane %v891_v60, %v4802_v1  ;;  %974 = vmatmul.mubr.bf16.vlgmr.msra.gmra.mrb[16].mxu0 %v940_v11  ;;  %3614 = vmatmul.mubr.bf16.vlgmr.msra.gmra.mrb[16].mxu1 %v940_v11  ;;  %v5004_v60 = vld [vmem:[#allocation9 + $0x4c] ss:$12 sps:$4 sm:$0xff]   ;;  %v5008_v11 = vld [vmem:[#allocation9 + $0x48] ss:$12 sps:$4 sm:$0xff]  }
 0x384   :  { %1078 = vmatpush1.bf16.msra.mxu0 %v4916_v52  ;;  %3618 = vmatpush3.bf16.msra.mxu1 %v4464_v17  ;;  %v4932_v17 = vld [vmem:[#allocation9 + $0x18] ss:$12 sps:$4 sm:$0xff]  }
 0x385   :  { %v906_v14 = vrot.slane %v892_v36, %v4802_v1  ;;  %909 = vst.msk [vmem:[#allocation2 + $0x2] sm:$0x1] %vm590_vm6, %v899_v32  ;;  %1079 = vmatprep.subr.bf16.mxu0 %v4923_v30  ;;  %3619 = vmatprep.subr.bf16.mxu1 %v6013_v37  ;;  %v5011_v36 = vld [vmem:[#allocation9 + $0x50] ss:$12 sps:$4 sm:$0xff]  }
 0x386   :  { %911 = vst.msk [vmem:[#allocation2 + $0x5] sm:$0x1] %vm593_vm7, %v899_v32  ;;  %1109 = vmatprep.mubr.bf16.mxu0 %v6014_v4  ;;  %3633 = vmatprep.mubr.msk.bf16.mxu1 %vm4331_vm0, %v6013_v37  ;;  %v5014_v32 = vld [vmem:[#allocation9 + $0x64] ss:$12 sps:$4 sm:$0xff]  }
 0x387   :  { %910 = vst.msk [vmem:[#allocation2 + $0xa] sm:$0x1] %vm590_vm6, %v906_v14 }
 0x388   :  { %912 = vst.msk [vmem:[#allocation2 + $0xd] sm:$0x1] %vm593_vm7, %v906_v14  ;;  %1080 = vmatpush1.bf16.msra.mxu0 %v4932_v17  ;;  %3620 = vmatpush3.bf16.msra.mxu1 %v4475_v20  ;;  %v5018_v14 = vld [vmem:[#allocation9 + $0x60] ss:$12 sps:$4 sm:$0xff]  }
 0x389   :  { %1081 = vmatprep.subr.bf16.mxu0 %v4457_v15  ;;  %3621 = vmatprep.subr.bf16.mxu1 %v6013_v37  ;;  %v4960_v15 = vld [vmem:[#allocation9 + $0x4] ss:$12 sps:$4 sm:$0xff]  }
 0x38c   :  { %1082 = vmatpush1.bf16.msra.mxu0 %v4462_v16  ;;  %3622 = vmatpush3.bf16.msra.mxu1 %v4487_v23 }
 0x38d   :  { %1083 = vmatprep.subr.bf16.mxu0 %v4467_v18  ;;  %3623 = vmatprep.subr.bf16.mxu1 %v6013_v37 }
 0x390   :  { %1084 = vmatpush1.bf16.msra.mxu0 %v4470_v19  ;;  %3624 = vmatpush3.bf16.msra.mxu1 %v4495_v26 }
 0x391   :  { %1085 = vmatprep.subr.bf16.mxu0 %v4478_v21  ;;  %3625 = vmatprep.subr.bf16.mxu1 %v6013_v37 }
 0x394   :  { %1086 = vmatpush1.bf16.msra.mxu0 %v4483_v22  ;;  %3626 = vmatpush3.bf16.msra.mxu1 %v4505_v29 }
 0x395   :  { %1087 = vmatprep.subr.bf16.mxu0 %v4490_v24  ;;  %3627 = vmatprep.subr.bf16.mxu1 %v6013_v37 }
 0x398   :  { %1088 = vmatpush1.bf16.msra.mxu0 %v4493_v25  ;;  %3628 = vmatpush3.bf16.msra.mxu1 %v4520_v33 }
 0x399   :  { %1089 = vmatprep.subr.bf16.mxu0 %v4497_v27  ;;  %3629 = vmatprep.subr.bf16.mxu1 %v6013_v37 }
 0x39c   :  { %1090 = vmatpush1.bf16.msra.mxu0 %v6015_v6  ;;  %3630 = vmatpush3.bf16.msra.mxu1 %v6016_v54 }
 0x39d   :  { %1091 = vmatprep.subr.bf16.mxu0 %v6017_v45  ;;  %3631 = vmatprep.subr.bf16.mxu1 %v6013_v37 }
 0x3a0   :  { %1092 = vmatpush1.bf16.msra.mxu0 %v6018_v47  ;;  %3632 = vmatpush3.bf16.msra.mxu1 %v6019_v56 }
 0x3a1   :  { %1213 = vmatprep.subr.bf16.mxu0 %v4960_v15  ;;  %3637 = vmatprep.subr.bf16.mxu1 %v6013_v37 }
 0x456   :  { %v975_v16 = vpop.f32.mrb[16].mxu0  ;;  %v1016_v18 = vpop.f32.mrb[16].mxu1 }
 0x457   :  { %v1022_v19 = vadd.f32 %v975_v16, %v4719_v49  ;;  %v977_v20 = vpop.f32.mrb[17].mxu0  ;;  %v3615_v21 = vpop.f32.mrb[17].mxu1  ;;  %v1036_v51 = vadd.f32 %v4797_v43, %v1016_v18  ;;  %v5021_v16 = vld [vmem:[#allocation9 + $0x68] ss:$12 sps:$4 sm:$0xff]  }
 0x458   :  { %v1029_v22 = vadd.f32 %v977_v20, %v4764_v8  ;;  %v979_v23 = vpop.f32.mrb[18].mxu0  ;;  %v1019_v24 = vpop.f32.mrb[18].mxu1  ;;  %v5024_v18 = vld [vmem:[#allocation9 + $0x7c] ss:$12 sps:$4 sm:$0xff]   ;;  %v5032_v20 = vld [vmem:[#allocation9 + $0x94] ss:$12 sps:$4 sm:$0xff]  }
 0x459   :  { %v3295_v25 = vmul.f32 -1.442695, %v1022_v19  ;;  %v980_v26 = vpop.f32.mrb[19].mxu0  ;;  %v3616_v27 = vpop.f32.mrb[19].mxu1  ;;  %v5028_v19 = vld [vmem:[#allocation9 + $0x78] ss:$12 sps:$4 sm:$0xff]  }
 0x45a   :  { %v3296_v29 = vmul.f32 -1.442695, %v1029_v22  ;;  %v5036_v21 = vld [vmem:[#allocation9 + $0x90] ss:$12 sps:$4 sm:$0xff]   ;;  %v5040_v22 = vld [vmem:[#allocation9 + $0xac] ss:$12 sps:$4 sm:$0xff]  }
 0x45b   :  { %4024 = vpow2.f32 %v3295_v25  ;;  %v5044_v23 = vld [vmem:[#allocation9 + $0xa8] ss:$12 sps:$4 sm:$0xff]  }
 0x45c   :  { %4026 = vpow2.f32 %v3296_v29 }
 0x465   :  { %v4025_v6 = vpop.eup %4024 }
 0x466   :  { %v1026_v45 = vadd.f32 1.0, %v4025_v6  ;;  %v4027_v47 = vpop.eup %4026 }
 0x467   :  { %v1033_v58 = vadd.f32 1.0, %v4027_v47 }
 0x468   :  { %4028 = vrcp.f32 %v1026_v45 }
 0x469   :  { %4030 = vrcp.f32 %v1033_v58 }
 0x472   :  { %v4029_v49 = vpop.eup %4028 }
 0x473   :  { %v1037_v7 = vmul.f32 %v4029_v49, %v1036_v51  ;;  %v4031_v41 = vpop.eup %4030 }
 0x474   :  { %v1040_v63 = vsub.f32 1.0, %v4031_v41  ;;  %v1042_v57 = vmul.f32 %v4031_v41, %v4909_v2  ;;  %v5001_v2 = vld [vmem:[#allocation9 + $0x38] ss:$12 sps:$4 sm:$0xff]  }
 0x475   :  { %v1038_v8 = vadd.f32 %v1037_v7, %v4726_v5  ;;  %v4977_v5 = vld [vmem:[#allocation9 + $0x8] ss:$12 sps:$4 sm:$0xff]  }
 0x477   :  { %4032 = vtanh.f32 %v1038_v8 }
 0x481   :  { %v4033_v46 = vpop.eup %4032 }
 0x482   :  { %v1041_v53 = vmul.f32 %v4033_v46, %v1040_v63 }
 0x484   :  { %v4969_v44 = vadd.f32 %v1042_v57, %v1041_v53 }
 0x486   :  { %v1051_v48 = vrot.slane %v4969_v44, %v4802_v1  ;;  %v1076_v50 = vpack.c.bf16 %v4969_v44, %v4969_v44 }
 0x488   :  { %v1052_v0 = vcombine.high %v1051_v48, %v1051_v48  ;;  %v1059_v38 = vrot.slane %v1051_v48, %v4802_v1  ;;  %1110 = vmatmul.mubr.bf16.vlgmr.msra.gmra.mrb[20].mxu0 %v1076_v50  ;;  %3634 = vmatmul.mubr.bf16.vlgmr.msra.gmra.mrb[20].mxu1 %v1076_v50 }
 0x489   :  { %1214 = vmatpush1.bf16.msra.mxu0 %v4916_v52  ;;  %3638 = vmatpush3.bf16.msra.mxu1 %v4977_v5 }
 0x48a   :  { %v1066_v40 = vrot.slane %v1052_v0, %v4802_v1  ;;  %1069 = vst.msk [vmem:[#allocation2 + $0x3] sm:$0x1] %vm590_vm6, %v1059_v38  ;;  %1215 = vmatprep.subr.bf16.mxu0 %v4923_v30  ;;  %3639 = vmatprep.subr.bf16.mxu1 %v6013_v37 }
 0x48b   :  { %1071 = vst.msk [vmem:[#allocation2 + $0x4] sm:$0x1] %vm593_vm7, %v1059_v38  ;;  %1245 = vmatprep.mubr.bf16.mxu0 %v6014_v4  ;;  %3653 = vmatprep.mubr.msk.bf16.mxu1 %vm4331_vm0, %v6013_v37 }
 0x48c   :  { %1070 = vst.msk [vmem:[#allocation2 + $0xb] sm:$0x1] %vm590_vm6, %v1066_v40 }
 0x48d   :  { %1072 = vst.msk [vmem:[#allocation2 + $0xc] sm:$0x1] %vm593_vm7, %v1066_v40  ;;  %1216 = vmatpush1.bf16.msra.mxu0 %v4932_v17  ;;  %3640 = vmatpush3.bf16.msra.mxu1 %v4991_v10 }
 0x48e   :  { %1217 = vmatprep.subr.bf16.mxu0 %v4994_v13  ;;  %3641 = vmatprep.subr.bf16.mxu1 %v6013_v37 }
 0x491   :  { %1218 = vmatpush1.bf16.msra.mxu0 %v4998_v12  ;;  %3642 = vmatpush3.bf16.msra.mxu1 %v5001_v2 }
 0x492   :  { %1219 = vmatprep.subr.bf16.mxu0 %v5004_v60  ;;  %3643 = vmatprep.subr.bf16.mxu1 %v6013_v37 }
 0x495   :  { %1220 = vmatpush1.bf16.msra.mxu0 %v5008_v11  ;;  %3644 = vmatpush3.bf16.msra.mxu1 %v5011_v36 }
 0x496   :  { %1221 = vmatprep.subr.bf16.mxu0 %v5014_v32  ;;  %3645 = vmatprep.subr.bf16.mxu1 %v6013_v37 }
 0x499   :  { %1222 = vmatpush1.bf16.msra.mxu0 %v5018_v14  ;;  %3646 = vmatpush3.bf16.msra.mxu1 %v5021_v16 }
 0x49a   :  { %1223 = vmatprep.subr.bf16.mxu0 %v5024_v18  ;;  %3647 = vmatprep.subr.bf16.mxu1 %v6013_v37 }
 0x49d   :  { %1224 = vmatpush1.bf16.msra.mxu0 %v5028_v19  ;;  %3648 = vmatpush3.bf16.msra.mxu1 %v4520_v33 }
 0x49e   :  { %1225 = vmatprep.subr.bf16.mxu0 %v5032_v20  ;;  %3649 = vmatprep.subr.bf16.mxu1 %v6013_v37 }
 0x4a1   :  { %1226 = vmatpush1.bf16.msra.mxu0 %v5036_v21  ;;  %3650 = vmatpush3.bf16.msra.mxu1 %v6016_v54 }
 0x4a2   :  { %1227 = vmatprep.subr.bf16.mxu0 %v5040_v22  ;;  %3651 = vmatprep.subr.bf16.mxu1 %v6013_v37 }
 0x4a5   :  { %1228 = vmatpush1.bf16.msra.mxu0 %v5044_v23  ;;  %3652 = vmatpush3.bf16.msra.mxu1 %v6019_v56 }
 0x4a6   :  { %1349 = vmatprep.subr.bf16.mxu0 %v4960_v15  ;;  %3657 = vmatprep.subr.bf16.mxu1 %v6013_v37 }
 0x55b   :  { %v1111_v33 = vpop.f32.mrb[20].mxu0  ;;  %v1152_v24 = vpop.f32.mrb[20].mxu1 }
 0x55c   :  { %v1158_v54 = vadd.f32 %v1111_v33, %v4732_v62  ;;  %v1113_v25 = vpop.f32.mrb[21].mxu0  ;;  %v3635_v26 = vpop.f32.mrb[21].mxu1  ;;  %v1172_v41 = vadd.f32 %v4797_v43, %v1152_v24 }
 0x55d   :  { %v1165_v27 = vadd.f32 %v1113_v25, %v4768_v31  ;;  %v1115_v29 = vpop.f32.mrb[22].mxu0  ;;  %v1155_v6 = vpop.f32.mrb[22].mxu1  ;;  %v5103_v25 = vld [vmem:[#allocation9 + $0xb0] ss:$12 sps:$4 sm:$0xff]  }
 0x55e   :  { %v3297_v45 = vmul.f32 -1.442695, %v1158_v54  ;;  %v1116_v47 = vpop.f32.mrb[23].mxu0  ;;  %v3636_v58 = vpop.f32.mrb[23].mxu1  ;;  %v5097_v54 = vld [vmem:[#allocation9 + $0x98] ss:$12 sps:$4 sm:$0xff]  }
 0x55f   :  { %v3298_v51 = vmul.f32 -1.442695, %v1165_v27 }
 0x560   :  { %4034 = vpow2.f32 %v3297_v45 }
 0x561   :  { %4036 = vpow2.f32 %v3298_v51 }
 0x56a   :  { %v4035_v56 = vpop.eup %4034 }
 0x56b   :  { %v1162_v49 = vadd.f32 1.0, %v4035_v56  ;;  %v4037_v7 = vpop.eup %4036 }
 0x56c   :  { %v1169_v8 = vadd.f32 1.0, %v4037_v7 }
 0x56d   :  { %4038 = vrcp.f32 %v1162_v49 }
 0x56e   :  { %4040 = vrcp.f32 %v1169_v8 }
 0x577   :  { %v4039_v62 = vpop.eup %4038 }
 0x578   :  { %v1173_v63 = vmul.f32 %v4039_v62, %v1172_v41  ;;  %v4041_v46 = vpop.eup %4040 }
 0x579   :  { %v1176_v53 = vsub.f32 1.0, %v4041_v46  ;;  %v1178_v50 = vmul.f32 %v4041_v46, %v4969_v44  ;;  %v5091_v44 = vld [vmem:[#allocation9 + $0x80] ss:$12 sps:$4 sm:$0xff]  }
 0x57a   :  { %v1174_v31 = vadd.f32 %v1173_v63, %v4737_v34 }
 0x57c   :  { %4042 = vtanh.f32 %v1174_v31 }
 0x586   :  { %v4043_v57 = vpop.eup %4042 }
 0x587   :  { %v1177_v48 = vmul.f32 %v4043_v57, %v1176_v53 }
 0x589   :  { %v5055_v0 = vadd.f32 %v1178_v50, %v1177_v48 }
 0x58b   :  { %v1187_v38 = vrot.slane %v5055_v0, %v4802_v1  ;;  %v1212_v40 = vpack.c.bf16 %v5055_v0, %v5055_v0 }
 0x58d   :  { %v1188_v33 = vcombine.high %v1187_v38, %v1187_v38  ;;  %v1195_v24 = vrot.slane %v1187_v38, %v4802_v1  ;;  %1246 = vmatmul.mubr.bf16.vlgmr.msra.gmra.mrb[24].mxu0 %v1212_v40  ;;  %3654 = vmatmul.mubr.bf16.vlgmr.msra.gmra.mrb[24].mxu1 %v1212_v40 }
 0x58e   :  { %1350 = vmatpush1.bf16.msra.mxu0 %v4916_v52  ;;  %3658 = vmatpush3.bf16.msra.mxu1 %v4977_v5 }
 0x58f   :  { %v1202_v34 = vrot.slane %v1188_v33, %v4802_v1  ;;  %1205 = vst.msk [vmem:[#allocation2 + $0x4] sm:$0x1] %vm590_vm6, %v1195_v24  ;;  %1351 = vmatprep.subr.bf16.mxu0 %v4923_v30  ;;  %3659 = vmatprep.subr.bf16.mxu1 %v6013_v37 }
 0x590   :  { %1207 = vst.msk [vmem:[#allocation2 + $0x3] sm:$0x1] %vm593_vm7, %v1195_v24  ;;  %1381 = vmatprep.mubr.bf16.mxu0 %v6014_v4  ;;  %3673 = vmatprep.mubr.msk.bf16.mxu1 %vm4331_vm0, %v6013_v37 }
 0x591   :  { %1206 = vst.msk [vmem:[#allocation2 + $0xc] sm:$0x1] %vm590_vm6, %v1202_v34 }
 0x592   :  { %1208 = vst.msk [vmem:[#allocation2 + $0xb] sm:$0x1] %vm593_vm7, %v1202_v34  ;;  %1352 = vmatpush1.bf16.msra.mxu0 %v4932_v17  ;;  %3660 = vmatpush3.bf16.msra.mxu1 %v4991_v10 }
 0x593   :  { %1353 = vmatprep.subr.bf16.mxu0 %v4994_v13  ;;  %3661 = vmatprep.subr.bf16.mxu1 %v6013_v37 }
 0x596   :  { %1354 = vmatpush1.bf16.msra.mxu0 %v4998_v12  ;;  %3662 = vmatpush3.bf16.msra.mxu1 %v5001_v2 }
 0x597   :  { %1355 = vmatprep.subr.bf16.mxu0 %v5004_v60  ;;  %3663 = vmatprep.subr.bf16.mxu1 %v6013_v37 }
 0x59a   :  { %1356 = vmatpush1.bf16.msra.mxu0 %v5008_v11  ;;  %3664 = vmatpush3.bf16.msra.mxu1 %v5011_v36 }
 0x59b   :  { %1357 = vmatprep.subr.bf16.mxu0 %v5014_v32  ;;  %3665 = vmatprep.subr.bf16.mxu1 %v6013_v37 }
 0x59e   :  { %1358 = vmatpush1.bf16.msra.mxu0 %v5018_v14  ;;  %3666 = vmatpush3.bf16.msra.mxu1 %v5021_v16 }
 0x59f   :  { %1359 = vmatprep.subr.bf16.mxu0 %v5024_v18  ;;  %3667 = vmatprep.subr.bf16.mxu1 %v6013_v37 }
 0x5a2   :  { %1360 = vmatpush1.bf16.msra.mxu0 %v5028_v19  ;;  %3668 = vmatpush3.bf16.msra.mxu1 %v5091_v44 }
 0x5a3   :  { %1361 = vmatprep.subr.bf16.mxu0 %v5032_v20  ;;  %3669 = vmatprep.subr.bf16.mxu1 %v6013_v37 }
 0x5a6   :  { %1362 = vmatpush1.bf16.msra.mxu0 %v5036_v21  ;;  %3670 = vmatpush3.bf16.msra.mxu1 %v5097_v54 }
 0x5a7   :  { %1363 = vmatprep.subr.bf16.mxu0 %v5040_v22  ;;  %3671 = vmatprep.subr.bf16.mxu1 %v6013_v37 }
 0x5aa   :  { %1364 = vmatpush1.bf16.msra.mxu0 %v5044_v23  ;;  %3672 = vmatpush3.bf16.msra.mxu1 %v5103_v25 }
 0x5ab   :  { %1485 = vmatprep.subr.bf16.mxu0 %v4960_v15  ;;  %3677 = vmatprep.subr.bf16.mxu1 %v6013_v37 }
 0x660   :  { %v1247_v26 = vpop.f32.mrb[24].mxu0  ;;  %v1288_v27 = vpop.f32.mrb[24].mxu1 }
 0x661   :  { %v1294_v29 = vadd.f32 %v1247_v26, %v4741_v9  ;;  %v1249_v6 = vpop.f32.mrb[25].mxu0  ;;  %v3655_v45 = vpop.f32.mrb[25].mxu1  ;;  %v1308_v31 = vadd.f32 %v4797_v43, %v1288_v27 }
 0x662   :  { %v1301_v47 = vadd.f32 %v1249_v6, %v4750_v59  ;;  %v1251_v58 = vpop.f32.mrb[26].mxu0  ;;  %v1291_v51 = vpop.f32.mrb[26].mxu1  ;;  %v3932_v45 = vld [vmem:[#allocation8 + $0x4] ss:$12 sps:$4 sm:$0xff]  }
 0x663   :  { %v3299_v56 = vmul.f32 -1.442695, %v1294_v29  ;;  %v1252_v49 = vpop.f32.mrb[27].mxu0  ;;  %v3656_v7 = vpop.f32.mrb[27].mxu1  ;;  %v3933_v58 = vld [vmem:[#allocation8 + $0x8] ss:$12 sps:$4 sm:$0xff]  }
 0x664   :  { %v3300_v8 = vmul.f32 -1.442695, %v1301_v47  ;;  %v3930_v47 = vld [vmem:[#allocation8] ss:$12 sps:$4 sm:$0xff]   ;;  %v3936_v51 = vld [vmem:[#allocation8 + $0x1c] ss:$12 sps:$4 sm:$0xff]  }
 0x665   :  { %4044 = vpow2.f32 %v3299_v56  ;;  %v3934_v56 = vld [vmem:[#allocation8 + $0x18] ss:$12 sps:$4 sm:$0xff]   ;;  %v3937_v49 = vld [vmem:[#allocation8 + $0x20] ss:$12 sps:$4 sm:$0xff]   ;;  %v3938_v7 = vld [vmem:[#allocation8 + $0x30] ss:$12 sps:$4 sm:$0xff]  }
 0x666   :  { %4046 = vpow2.f32 %v3300_v8  ;;  %v3940_v8 = vld [vmem:[#allocation8 + $0x34] ss:$12 sps:$4 sm:$0xff]  }
 0x66f   :  { %v4045_v41 = vpop.eup %4044 }
 0x670   :  { %v1298_v15 = vadd.f32 1.0, %v4045_v41  ;;  %v4047_v62 = vpop.eup %4046  ;;  %v3941_v41 = vld [vmem:[#allocation8 + $0x38] ss:$12 sps:$4 sm:$0xff]  }
 0x671   :  { %v1305_v63 = vadd.f32 1.0, %v4047_v62  ;;  %v3942_v62 = vld [vmem:[#allocation8 + $0x48] ss:$12 sps:$4 sm:$0xff]  }
 0x672   :  { %4048 = vrcp.f32 %v1298_v15  ;;  %v3944_v15 = vld [vmem:[#allocation8 + $0x4c] ss:$12 sps:$4 sm:$0xff]  }
 0x673   :  { %4050 = vrcp.f32 %v1305_v63  ;;  %v3945_v63 = vld [vmem:[#allocation8 + $0x50] ss:$12 sps:$4 sm:$0xff]  }
 0x67c   :  { %v4049_v9 = vpop.eup %4048 }
 0x67d   :  { %v1309_v46 = vmul.f32 %v4049_v9, %v1308_v31  ;;  %v4051_v53 = vpop.eup %4050  ;;  %v3948_v31 = vld [vmem:[#allocation8 + $0x64] ss:$12 sps:$4 sm:$0xff]   ;;  %v3946_v9 = vld [vmem:[#allocation8 + $0x60] ss:$12 sps:$4 sm:$0xff]  }
 0x67e   :  { %v1312_v57 = vsub.f32 1.0, %v4051_v53  ;;  %v1314_v38 = vmul.f32 %v4051_v53, %v5055_v0  ;;  %v3950_v53 = vld [vmem:[#allocation8 + $0x78] ss:$12 sps:$4 sm:$0xff]  }
 0x67f   :  { %v1310_v59 = vadd.f32 %v1309_v46, %v4745_v39  ;;  %v3949_v46 = vld [vmem:[#allocation8 + $0x68] ss:$12 sps:$4 sm:$0xff]  }
 0x681   :  { %4052 = vtanh.f32 %v1310_v59  ;;  %v3952_v59 = vld [vmem:[#allocation8 + $0x7c] ss:$12 sps:$4 sm:$0xff]  }
 0x68b   :  { %v4053_v48 = vpop.eup %4052 }
 0x68c   :  { %v1313_v50 = vmul.f32 %v4053_v48, %v1312_v57  ;;  %v3953_v57 = vld [vmem:[#allocation8 + $0x80] ss:$12 sps:$4 sm:$0xff]  }
 0x68d   :  { %v3956_v48 = vld [vmem:[#allocation8 + $0x94] ss:$12 sps:$4 sm:$0xff]  }
 0x68e   :  { %v5113_v40 = vadd.f32 %v1314_v38, %v1313_v50  ;;  %v3954_v50 = vld [vmem:[#allocation8 + $0x90] ss:$12 sps:$4 sm:$0xff]   ;;  %v3957_v38 = vld [vmem:[#allocation8 + $0x98] ss:$12 sps:$4 sm:$0xff]  }
 0x690   :  { %v1323_v33 = vrot.slane %v5113_v40, %v4802_v1  ;;  %v1348_v24 = vpack.c.bf16 %v5113_v40, %v5113_v40 }
 0x692   :  { %v1324_v34 = vcombine.high %v1323_v33, %v1323_v33  ;;  %v1331_v26 = vrot.slane %v1323_v33, %v4802_v1  ;;  %1382 = vmatmul.mubr.bf16.vlgmr.msra.gmra.mrb[28].mxu0 %v1348_v24  ;;  %3674 = vmatmul.mubr.bf16.vlgmr.msra.gmra.mrb[28].mxu1 %v1348_v24  ;;  %v3958_v33 = vld [vmem:[#allocation8 + $0xa8] ss:$12 sps:$4 sm:$0xff]   ;;  %v3961_v24 = vld [vmem:[#allocation8 + $0xb0] ss:$12 sps:$4 sm:$0xff]  }
 0x693   :  { %1486 = vmatpush1.bf16.msra.mxu0 %v4916_v52  ;;  %3678 = vmatpush3.bf16.msra.mxu1 %v4977_v5 }
 0x694   :  { %v1338_v39 = vrot.slane %v1324_v34, %v4802_v1  ;;  %1341 = vst.msk [vmem:[#allocation2 + $0x5] sm:$0x1] %vm590_vm6, %v1331_v26  ;;  %1487 = vmatprep.subr.bf16.mxu0 %v4923_v30  ;;  %3679 = vmatprep.subr.bf16.mxu1 %v6013_v37  ;;  %v5185_v34 = vld [vmem:[#allocation9 + $0xc4] ss:$12 sps:$4 sm:$0xff]  }
 0x695   :  { %1343 = vst.msk [vmem:[#allocation2 + $0x2] sm:$0x1] %vm593_vm7, %v1331_v26  ;;  %1517 = vmatprep.mubr.bf16.mxu0 %v6014_v4  ;;  %3693 = vmatprep.mubr.msk.bf16.mxu1 %vm4331_vm0, %v6013_v37  ;;  %6026 = vst [vmem:[#allocation17_spill] sm:$0xff] %v5185_v34 }
 0x696   :  { %1342 = vst.msk [vmem:[#allocation2 + $0xd] sm:$0x1] %vm590_vm6, %v1338_v39 }
 0x697   :  { %1344 = vst.msk [vmem:[#allocation2 + $0xa] sm:$0x1] %vm593_vm7, %v1338_v39  ;;  %1488 = vmatpush1.bf16.msra.mxu0 %v4932_v17  ;;  %3680 = vmatpush3.bf16.msra.mxu1 %v4991_v10 }
 0x698   :  { %1489 = vmatprep.subr.bf16.mxu0 %v4994_v13  ;;  %3681 = vmatprep.subr.bf16.mxu1 %v6013_v37 }
 0x69b   :  { %1490 = vmatpush1.bf16.msra.mxu0 %v4998_v12  ;;  %3682 = vmatpush3.bf16.msra.mxu1 %v5001_v2 }
 0x69c   :  { %1491 = vmatprep.subr.bf16.mxu0 %v5004_v60  ;;  %3683 = vmatprep.subr.bf16.mxu1 %v6013_v37 }
 0x69f   :  { %1492 = vmatpush1.bf16.msra.mxu0 %v5008_v11  ;;  %3684 = vmatpush3.bf16.msra.mxu1 %v5011_v36 }
 0x6a0   :  { %1493 = vmatprep.subr.bf16.mxu0 %v5014_v32  ;;  %3685 = vmatprep.subr.bf16.mxu1 %v6013_v37 }
 0x6a3   :  { %1494 = vmatpush1.bf16.msra.mxu0 %v5018_v14  ;;  %3686 = vmatpush3.bf16.msra.mxu1 %v5021_v16 }
 0x6a4   :  { %1495 = vmatprep.subr.bf16.mxu0 %v5024_v18  ;;  %3687 = vmatprep.subr.bf16.mxu1 %v6013_v37 }
 0x6a7   :  { %1496 = vmatpush1.bf16.msra.mxu0 %v5028_v19  ;;  %3688 = vmatpush3.bf16.msra.mxu1 %v5091_v44 }
 0x6a8   :  { %1497 = vmatprep.subr.bf16.mxu0 %v5032_v20  ;;  %3689 = vmatprep.subr.bf16.mxu1 %v6013_v37 }
 0x6ab   :  { %1498 = vmatpush1.bf16.msra.mxu0 %v5036_v21  ;;  %3690 = vmatpush3.bf16.msra.mxu1 %v5097_v54 }
 0x6ac   :  { %1499 = vmatprep.subr.bf16.mxu0 %v5040_v22  ;;  %3691 = vmatprep.subr.bf16.mxu1 %v6013_v37 }
 0x6af   :  { %1500 = vmatpush1.bf16.msra.mxu0 %v5044_v23  ;;  %3692 = vmatpush3.bf16.msra.mxu1 %v5103_v25 }
 0x6b0   :  { %3697 = vmatprep.subr.bf16.mxu1 %v6013_v37  ;;  %1798 = vmatprep.subr.bf16.mxu0 %v3932_v45  ;;  %v5208_v45 = vld [vmem:[#allocation9 + $0xdc] ss:$12 sps:$4 sm:$0xff]  }
 0x765   :  { %v1383_v52 = vpop.f32.mrb[28].mxu0  ;;  %v1424_v30 = vpop.f32.mrb[28].mxu1 }
 0x766   :  { %v1430_v17 = vadd.f32 %v1383_v52, %v4756_v28  ;;  %v1385_v5 = vpop.f32.mrb[29].mxu0  ;;  %v3675_v10 = vpop.f32.mrb[29].mxu1  ;;  %v1444_v20 = vadd.f32 %v4797_v43, %v1424_v30 }
 0x767   :  { %v1437_v13 = vadd.f32 %v1385_v5, %v4774_v55  ;;  %v1387_v12 = vpop.f32.mrb[30].mxu0  ;;  %v1427_v2 = vpop.f32.mrb[30].mxu1 }
 0x768   :  { %v3301_v60 = vmul.f32 -1.442695, %v1430_v17  ;;  %v1388_v11 = vpop.f32.mrb[31].mxu0  ;;  %v3676_v36 = vpop.f32.mrb[31].mxu1 }
 0x769   :  { %v3302_v32 = vmul.f32 -1.442695, %v1437_v13 }
 0x76a   :  { %4054 = vpow2.f32 %v3301_v60 }
 0x76b   :  { %4056 = vpow2.f32 %v3302_v32 }
 0x774   :  { %v4055_v14 = vpop.eup %4054 }
 0x775   :  { %v1434_v16 = vadd.f32 1.0, %v4055_v14  ;;  %v4057_v18 = vpop.eup %4056 }
 0x776   :  { %v1441_v19 = vadd.f32 1.0, %v4057_v18 }
 0x777   :  { %4058 = vrcp.f32 %v1434_v16 }
 0x778   :  { %4060 = vrcp.f32 %v1441_v19 }
 0x781   :  { %v4059_v28 = vpop.eup %4058 }
 0x782   :  { %v1445_v21 = vmul.f32 %v4059_v28, %v1444_v20  ;;  %v4061_v22 = vpop.eup %4060 }
 0x783   :  { %v1448_v23 = vsub.f32 1.0, %v4061_v22  ;;  %v1450_v54 = vmul.f32 %v4061_v22, %v5113_v40  ;;  %v3960_v40 = vld [vmem:[#allocation8 + $0xac] ss:$12 sps:$4 sm:$0xff]  }
 0x784   :  { %v1446_v55 = vadd.f32 %v1445_v21, %v4760_v42 }
 0x786   :  { %4062 = vtanh.f32 %v1446_v55 }
 0x790   :  { %v4063_v0 = vpop.eup %4062 }
 0x791   :  { %v1449_v44 = vmul.f32 %v4063_v0, %v1448_v23 }
 0x793   :  { %v5164_v25 = vadd.f32 %v1450_v54, %v1449_v44 }
 0x795   :  { %v1459_v27 = vrot.slane %v5164_v25, %v4802_v1  ;;  %v1484_v43 = vpack.c.bf16 %v5164_v25, %v5164_v25 }
 0x797   :  { %v1460_v29 = vcombine.high %v1459_v27, %v1459_v27  ;;  %v1467_v6 = vrot.slane %v1459_v27, %v4802_v1  ;;  %1518 = vmatmul.mubr.bf16.vlgmr.msra.gmra.mrb[32].mxu0 %v1484_v43  ;;  %3694 = vmatmul.mubr.bf16.vlgmr.msra.gmra.mrb[32].mxu1 %v1484_v43 }
 0x798   :  { %1830 = vmatprep.mubr.bf16.mxu0 %v6014_v4  ;;  %3713 = vmatprep.mubr.msk.bf16.mxu1 %vm4331_vm0, %v6013_v37 }
 0x799   :  { %v1474_v42 = vrot.slane %v1460_v29, %v4802_v1  ;;  %1477 = vst.msk [vmem:[#allocation2 + $0x6] sm:$0x1] %vm590_vm6, %v1467_v6  ;;  %1799 = vmatpush1.bf16.msra.mxu0 %v3930_v47  ;;  %3698 = vmatpush3.bf16.msra.mxu1 %v3933_v58  ;;  %v5211_v47 = vld [vmem:[#allocation9 + $0xd8] ss:$12 sps:$4 sm:$0xff]   ;;  %v5214_v58 = vld [vmem:[#allocation9 + $0xe0] ss:$12 sps:$4 sm:$0xff]  }
 0x79a   :  { %1479 = vst.msk [vmem:[#allocation2 + $0x1] sm:$0x1] %vm593_vm7, %v1467_v6  ;;  %3699 = vmatprep.subr.bf16.mxu1 %v6013_v37  ;;  %1800 = vmatprep.subr.bf16.mxu0 %v3936_v51  ;;  %v5206_v6 = vld [vmem:[#allocation9 + $0xc8] ss:$12 sps:$4 sm:$0xff]  }
 0x79b   :  { %1478 = vst.msk [vmem:[#allocation2 + $0xe] sm:$0x1] %vm590_vm6, %v1474_v42  ;;  %v5217_v51 = vld [vmem:[#allocation9 + $0xf4] ss:$12 sps:$4 sm:$0xff]  }
 0x79c   :  { %1480 = vst.msk [vmem:[#allocation2 + $0x9] sm:$0x1] %vm593_vm7, %v1474_v42 }
 0x79d   :  { %1801 = vmatpush1.bf16.msra.mxu0 %v3934_v56  ;;  %3700 = vmatpush3.bf16.msra.mxu1 %v3937_v49  ;;  %v5224_v56 = vld [vmem:[#allocation9 + $0xf0] ss:$12 sps:$4 sm:$0xff]   ;;  %v5227_v49 = vld [vmem:[#allocation9 + $0xf8] ss:$12 sps:$4 sm:$0xff]  }
 0x79e   :  { %1802 = vmatprep.subr.bf16.mxu0 %v3940_v8  ;;  %3701 = vmatprep.subr.bf16.mxu1 %v6013_v37  ;;  %v5234_v8 = vld [vmem:[#allocation9 + $0x108] ss:$12 sps:$4 sm:$0xff]  }
 0x7a1   :  { %1803 = vmatpush1.bf16.msra.mxu0 %v3938_v7  ;;  %3702 = vmatpush3.bf16.msra.mxu1 %v3941_v41  ;;  %v5230_v7 = vld [vmem:[#allocation9 + $0x10c] ss:$12 sps:$4 sm:$0xff]   ;;  %v5237_v41 = vld [vmem:[#allocation9 + $0x110] ss:$12 sps:$4 sm:$0xff]  }
 0x7a2   :  { %1804 = vmatprep.subr.bf16.mxu0 %v3944_v15  ;;  %3703 = vmatprep.subr.bf16.mxu1 %v6013_v37  ;;  %v5240_v15 = vld [vmem:[#allocation9 + $0x124] ss:$12 sps:$4 sm:$0xff]  }
 0x7a5   :  { %1805 = vmatpush1.bf16.msra.mxu0 %v3942_v62  ;;  %3704 = vmatpush3.bf16.msra.mxu1 %v3945_v63  ;;  %v5244_v62 = vld [vmem:[#allocation9 + $0x120] ss:$12 sps:$4 sm:$0xff]   ;;  %v5247_v63 = vld [vmem:[#allocation9 + $0x128] ss:$12 sps:$4 sm:$0xff]  }
 0x7a6   :  { %1806 = vmatprep.subr.bf16.mxu0 %v3948_v31  ;;  %3705 = vmatprep.subr.bf16.mxu1 %v6013_v37  ;;  %v5250_v31 = vld [vmem:[#allocation9 + $0x13c] ss:$12 sps:$4 sm:$0xff]  }
 0x7a9   :  { %1807 = vmatpush1.bf16.msra.mxu0 %v3946_v9  ;;  %3706 = vmatpush3.bf16.msra.mxu1 %v3949_v46  ;;  %v5254_v9 = vld [vmem:[#allocation9 + $0x138] ss:$12 sps:$4 sm:$0xff]   ;;  %v5257_v46 = vld [vmem:[#allocation9 + $0x140] ss:$12 sps:$4 sm:$0xff]  }
 0x7aa   :  { %1808 = vmatprep.subr.bf16.mxu0 %v3952_v59  ;;  %3707 = vmatprep.subr.bf16.mxu1 %v6013_v37  ;;  %v5260_v59 = vld [vmem:[#allocation9 + $0x154] ss:$12 sps:$4 sm:$0xff]  }
 0x7ab   :  { %6027 = vst [vmem:[#allocation20_spill] sm:$0xff] %v5260_v59 }
 0x7ad   :  { %1809 = vmatpush1.bf16.msra.mxu0 %v3950_v53  ;;  %3708 = vmatpush3.bf16.msra.mxu1 %v3953_v57  ;;  %v5264_v53 = vld [vmem:[#allocation9 + $0x150] ss:$12 sps:$4 sm:$0xff]   ;;  %v5267_v57 = vld [vmem:[#allocation9 + $0x158] ss:$12 sps:$4 sm:$0xff]  }
 0x7ae   :  { %1810 = vmatprep.subr.bf16.mxu0 %v3956_v48  ;;  %3709 = vmatprep.subr.bf16.mxu1 %v6013_v37  ;;  %6028 = vst [vmem:[#allocation18_spill] sm:$0xff] %v5264_v53  ;;  %6029 = vst [vmem:[#allocation19_spill] sm:$0xff] %v5267_v57  ;;  %v5270_v48 = vld [vmem:[#allocation9 + $0x16c] ss:$12 sps:$4 sm:$0xff]  }
 0x7af   :  { %6030 = vst [vmem:[#allocation21_spill] sm:$0xff] %v5270_v48 }
 0x7b1   :  { %1811 = vmatpush1.bf16.msra.mxu0 %v3954_v50  ;;  %3710 = vmatpush3.bf16.msra.mxu1 %v3957_v38  ;;  %v5274_v50 = vld [vmem:[#allocation9 + $0x168] ss:$12 sps:$4 sm:$0xff]   ;;  %v5279_v38 = vld [vmem:[%s5955_s6 + $0x2] sm:$0x3] }
 0x7b2   :  { %1812 = vmatprep.subr.bf16.mxu0 %v3960_v40  ;;  %3711 = vmatprep.subr.bf16.mxu1 %v6013_v37  ;;  %6031 = vst [vmem:[#allocation16_spill] sm:$0xff] %v5274_v50  ;;  %v5282_v40 = vld [vmem:[#allocation9 + $0x170] ss:$12 sps:$4 sm:$0xff]  }
 0x7b3   :  { %6032 = vst [vmem:[#allocation26_spill] sm:$0xff] %v5282_v40 }
 0x7b5   :  { %1813 = vmatpush1.bf16.msra.mxu0 %v3958_v33  ;;  %3712 = vmatpush3.bf16.msra.mxu1 %v3961_v24  ;;  %v1955_v33 = vpack.c.bf16 %v5279_v38, %v5279_v38  ;;  %v3305_v24 = vld [vmem:[%s5953_s4 + $0x3] sm:$0x7] }
 0x7b6   :  { %2084 = vmatprep.subr.bf16.mxu0 %v5185_v34  ;;  %3717 = vmatprep.subr.bf16.mxu1 %v6013_v37 }
 0x86a   :  { %v1519_v26 = vpop.f32.mrb[32].mxu0  ;;  %v1560_v39 = vpop.f32.mrb[32].mxu1 }
 0x86b   :  { %v1566_v52 = vadd.f32 %v1519_v26, %v4780_v3  ;;  %v1521_v30 = vpop.f32.mrb[33].mxu0  ;;  %v3695_v17 = vpop.f32.mrb[33].mxu1  ;;  %v4178_v3 = vld [vmem:[%s5954_s5] ss:$0 sm:$0xff]  ;;  %v6033_v26 = vld [vmem:[#allocation22_spill] sm:$0xff] }
 0x86c   :  { %v1573_v5 = vadd.f32 %v1521_v30, %v4790_v61  ;;  %v1523_v10 = vpop.f32.mrb[34].mxu0  ;;  %v1563_v13 = vpop.f32.mrb[34].mxu1  ;;  %v1580_v18 = vadd.f32 %v4178_v3, %v1560_v39  ;;  %v6034_v39 = vsub.s32 0, %v6033_v26  ;;  %v6035_v30 = vsub.s32 2, %v6033_v26 }
 0x86d   :  { %v3303_v12 = vmul.f32 -1.442695, %v1566_v52  ;;  %v1524_v2 = vpop.f32.mrb[35].mxu0  ;;  %v3696_v60 = vpop.f32.mrb[35].mxu1 }
 0x86e   :  { %v3304_v11 = vmul.f32 -1.442695, %v1573_v5  ;;  %v1658_v52 = vrot.slane %v3305_v24, %v6034_v39  ;;  %v1666_v17 = vrot.slane %v3305_v24, %v6035_v30  ;;  %v6036_v5 = vsub.s32 1, %v6033_v26 }
 0x86f   :  { %4064 = vpow2.f32 %v3303_v12 }
 0x870   :  { %4066 = vpow2.f32 %v3304_v11  ;;  %v1662_v10 = vrot.slane %v3305_v24, %v6036_v5 }
 0x879   :  { %v4065_v36 = vpop.eup %4064 }
 0x87a   :  { %v1570_v32 = vadd.f32 1.0, %v4065_v36  ;;  %v4067_v14 = vpop.eup %4066 }
 0x87b   :  { %v1577_v16 = vadd.f32 1.0, %v4067_v14 }
 0x87c   :  { %4068 = vrcp.f32 %v1570_v32 }
 0x87d   :  { %4070 = vrcp.f32 %v1577_v16 }
 0x886   :  { %v4069_v19 = vpop.eup %4068 }
 0x887   :  { %v1581_v61 = vmul.f32 %v4069_v19, %v1580_v18  ;;  %v4071_v28 = vpop.eup %4070 }
 0x888   :  { %v1584_v21 = vsub.f32 1.0, %v4071_v28  ;;  %v1586_v23 = vmul.f32 %v4071_v28, %v5164_v25 }
 0x889   :  { %v1582_v20 = vadd.f32 %v1581_v61, %v4784_v35  ;;  %v5204_v35 = vld [vmem:[#allocation9 + $0xc0] ss:$12 sps:$4 sm:$0xff]  }
 0x88b   :  { %4072 = vtanh.f32 %v1582_v20 }
 0x895   :  { %v4073_v55 = vpop.eup %4072 }
 0x896   :  { %v1585_v22 = vmul.f32 %v4073_v55, %v1584_v21 }
 0x898   :  { %v1587_v0 = vadd.f32 %v1586_v23, %v1585_v22 }
 0x89a   :  { %v1595_v44 = vrot.slane %v1587_v0, %v4802_v1 }
 0x89c   :  { %v1596_v54 = vcombine.high %v1595_v44, %v1595_v44  ;;  %v1603_v27 = vrot.slane %v1595_v44, %v4802_v1 }
 0x89e   :  { %v1610_v43 = vrot.slane %v1596_v54, %v4802_v1  ;;  %1613 = vst.msk [vmem:[#allocation2 + $0x7] sm:$0x1] %vm590_vm6, %v1603_v27 }
 0x89f   :  { %1615 = vst.msk [vmem:[#allocation2] sm:$0x1] %vm593_vm7, %v1603_v27 }
 0x8a0   :  { %1614 = vst.msk [vmem:[#allocation2 + $0xf] sm:$0x1] %vm590_vm6, %v1610_v43 }
 0x8a1   :  { %1616 = vst.msk [vmem:[#allocation2 + $0x8] sm:$0x1] %vm593_vm7, %v1610_v43 }
 0x8a6   :  { %v1617_v29 = vld [vmem:[#allocation2] sm:$0xff] }
 0x8a8   :  { %v1618_v25 = vld [vmem:[#allocation2 + $0x8] sm:$0xff] }
 0x8a9   :  { %v1651_v42 = vpack.c.bf16 %v1618_v25, %v1617_v29 }
 0x8ab   :  { %1831 = vmatmul.mubr.bf16.vlgmr.msra.gmra.mrb[36].mxu0 %v1651_v42  ;;  %3714 = vmatmul.mubr.bf16.vlgmr.msra.gmra.mrb[36].mxu1 %v1651_v42 }
 0x8ac   :  { %2085 = vmatpush1.bf16.msra.mxu0 %v5204_v35  ;;  %3718 = vmatpush3.bf16.msra.mxu1 %v5206_v6 }
 0x8ad   :  { %2086 = vmatprep.subr.bf16.mxu0 %v5208_v45  ;;  %3719 = vmatprep.subr.bf16.mxu1 %v6013_v37 }
 0x8ae   :  { %2116 = vmatprep.mubr.bf16.mxu0 %v6014_v4  ;;  %3733 = vmatprep.mubr.msk.bf16.mxu1 %vm4331_vm0, %v6013_v37 }
 0x8b0   :  { %2087 = vmatpush1.bf16.msra.mxu0 %v5211_v47  ;;  %3720 = vmatpush3.bf16.msra.mxu1 %v5214_v58 }
 0x8b1   :  { %2088 = vmatprep.subr.bf16.mxu0 %v5217_v51  ;;  %3721 = vmatprep.subr.bf16.mxu1 %v6013_v37 }
 0x8b4   :  { %2089 = vmatpush1.bf16.msra.mxu0 %v5224_v56  ;;  %3722 = vmatpush3.bf16.msra.mxu1 %v5227_v49 }
 0x8b5   :  { %2090 = vmatprep.subr.bf16.mxu0 %v5230_v7  ;;  %3723 = vmatprep.subr.bf16.mxu1 %v6013_v37 }
 0x8b8   :  { %2091 = vmatpush1.bf16.msra.mxu0 %v5234_v8  ;;  %3724 = vmatpush3.bf16.msra.mxu1 %v5237_v41 }
 0x8b9   :  { %2092 = vmatprep.subr.bf16.mxu0 %v5240_v15  ;;  %3725 = vmatprep.subr.bf16.mxu1 %v6013_v37 }
 0x8bc   :  { %2093 = vmatpush1.bf16.msra.mxu0 %v5244_v62  ;;  %3726 = vmatpush3.bf16.msra.mxu1 %v5247_v63 }
 0x8bd   :  { %2094 = vmatprep.subr.bf16.mxu0 %v5250_v31  ;;  %3727 = vmatprep.subr.bf16.mxu1 %v6013_v37 }
 0x8c0   :  { %2095 = vmatpush1.bf16.msra.mxu0 %v5254_v9  ;;  %3728 = vmatpush3.bf16.msra.mxu1 %v5257_v46 }
 0x8c1   :  { %2096 = vmatprep.subr.bf16.mxu0 %v5260_v59  ;;  %3729 = vmatprep.subr.bf16.mxu1 %v6013_v37 }
 0x8c4   :  { %2097 = vmatpush1.bf16.msra.mxu0 %v5264_v53  ;;  %3730 = vmatpush3.bf16.msra.mxu1 %v5267_v57 }
 0x8c5   :  { %2098 = vmatprep.subr.bf16.mxu0 %v5270_v48  ;;  %3731 = vmatprep.subr.bf16.mxu1 %v6013_v37 }
 0x8c8   :  { %2099 = vmatpush1.bf16.msra.mxu0 %v5274_v50  ;;  %3732 = vmatpush3.bf16.msra.mxu1 %v5282_v40 }
 0x8c9   :  { %2241 = vmatprep.subr.bf16.mxu0 %v5185_v34  ;;  %3737 = vmatprep.subr.bf16.mxu1 %v6013_v37 }
 0x8cb   :  { %2117 = vmatmul.mubr.bf16.vlgmr.msra.gmra.mrb[40].mxu0 %v1955_v33  ;;  %3734 = vmatmul.mubr.bf16.vlgmr.msra.gmra.mrb[40].mxu1 %v1955_v33 }
 0x8cc   :  { %2242 = vmatpush1.bf16.msra.mxu0 %v5204_v35  ;;  %3738 = vmatpush3.bf16.msra.mxu1 %v5206_v6 }
 0x8cd   :  { %2243 = vmatprep.subr.bf16.mxu0 %v5208_v45  ;;  %3739 = vmatprep.subr.bf16.mxu1 %v6013_v37 }
 0x8ce   :  { %2273 = vmatprep.mubr.bf16.mxu0 %v6014_v4  ;;  %3753 = vmatprep.mubr.msk.bf16.mxu1 %vm4331_vm0, %v6013_v37 }
 0x8d0   :  { %2244 = vmatpush1.bf16.msra.mxu0 %v5211_v47  ;;  %3740 = vmatpush3.bf16.msra.mxu1 %v5214_v58 }
 0x8d1   :  { %2245 = vmatprep.subr.bf16.mxu0 %v5217_v51  ;;  %3741 = vmatprep.subr.bf16.mxu1 %v6013_v37 }
 0x8d4   :  { %2246 = vmatpush1.bf16.msra.mxu0 %v5224_v56  ;;  %3742 = vmatpush3.bf16.msra.mxu1 %v5227_v49 }
 0x8d5   :  { %2247 = vmatprep.subr.bf16.mxu0 %v5230_v7  ;;  %3743 = vmatprep.subr.bf16.mxu1 %v6013_v37 }
 0x8d8   :  { %2248 = vmatpush1.bf16.msra.mxu0 %v5234_v8  ;;  %3744 = vmatpush3.bf16.msra.mxu1 %v5237_v41 }
 0x8d9   :  { %2249 = vmatprep.subr.bf16.mxu0 %v5240_v15  ;;  %3745 = vmatprep.subr.bf16.mxu1 %v6013_v37 }
 0x8dc   :  { %2250 = vmatpush1.bf16.msra.mxu0 %v5244_v62  ;;  %3746 = vmatpush3.bf16.msra.mxu1 %v5247_v63 }
 0x8dd   :  { %2251 = vmatprep.subr.bf16.mxu0 %v5250_v31  ;;  %3747 = vmatprep.subr.bf16.mxu1 %v6013_v37 }
 0x8e0   :  { %2252 = vmatpush1.bf16.msra.mxu0 %v5254_v9  ;;  %3748 = vmatpush3.bf16.msra.mxu1 %v5257_v46 }
 0x8e1   :  { %2253 = vmatprep.subr.bf16.mxu0 %v5260_v59  ;;  %3749 = vmatprep.subr.bf16.mxu1 %v6013_v37 }
 0x8e4   :  { %2254 = vmatpush1.bf16.msra.mxu0 %v5264_v53  ;;  %3750 = vmatpush3.bf16.msra.mxu1 %v5267_v57 }
 0x8e5   :  { %2255 = vmatprep.subr.bf16.mxu0 %v5270_v48  ;;  %3751 = vmatprep.subr.bf16.mxu1 %v6013_v37 }
 0x8e8   :  { %2256 = vmatpush1.bf16.msra.mxu0 %v5274_v50  ;;  %3752 = vmatpush3.bf16.msra.mxu1 %v5282_v40 }
 0x8e9   :  { %2401 = vmatprep.subr.bf16.mxu0 %v5185_v34  ;;  %3757 = vmatprep.subr.bf16.mxu1 %v6013_v37 }
 0x97e   :  { %v1832_v13 = vpop.f32.mrb[36].mxu0  ;;  %v1875_v12 = vpop.f32.mrb[36].mxu1 }
 0x97f   :  { %v5336_v2 = vadd.f32 %v1832_v13, %v1658_v52  ;;  %v5338_v60 = vadd.f32 %v1875_v12, %v1666_v17  ;;  %v1834_v11 = vpop.f32.mrb[37].mxu0  ;;  %v3715_v36 = vpop.f32.mrb[37].mxu1 }
 0x980   :  { %v5340_v32 = vadd.f32 %v1834_v11, %v1662_v10  ;;  %v1836_v14 = vpop.f32.mrb[38].mxu0  ;;  %v1878_v16 = vpop.f32.mrb[38].mxu1 }
 0x981   :  { %v5342_v3 = vadd.f32 %v1836_v14, %v1658_v52  ;;  %v5344_v18 = vadd.f32 %v1878_v16, %v1666_v17  ;;  %v1838_v19 = vpop.f32.mrb[39].mxu0  ;;  %v3716_v61 = vpop.f32.mrb[39].mxu1  ;;  %v1940_v20 = vrot.slane %v5336_v2, 7  ;;  %v1946_v28 = vrot.slane %v5338_v60, 7 }
 0x982   :  { %v5348_v21 = vadd.f32 %v1838_v19, %v1662_v10  ;;  %v1943_v55 = vrot.slane %v5340_v32, 7  ;;  %v2216_v22 = vrot.slane %v5336_v2, 1  ;;  %v2225_v23 = vrot.slane %v5336_v2, 6 }
 0x983   :  { %v1931_v0 = vrot.slane %v5342_v3, 7  ;;  %v1941_v44 = vrot.slane %v5342_v3, 6  ;;  %v1935_v54 = vrot.slane %v5344_v18, 7  ;;  %v1947_v27 = vrot.slane %v5344_v18, 6 }
 0x984   :  { %v1933_v43 = vrot.slane %v5348_v21, 7  ;;  %v1944_v29 = vrot.slane %v5348_v21, 6  ;;  %v5361_v25 = vsel %vm309_vm4, %v5342_v3, %v2216_v22  ;;  %v2226_v42 = vrot.slane %v5342_v3, 5 }
 0x985   :  { %v5366_v33 = vsel %vm309_vm4, %v1931_v0, %v5336_v2  ;;  %v5369_v24 = vsel %vm309_vm4, %v1941_v44, %v1940_v20  ;;  %v5373_v26 = vsel %vm309_vm4, %v1935_v54, %v5338_v60  ;;  %v5376_v39 = vsel %vm309_vm4, %v1947_v27, %v1946_v28 }
 0x986   :  { %v5382_v30 = vsel %vm87_vm2, %v5366_v33, %v5369_v24  ;;  %v5386_v17 = vsel %vm309_vm4, %v1933_v43, %v5340_v32  ;;  %v5389_v5 = vsel %vm309_vm4, %v1944_v29, %v1943_v55  ;;  %v5395_v13 = vsel %vm107_vm5, %v5373_v26, %v5376_v39 }
 0x987   :  { %v5401_v11 = vsel %vm94_vm3, %v5386_v17, %v5389_v5  ;;  %v5404_v36 = vsel %vm309_vm4, %v2226_v42, %v2225_v23  ;;  %v2220_v14 = vrot.slane %v5338_v60, 1  ;;  %v2231_v16 = vrot.slane %v5338_v60, 6 }
 0x988   :  { %v5412_v19 = vsel %vm87_vm2, %v5361_v25, %v5404_v36  ;;  %v2232_v61 = vrot.slane %v5344_v18, 5  ;;  %v2218_v20 = vrot.slane %v5340_v32, 1  ;;  %v2228_v28 = vrot.slane %v5340_v32, 6 }
 0x989   :  { %6040 = vst [vmem:[#allocation27_spill] sm:$0xff] %v5412_v19  ;;  %v2221_v55 = vsel %vm309_vm4, %v5344_v18, %v2220_v14  ;;  %v2229_v22 = vrot.slane %v5348_v21, 5  ;;  %v2373_v23 = vrot.slane %v5336_v2, 2  ;;  %v2374_v0 = vrot.slane %v5342_v3, 1 }
 0x98a   :  { %v2233_v44 = vsel %vm309_vm4, %v2232_v61, %v2231_v16  ;;  %v2219_v54 = vsel %vm309_vm4, %v5348_v21, %v2218_v20  ;;  %v2385_v27 = vrot.slane %v5336_v2, 5  ;;  %v2386_v43 = vrot.slane %v5342_v3, 4 }
 0x98b   :  { %v5429_v29 = vsel %vm107_vm5, %v2221_v55, %v2233_v44  ;;  %v2230_v42 = vsel %vm309_vm4, %v2229_v22, %v2228_v28  ;;  %v2375_v14 = vsel %vm309_vm4, %v2374_v0, %v2373_v23  ;;  %v2379_v19 = vrot.slane %v5338_v60, 2 }
 0x98c   :  { %6041 = vst [vmem:[#allocation29_spill] sm:$0xff] %v5429_v29  ;;  %v5436_v16 = vsel %vm94_vm3, %v2219_v54, %v2230_v42  ;;  %v2387_v61 = vsel %vm309_vm4, %v2386_v43, %v2385_v27  ;;  %v2380_v20 = vrot.slane %v5344_v18, 1  ;;  %v2391_v34 = vrot.slane %v5338_v60, 5 }
 0x98d   :  { %6042 = vst [vmem:[#allocation28_spill] sm:$0xff] %v5436_v16  ;;  %v5443_v40 = vsel %vm87_vm2, %v2375_v14, %v2387_v61  ;;  %v2392_v28 = vrot.slane %v5344_v18, 4  ;;  %v2376_v22 = vrot.slane %v5340_v32, 2  ;;  %v2377_v23 = vrot.slane %v5348_v21, 1 }
 0x98e   :  { %6043 = vst [vmem:[#allocation30_spill] sm:$0xff] %v5443_v40  ;;  %v2381_v0 = vsel %vm309_vm4, %v2380_v20, %v2379_v19  ;;  %v2388_v29 = vrot.slane %v5340_v32, 5  ;;  %v2389_v27 = vrot.slane %v5348_v21, 4  ;;  %v2533_v43 = vrot.slane %v5336_v2, 3 }
 0x98f   :  { %v2393_v16 = vsel %vm309_vm4, %v2392_v28, %v2391_v34  ;;  %v2378_v50 = vsel %vm309_vm4, %v2377_v23, %v2376_v22  ;;  %v2534_v40 = vrot.slane %v5342_v3, 2  ;;  %v2545_v48 = vrot.slane %v5336_v2, 4 }
 0x990   :  { %v5458_v57 = vsel %vm107_vm5, %v2381_v0, %v2393_v16  ;;  %v2390_v19 = vsel %vm309_vm4, %v2389_v27, %v2388_v29  ;;  %v2546_v20 = vrot.slane %v5342_v3, 3  ;;  %v2539_v53 = vrot.slane %v5338_v60, 3 }
 0x991   :  { %6044 = vst [vmem:[#allocation22_spill] sm:$0xff] %v5458_v57  ;;  %v5465_v59 = vsel %vm94_vm3, %v2378_v50, %v2390_v19  ;;  %v2535_v34 = vsel %vm309_vm4, %v2534_v40, %v2533_v43  ;;  %v2540_v28 = vrot.slane %v5344_v18, 2  ;;  %v2551_v2 = vrot.slane %v5338_v60, 4 }
 0x992   :  { %v2547_v22 = vsel %vm309_vm4, %v2546_v20, %v2545_v48  ;;  %v2552_v23 = vrot.slane %v5344_v18, 3  ;;  %v2536_v29 = vrot.slane %v5340_v32, 3  ;;  %v2537_v3 = vrot.slane %v5348_v21, 2 }
 0x993   :  { %v5476_v27 = vsel %vm87_vm2, %v2535_v34, %v2547_v22  ;;  %v2541_v57 = vsel %vm309_vm4, %v2540_v28, %v2539_v53  ;;  %v2548_v40 = vrot.slane %v5340_v32, 4  ;;  %v2549_v43 = vrot.slane %v5348_v21, 3 }
 0x994   :  { %6045 = vst [vmem:[#allocation23_spill] sm:$0xff] %v5476_v27  ;;  %v2553_v60 = vsel %vm309_vm4, %v2552_v23, %v2551_v2  ;;  %v2538_v48 = vsel %vm309_vm4, %v2537_v3, %v2536_v29  ;;  %v5485_v18 = vsel %vm87_vm2, %v2547_v22, %v2535_v34  ;;  %v5489_v20 = vsel %vm87_vm2, %v2387_v61, %v2375_v14 }
 0x995   :  { %v5493_v27 = vsel %vm107_vm5, %v2541_v57, %v2553_v60  ;;  %v2550_v53 = vsel %vm309_vm4, %v2549_v43, %v2548_v40  ;;  %v5498_v32 = vsel %vm107_vm5, %v2553_v60, %v2541_v57  ;;  %v5502_v21 = vsel %vm107_vm5, %v2393_v16, %v2381_v0 }
 0x996   :  { %v5506_v34 = vsel %vm94_vm3, %v2538_v48, %v2550_v53  ;;  %v5510_v14 = vsel %vm94_vm3, %v2550_v53, %v2538_v48  ;;  %v5514_v61 = vsel %vm94_vm3, %v2390_v19, %v2378_v50  ;;  %v5520_v57 = vsel %vm87_vm2, %v5404_v36, %v5361_v25 }
 0x997   :  { %v5524_v16 = vsel %vm107_vm5, %v2233_v44, %v2221_v55  ;;  %v5528_v0 = vsel %vm94_vm3, %v2230_v42, %v2219_v54  ;;  %v5534_v50 = vsel %vm87_vm2, %v5369_v24, %v5366_v33  ;;  %v5540_v25 = vsel %vm107_vm5, %v5376_v39, %v5373_v26 }
 0x998   :  { %v5546_v36 = vsel %vm94_vm3, %v5389_v5, %v5386_v17 }
 0x99e   :  { %v2118_v55 = vpop.f32.mrb[40].mxu0  ;;  %v2159_v44 = vpop.f32.mrb[40].mxu1 }
 0x99f   :  { %v2165_v54 = vadd.f32 %v2118_v55, %v5382_v30  ;;  %v2120_v42 = vpop.f32.mrb[41].mxu0  ;;  %v3735_v52 = vpop.f32.mrb[41].mxu1  ;;  %v5553_v30 = vld [vmem:[%s5954_s5 + $0x1] ss:$0 sm:$0xff]  ;;  %s4333_s5 = smov [#allocation11]  }
 0x9a0   :  { %v2172_v33 = vadd.f32 %v2120_v42, %v5401_v11  ;;  %v2122_v24 = vpop.f32.mrb[42].mxu0  ;;  %v2162_v19 = vpop.f32.mrb[42].mxu1  ;;  %v2179_v11 = vadd.f32 %v5553_v30, %v2159_v44  ;;  %v6047_v52 = vld [vmem:[#allocation18_spill] sm:$0xff]  ;;  %s3242_s0 = sshll.u32 %s4333_s5, 4  ;;  %s3243_s0 = int_to_ptr.vmem [resolvable:$true] %s3242_s0 }
 0x9a1   :  { %v3357_v28 = vmul.f32 -1.442695, %v2165_v54  ;;  %v2123_v10 = vpop.f32.mrb[43].mxu0  ;;  %v3736_v26 = vpop.f32.mrb[43].mxu1  ;;  %v6049_v24 = vld [vmem:[#allocation21_spill] sm:$0xff]  ;;  %v6050_v19 = vld [vmem:[#allocation16_spill] sm:$0xff]  ;;  %p4296_p5 = scmp.lt.s32.totalorder %s3243_s0, %s3243_s0 }
 0x9a2   :  { %v3358_v39 = vmul.f32 -1.442695, %v2172_v33  ;;  %v6048_v33 = vld [vmem:[#allocation19_spill] sm:$0xff]  ;;  %v6052_v10 = vld [vmem:[#allocation17_spill] sm:$0xff]  ;;  %s4291_s16 = scalar_lea.vmem %s3243_s0, 256 }
 0x9a3   :  { %4074 = vpow2.f32 %v3357_v28  ;;  %v6051_v28 = vld [vmem:[#allocation26_spill] sm:$0xff]  ;;  %p4292_p4 = scmp.ne.s32.totalorder %s3243_s0, %s4291_s16  ;;  %p4297_p6 = scmp.lt.s32.totalorder %s4291_s16, %s4291_s16 }
 0x9a4   :  { %4076 = vpow2.f32 %v3358_v39 }
 0x9a5   :  { %p4298_p7 = por %p4297_p6, %p4296_p5 }
 0x9a7   :  { %p4299_p8 = pnand %p4298_p7, %p4292_p4 }
 0x9ad   :  { %v4075_v2 = vpop.eup %4074 }
 0x9ae   :  { %v2169_v12 = vadd.f32 1.0, %v4075_v2  ;;  %v4077_v17 = vpop.eup %4076  ;;  %v6053_v2 = vld [vmem:[#allocation27_spill] sm:$0xff] }
 0x9af   :  { %v2176_v5 = vadd.f32 1.0, %v4077_v17 }
 0x9b0   :  { %4078 = vrcp.f32 %v2169_v12 }
 0x9b1   :  { %4080 = vrcp.f32 %v2176_v5 }
 0x9ba   :  { %v4079_v22 = vpop.eup %4078 }
 0x9bb   :  { %v2180_v23 = vmul.f32 %v4079_v22, %v2179_v11  ;;  %v4081_v3 = vpop.eup %4080  ;;  %v6054_v11 = vld [vmem:[#allocation28_spill] sm:$0xff] }
 0x9bc   :  { %v2183_v40 = vsub.f32 1.0, %v4081_v3  ;;  %v2185_v48 = vmul.f32 %v4081_v3, %v5279_v38  ;;  %v6046_v38 = vld [vmem:[#allocation20_spill] sm:$0xff] }
 0x9bd   :  { %v2181_v29 = vadd.f32 %v2180_v23, %v5395_v13 }
 0x9bf   :  { %4082 = vtanh.f32 %v2181_v29 }
 0x9c9   :  { %v4083_v43 = vpop.eup %4082 }
 0x9ca   :  { %v2184_v60 = vmul.f32 %v4083_v43, %v2183_v40 }
 0x9cc   :  { %v5558_v53 = vadd.f32 %v2185_v48, %v2184_v60 }
 0x9ce   :  { %v2194_v55 = vrot.slane %v5558_v53, %v4802_v1  ;;  %v2240_v44 = vpack.c.bf16 %v5558_v53, %v5558_v53 }
 0x9d0   :  { %v2195_v54 = vcombine.high %v2194_v55, %v2194_v55  ;;  %v2202_v42 = vrot.slane %v2194_v55, %v4802_v1  ;;  %2274 = vmatmul.mubr.bf16.vlgmr.msra.gmra.mrb[44].mxu0 %v2240_v44  ;;  %3754 = vmatmul.mubr.bf16.vlgmr.msra.gmra.mrb[44].mxu1 %v2240_v44 }
 0x9d1   :  { %2402 = vmatpush1.bf16.msra.mxu0 %v5204_v35  ;;  %3758 = vmatpush3.bf16.msra.mxu1 %v5206_v6 }
 0x9d2   :  { %v2209_v13 = vrot.slane %v2195_v54, %v4802_v1  ;;  %2212 = vst.msk [vmem:[#allocation11] sm:$0x1] %vm590_vm6, %v2202_v42  ;;  %2403 = vmatprep.subr.bf16.mxu0 %v5208_v45  ;;  %3759 = vmatprep.subr.bf16.mxu1 %v6013_v37 }
 0x9d3   :  { %2214 = vst.msk [vmem:[#allocation11 + $0x7] sm:$0x1] %vm593_vm7, %v2202_v42  ;;  %2433 = vmatprep.mubr.bf16.mxu0 %v6014_v4  ;;  %3773 = vmatprep.mubr.msk.bf16.mxu1 %vm4331_vm0, %v6013_v37 }
 0x9d4   :  { %2213 = vst.msk [vmem:[#allocation11 + $0x8] sm:$0x1] %vm590_vm6, %v2209_v13 }
 0x9d5   :  { %2215 = vst.msk [vmem:[#allocation11 + $0xf] sm:$0x1] %vm593_vm7, %v2209_v13  ;;  %2404 = vmatpush1.bf16.msra.mxu0 %v5211_v47  ;;  %3760 = vmatpush3.bf16.msra.mxu1 %v5214_v58 }
 0x9d6   :  { %2405 = vmatprep.subr.bf16.mxu0 %v5217_v51  ;;  %3761 = vmatprep.subr.bf16.mxu1 %v6013_v37 }
 0x9d9   :  { %2406 = vmatpush1.bf16.msra.mxu0 %v5224_v56  ;;  %3762 = vmatpush3.bf16.msra.mxu1 %v5227_v49 }
 0x9da   :  { %2407 = vmatprep.subr.bf16.mxu0 %v5230_v7  ;;  %3763 = vmatprep.subr.bf16.mxu1 %v6013_v37 }
 0x9dd   :  { %2408 = vmatpush1.bf16.msra.mxu0 %v5234_v8  ;;  %3764 = vmatpush3.bf16.msra.mxu1 %v5237_v41 }
 0x9de   :  { %2409 = vmatprep.subr.bf16.mxu0 %v5240_v15  ;;  %3765 = vmatprep.subr.bf16.mxu1 %v6013_v37 }
 0x9e1   :  { %2410 = vmatpush1.bf16.msra.mxu0 %v5244_v62  ;;  %3766 = vmatpush3.bf16.msra.mxu1 %v5247_v63 }
 0x9e2   :  { %2411 = vmatprep.subr.bf16.mxu0 %v5250_v31  ;;  %3767 = vmatprep.subr.bf16.mxu1 %v6013_v37 }
 0x9e5   :  { %2412 = vmatpush1.bf16.msra.mxu0 %v5254_v9  ;;  %3768 = vmatpush3.bf16.msra.mxu1 %v5257_v46 }
 0x9e6   :  { %2413 = vmatprep.subr.bf16.mxu0 %v6046_v38  ;;  %3769 = vmatprep.subr.bf16.mxu1 %v6013_v37 }
 0x9e9   :  { %2414 = vmatpush1.bf16.msra.mxu0 %v6047_v52  ;;  %3770 = vmatpush3.bf16.msra.mxu1 %v6048_v33 }
 0x9ea   :  { %2415 = vmatprep.subr.bf16.mxu0 %v6049_v24  ;;  %3771 = vmatprep.subr.bf16.mxu1 %v6013_v37 }
 0x9ed   :  { %2416 = vmatpush1.bf16.msra.mxu0 %v6050_v19  ;;  %3772 = vmatpush3.bf16.msra.mxu1 %v6051_v28 }
 0x9ee   :  { %2561 = vmatprep.subr.bf16.mxu0 %v6052_v10  ;;  %3777 = vmatprep.subr.bf16.mxu1 %v6013_v37 }
 0xaa3   :  { %v2275_v26 = vpop.f32.mrb[44].mxu0  ;;  %v2316_v39 = vpop.f32.mrb[44].mxu1 }
 0xaa4   :  { %v2322_v12 = vadd.f32 %v2275_v26, %v6053_v2  ;;  %v2277_v17 = vpop.f32.mrb[45].mxu0  ;;  %v3755_v5 = vpop.f32.mrb[45].mxu1  ;;  %v2336_v42 = vadd.f32 %v5553_v30, %v2316_v39  ;;  %v6055_v2 = vld [vmem:[#allocation29_spill] sm:$0xff] }
 0xaa5   :  { %v2329_v22 = vadd.f32 %v2277_v17, %v6054_v11  ;;  %v2279_v23 = vpop.f32.mrb[46].mxu0  ;;  %v2319_v29 = vpop.f32.mrb[46].mxu1 }
 0xaa6   :  { %v3359_v3 = vmul.f32 -1.442695, %v2322_v12  ;;  %v2280_v40 = vpop.f32.mrb[47].mxu0  ;;  %v3756_v43 = vpop.f32.mrb[47].mxu1 }
 0xaa7   :  { %v3360_v60 = vmul.f32 -1.442695, %v2329_v22 }
 0xaa8   :  { %4084 = vpow2.f32 %v3359_v3 }
 0xaa9   :  { %4086 = vpow2.f32 %v3360_v60 }
 0xab2   :  { %v4085_v48 = vpop.eup %4084 }
 0xab3   :  { %v2326_v55 = vadd.f32 1.0, %v4085_v48  ;;  %v4087_v44 = vpop.eup %4086 }
 0xab4   :  { %v2333_v54 = vadd.f32 1.0, %v4087_v44 }
 0xab5   :  { %4088 = vrcp.f32 %v2326_v55  ;;  %v6056_v55 = vld [vmem:[#allocation30_spill] sm:$0xff] }
 0xab6   :  { %4090 = vrcp.f32 %v2333_v54 }
 0xabf   :  { %v4089_v13 = vpop.eup %4088 }
 0xac0   :  { %v2337_v26 = vmul.f32 %v4089_v13, %v2336_v42  ;;  %v4091_v5 = vpop.eup %4090 }
 0xac1   :  { %v2340_v12 = vsub.f32 1.0, %v4091_v5  ;;  %v2342_v22 = vmul.f32 %v4091_v5, %v5558_v53 }
 0xac2   :  { %v2338_v17 = vadd.f32 %v2337_v26, %v6055_v2 }
 0xac4   :  { %4092 = vtanh.f32 %v2338_v17 }
 0xace   :  { %v4093_v11 = vpop.eup %4092 }
 0xacf   :  { %v2341_v23 = vmul.f32 %v4093_v11, %v2340_v12 }
 0xad1   :  { %v5610_v29 = vadd.f32 %v2342_v22, %v2341_v23 }
 0xad3   :  { %v2351_v3 = vrot.slane %v5610_v29, %v4802_v1  ;;  %v2400_v39 = vpack.c.bf16 %v5610_v29, %v5610_v29 }
 0xad5   :  { %v2352_v40 = vcombine.high %v2351_v3, %v2351_v3  ;;  %v2359_v43 = vrot.slane %v2351_v3, %v4802_v1  ;;  %2434 = vmatmul.mubr.bf16.vlgmr.msra.gmra.mrb[48].mxu0 %v2400_v39  ;;  %3774 = vmatmul.mubr.bf16.vlgmr.msra.gmra.mrb[48].mxu1 %v2400_v39 }
 0xad6   :  { %2562 = vmatpush1.bf16.msra.mxu0 %v5204_v35  ;;  %3778 = vmatpush3.bf16.msra.mxu1 %v5206_v6 }
 0xad7   :  { %v2366_v60 = vrot.slane %v2352_v40, %v4802_v1  ;;  %2369 = vst.msk [vmem:[#allocation11 + $0x1] sm:$0x1] %vm590_vm6, %v2359_v43  ;;  %2563 = vmatprep.subr.bf16.mxu0 %v5208_v45  ;;  %3779 = vmatprep.subr.bf16.mxu1 %v6013_v37 }
 0xad8   :  { %2371 = vst.msk [vmem:[#allocation11 + $0x6] sm:$0x1] %vm593_vm7, %v2359_v43  ;;  %2593 = vmatprep.mubr.bf16.mxu0 %v6014_v4  ;;  %3793 = vmatprep.mubr.msk.bf16.mxu1 %vm4331_vm0, %v6013_v37 }
 0xad9   :  { %2370 = vst.msk [vmem:[#allocation11 + $0x9] sm:$0x1] %vm590_vm6, %v2366_v60 }
 0xada   :  { %2372 = vst.msk [vmem:[#allocation11 + $0xe] sm:$0x1] %vm593_vm7, %v2366_v60  ;;  %2564 = vmatpush1.bf16.msra.mxu0 %v5211_v47  ;;  %3780 = vmatpush3.bf16.msra.mxu1 %v5214_v58 }
 0xadb   :  { %2565 = vmatprep.subr.bf16.mxu0 %v5217_v51  ;;  %3781 = vmatprep.subr.bf16.mxu1 %v6013_v37 }
 0xade   :  { %2566 = vmatpush1.bf16.msra.mxu0 %v5224_v56  ;;  %3782 = vmatpush3.bf16.msra.mxu1 %v5227_v49 }
 0xadf   :  { %2567 = vmatprep.subr.bf16.mxu0 %v5230_v7  ;;  %3783 = vmatprep.subr.bf16.mxu1 %v6013_v37 }
 0xae2   :  { %2568 = vmatpush1.bf16.msra.mxu0 %v5234_v8  ;;  %3784 = vmatpush3.bf16.msra.mxu1 %v5237_v41 }
 0xae3   :  { %2569 = vmatprep.subr.bf16.mxu0 %v5240_v15  ;;  %3785 = vmatprep.subr.bf16.mxu1 %v6013_v37 }
 0xae6   :  { %2570 = vmatpush1.bf16.msra.mxu0 %v5244_v62  ;;  %3786 = vmatpush3.bf16.msra.mxu1 %v5247_v63 }
 0xae7   :  { %2571 = vmatprep.subr.bf16.mxu0 %v5250_v31  ;;  %3787 = vmatprep.subr.bf16.mxu1 %v6013_v37 }
 0xaea   :  { %2572 = vmatpush1.bf16.msra.mxu0 %v5254_v9  ;;  %3788 = vmatpush3.bf16.msra.mxu1 %v5257_v46 }
 0xaeb   :  { %2573 = vmatprep.subr.bf16.mxu0 %v6046_v38  ;;  %3789 = vmatprep.subr.bf16.mxu1 %v6013_v37 }
 0xaee   :  { %2574 = vmatpush1.bf16.msra.mxu0 %v6047_v52  ;;  %3790 = vmatpush3.bf16.msra.mxu1 %v6048_v33 }
 0xaef   :  { %2575 = vmatprep.subr.bf16.mxu0 %v6049_v24  ;;  %3791 = vmatprep.subr.bf16.mxu1 %v6013_v37 }
 0xaf2   :  { %2576 = vmatpush1.bf16.msra.mxu0 %v6050_v19  ;;  %3792 = vmatpush3.bf16.msra.mxu1 %v6051_v28 }
 0xaf3   :  { %2697 = vmatprep.subr.bf16.mxu0 %v6052_v10  ;;  %3797 = vmatprep.subr.bf16.mxu1 %v6013_v37 }
 0xba8   :  { %v2435_v53 = vpop.f32.mrb[48].mxu0  ;;  %v2476_v48 = vpop.f32.mrb[48].mxu1 }
 0xba9   :  { %v2482_v44 = vadd.f32 %v2435_v53, %v6056_v55  ;;  %v2437_v54 = vpop.f32.mrb[49].mxu0  ;;  %v3775_v42 = vpop.f32.mrb[49].mxu1  ;;  %v2496_v40 = vadd.f32 %v5553_v30, %v2476_v48  ;;  %v6057_v53 = vld [vmem:[#allocation22_spill] sm:$0xff] }
 0xbaa   :  { %v2489_v13 = vadd.f32 %v2437_v54, %v5465_v59  ;;  %v2439_v26 = vpop.f32.mrb[50].mxu0  ;;  %v2479_v2 = vpop.f32.mrb[50].mxu1 }
 0xbab   :  { %v3361_v17 = vmul.f32 -1.442695, %v2482_v44  ;;  %v2440_v5 = vpop.f32.mrb[51].mxu0  ;;  %v3776_v12 = vpop.f32.mrb[51].mxu1 }
 0xbac   :  { %v3362_v11 = vmul.f32 -1.442695, %v2489_v13 }
 0xbad   :  { %4094 = vpow2.f32 %v3361_v17 }
 0xbae   :  { %4096 = vpow2.f32 %v3362_v11 }
 0xbb7   :  { %v4095_v23 = vpop.eup %4094 }
 0xbb8   :  { %v2486_v22 = vadd.f32 1.0, %v4095_v23  ;;  %v4097_v3 = vpop.eup %4096  ;;  %v6058_v23 = vld [vmem:[#allocation23_spill] sm:$0xff] }
 0xbb9   :  { %v2493_v39 = vadd.f32 1.0, %v4097_v3 }
 0xbba   :  { %4098 = vrcp.f32 %v2486_v22 }
 0xbbb   :  { %4100 = vrcp.f32 %v2493_v39 }
 0xbc4   :  { %v4099_v43 = vpop.eup %4098 }
 0xbc5   :  { %v2497_v60 = vmul.f32 %v4099_v43, %v2496_v40  ;;  %v4101_v55 = vpop.eup %4100 }
 0xbc6   :  { %v2500_v44 = vsub.f32 1.0, %v4101_v55  ;;  %v2502_v13 = vmul.f32 %v4101_v55, %v5610_v29 }
 0xbc7   :  { %v2498_v59 = vadd.f32 %v2497_v60, %v6057_v53 }
 0xbc9   :  { %4102 = vtanh.f32 %v2498_v59 }
 0xbd3   :  { %v4103_v54 = vpop.eup %4102 }
 0xbd4   :  { %v2501_v42 = vmul.f32 %v4103_v54, %v2500_v44 }
 0xbd6   :  { %v5662_v26 = vadd.f32 %v2502_v13, %v2501_v42 }
 0xbd8   :  { %v2511_v2 = vrot.slane %v5662_v26, %v4802_v1  ;;  %v2560_v48 = vpack.c.bf16 %v5662_v26, %v5662_v26 }
 0xbda   :  { %v2512_v17 = vcombine.high %v2511_v2, %v2511_v2  ;;  %v2519_v5 = vrot.slane %v2511_v2, %v4802_v1  ;;  %2594 = vmatmul.mubr.bf16.vlgmr.msra.gmra.mrb[52].mxu0 %v2560_v48  ;;  %3794 = vmatmul.mubr.bf16.vlgmr.msra.gmra.mrb[52].mxu1 %v2560_v48 }
 0xbdb   :  { %2698 = vmatpush1.bf16.msra.mxu0 %v5204_v35  ;;  %3798 = vmatpush3.bf16.msra.mxu1 %v5206_v6 }
 0xbdc   :  { %v2526_v12 = vrot.slane %v2512_v17, %v4802_v1  ;;  %2529 = vst.msk [vmem:[#allocation11 + $0x2] sm:$0x1] %vm590_vm6, %v2519_v5  ;;  %2699 = vmatprep.subr.bf16.mxu0 %v5208_v45  ;;  %3799 = vmatprep.subr.bf16.mxu1 %v6013_v37 }
 0xbdd   :  { %2531 = vst.msk [vmem:[#allocation11 + $0x5] sm:$0x1] %vm593_vm7, %v2519_v5  ;;  %2729 = vmatprep.mubr.bf16.mxu0 %v6014_v4  ;;  %3813 = vmatprep.mubr.msk.bf16.mxu1 %vm4331_vm0, %v6013_v37 }
 0xbde   :  { %2530 = vst.msk [vmem:[#allocation11 + $0xa] sm:$0x1] %vm590_vm6, %v2526_v12 }
 0xbdf   :  { %2532 = vst.msk [vmem:[#allocation11 + $0xd] sm:$0x1] %vm593_vm7, %v2526_v12  ;;  %2700 = vmatpush1.bf16.msra.mxu0 %v5211_v47  ;;  %3800 = vmatpush3.bf16.msra.mxu1 %v5214_v58 }
 0xbe0   :  { %2701 = vmatprep.subr.bf16.mxu0 %v5217_v51  ;;  %3801 = vmatprep.subr.bf16.mxu1 %v6013_v37 }
 0xbe3   :  { %2702 = vmatpush1.bf16.msra.mxu0 %v5224_v56  ;;  %3802 = vmatpush3.bf16.msra.mxu1 %v5227_v49 }
 0xbe4   :  { %2703 = vmatprep.subr.bf16.mxu0 %v5230_v7  ;;  %3803 = vmatprep.subr.bf16.mxu1 %v6013_v37 }
 0xbe7   :  { %2704 = vmatpush1.bf16.msra.mxu0 %v5234_v8  ;;  %3804 = vmatpush3.bf16.msra.mxu1 %v5237_v41 }
 0xbe8   :  { %2705 = vmatprep.subr.bf16.mxu0 %v5240_v15  ;;  %3805 = vmatprep.subr.bf16.mxu1 %v6013_v37 }
 0xbeb   :  { %2706 = vmatpush1.bf16.msra.mxu0 %v5244_v62  ;;  %3806 = vmatpush3.bf16.msra.mxu1 %v5247_v63 }
 0xbec   :  { %2707 = vmatprep.subr.bf16.mxu0 %v5250_v31  ;;  %3807 = vmatprep.subr.bf16.mxu1 %v6013_v37 }
 0xbef   :  { %2708 = vmatpush1.bf16.msra.mxu0 %v5254_v9  ;;  %3808 = vmatpush3.bf16.msra.mxu1 %v5257_v46 }
 0xbf0   :  { %2709 = vmatprep.subr.bf16.mxu0 %v6046_v38  ;;  %3809 = vmatprep.subr.bf16.mxu1 %v6013_v37 }
 0xbf3   :  { %2710 = vmatpush1.bf16.msra.mxu0 %v6047_v52  ;;  %3810 = vmatpush3.bf16.msra.mxu1 %v6048_v33 }
 0xbf4   :  { %2711 = vmatprep.subr.bf16.mxu0 %v6049_v24  ;;  %3811 = vmatprep.subr.bf16.mxu1 %v6013_v37 }
 0xbf7   :  { %2712 = vmatpush1.bf16.msra.mxu0 %v6050_v19  ;;  %3812 = vmatpush3.bf16.msra.mxu1 %v6051_v28 }
 0xbf8   :  { %2833 = vmatprep.subr.bf16.mxu0 %v6052_v10  ;;  %3817 = vmatprep.subr.bf16.mxu1 %v6013_v37 }
 0xcad   :  { %v2595_v29 = vpop.f32.mrb[52].mxu0  ;;  %v2636_v11 = vpop.f32.mrb[52].mxu1 }
 0xcae   :  { %v2642_v22 = vadd.f32 %v2595_v29, %v6058_v23  ;;  %v2597_v3 = vpop.f32.mrb[53].mxu0  ;;  %v3795_v39 = vpop.f32.mrb[53].mxu1  ;;  %v2656_v2 = vadd.f32 %v5553_v30, %v2636_v11 }
 0xcaf   :  { %v2649_v40 = vadd.f32 %v2597_v3, %v5506_v34  ;;  %v2599_v43 = vpop.f32.mrb[54].mxu0  ;;  %v2639_v60 = vpop.f32.mrb[54].mxu1 }
 0xcb0   :  { %v3363_v53 = vmul.f32 -1.442695, %v2642_v22  ;;  %v2600_v59 = vpop.f32.mrb[55].mxu0  ;;  %v3796_v55 = vpop.f32.mrb[55].mxu1 }
 0xcb1   :  { %v3364_v44 = vmul.f32 -1.442695, %v2649_v40 }
 0xcb2   :  { %4104 = vpow2.f32 %v3363_v53 }
 0xcb3   :  { %4106 = vpow2.f32 %v3364_v44 }
 0xcbc   :  { %v4105_v54 = vpop.eup %4104 }
 0xcbd   :  { %v2646_v10 = vadd.f32 1.0, %v4105_v54  ;;  %v4107_v42 = vpop.eup %4106  ;;  %v5778_v54 = vld [vmem:[#allocation9 + $0xc8] ss:$12 sps:$4 sm:$0xff]  }
 0xcbe   :  { %v2653_v13 = vadd.f32 1.0, %v4107_v42  ;;  %v5784_v42 = vld [vmem:[#allocation9 + $0xdc] ss:$12 sps:$4 sm:$0xff]  }
 0xcbf   :  { %4108 = vrcp.f32 %v2646_v10 }
 0xcc0   :  { %4110 = vrcp.f32 %v2653_v13  ;;  %v5793_v13 = vld [vmem:[#allocation9 + $0xd8] ss:$12 sps:$4 sm:$0xff]  }
 0xcc9   :  { %v4109_v48 = vpop.eup %4108 }
 0xcca   :  { %v2657_v17 = vmul.f32 %v4109_v48, %v2656_v2  ;;  %v4111_v5 = vpop.eup %4110  ;;  %v5796_v2 = vld [vmem:[#allocation9 + $0xe0] ss:$12 sps:$4 sm:$0xff]  }
 0xccb   :  { %v2660_v12 = vsub.f32 1.0, %v4111_v5  ;;  %v2662_v22 = vmul.f32 %v4111_v5, %v5662_v26  ;;  %v5799_v48 = vld [vmem:[#allocation9 + $0xf4] ss:$12 sps:$4 sm:$0xff]   ;;  %v5809_v5 = vld [vmem:[#allocation9 + $0x10c] ss:$12 sps:$4 sm:$0xff]  }
 0xccc   :  { %v2658_v34 = vadd.f32 %v2657_v17, %v5493_v27  ;;  %v5803_v17 = vld [vmem:[#allocation9 + $0xf0] ss:$12 sps:$4 sm:$0xff]  }
 0xcce   :  { %4112 = vtanh.f32 %v2658_v34  ;;  %v5806_v34 = vld [vmem:[#allocation9 + $0xf8] ss:$12 sps:$4 sm:$0xff]  }
 0xcd8   :  { %v4113_v29 = vpop.eup %4112 }
 0xcd9   :  { %v2661_v23 = vmul.f32 %v4113_v29, %v2660_v12  ;;  %v5813_v12 = vld [vmem:[#allocation9 + $0x108] ss:$12 sps:$4 sm:$0xff]   ;;  %v5816_v29 = vld [vmem:[#allocation9 + $0x110] ss:$12 sps:$4 sm:$0xff]  }
 0xcdb   :  { %v5714_v3 = vadd.f32 %v2662_v22, %v2661_v23  ;;  %v5819_v23 = vld [vmem:[#allocation9 + $0x124] ss:$12 sps:$4 sm:$0xff]   ;;  %v5823_v22 = vld [vmem:[#allocation9 + $0x120] ss:$12 sps:$4 sm:$0xff]  }
 0xcdd   :  { %v2671_v39 = vrot.slane %v5714_v3, %v4802_v1  ;;  %v2696_v11 = vpack.c.bf16 %v5714_v3, %v5714_v3 }
 0xcdf   :  { %v2672_v40 = vcombine.high %v2671_v39, %v2671_v39  ;;  %v2679_v43 = vrot.slane %v2671_v39, %v4802_v1  ;;  %2730 = vmatmul.mubr.bf16.vlgmr.msra.gmra.mrb[56].mxu0 %v2696_v11  ;;  %3814 = vmatmul.mubr.bf16.vlgmr.msra.gmra.mrb[56].mxu1 %v2696_v11  ;;  %v5829_v39 = vld [vmem:[#allocation9 + $0x13c] ss:$12 sps:$4 sm:$0xff]   ;;  %v5833_v11 = vld [vmem:[#allocation9 + $0x138] ss:$12 sps:$4 sm:$0xff]  }
 0xce0   :  { %2834 = vmatpush1.bf16.msra.mxu0 %v5204_v35  ;;  %3818 = vmatpush3.bf16.msra.mxu1 %v5206_v6  ;;  %v5759_v35 = vld [vmem:[#allocation9 + $0xc4] ss:$12 sps:$4 sm:$0xff]  }
 0xce1   :  { %v2686_v27 = vrot.slane %v2672_v40, %v4802_v1  ;;  %2689 = vst.msk [vmem:[#allocation11 + $0x3] sm:$0x1] %vm590_vm6, %v2679_v43  ;;  %2835 = vmatprep.subr.bf16.mxu0 %v5208_v45  ;;  %3819 = vmatprep.subr.bf16.mxu1 %v6013_v37  ;;  %v5836_v40 = vld [vmem:[#allocation9 + $0x140] ss:$12 sps:$4 sm:$0xff]  }
 0xce2   :  { %2691 = vst.msk [vmem:[#allocation11 + $0x4] sm:$0x1] %vm593_vm7, %v2679_v43  ;;  %2865 = vmatprep.mubr.bf16.mxu0 %v6014_v4  ;;  %3833 = vmatprep.mubr.msk.bf16.mxu1 %vm4331_vm0, %v6013_v37  ;;  %v5839_v43 = vld [vmem:[#allocation9 + $0x154] ss:$12 sps:$4 sm:$0xff]  }
 0xce3   :  { %2690 = vst.msk [vmem:[#allocation11 + $0xb] sm:$0x1] %vm590_vm6, %v2686_v27 }
 0xce4   :  { %2692 = vst.msk [vmem:[#allocation11 + $0xc] sm:$0x1] %vm593_vm7, %v2686_v27  ;;  %2836 = vmatpush1.bf16.msra.mxu0 %v5211_v47  ;;  %3820 = vmatpush3.bf16.msra.mxu1 %v5214_v58  ;;  %v5843_v27 = vld [vmem:[#allocation9 + $0x150] ss:$12 sps:$4 sm:$0xff]  }
 0xce5   :  { %2837 = vmatprep.subr.bf16.mxu0 %v5217_v51  ;;  %3821 = vmatprep.subr.bf16.mxu1 %v6013_v37 }
 0xce8   :  { %2838 = vmatpush1.bf16.msra.mxu0 %v5224_v56  ;;  %3822 = vmatpush3.bf16.msra.mxu1 %v5227_v49 }
 0xce9   :  { %2839 = vmatprep.subr.bf16.mxu0 %v5230_v7  ;;  %3823 = vmatprep.subr.bf16.mxu1 %v6013_v37 }
 0xcec   :  { %2840 = vmatpush1.bf16.msra.mxu0 %v5234_v8  ;;  %3824 = vmatpush3.bf16.msra.mxu1 %v5237_v41 }
 0xced   :  { %2841 = vmatprep.subr.bf16.mxu0 %v5240_v15  ;;  %3825 = vmatprep.subr.bf16.mxu1 %v6013_v37 }
 0xcf0   :  { %2842 = vmatpush1.bf16.msra.mxu0 %v5244_v62  ;;  %3826 = vmatpush3.bf16.msra.mxu1 %v5247_v63 }
 0xcf1   :  { %2843 = vmatprep.subr.bf16.mxu0 %v5250_v31  ;;  %3827 = vmatprep.subr.bf16.mxu1 %v6013_v37 }
 0xcf4   :  { %2844 = vmatpush1.bf16.msra.mxu0 %v5254_v9  ;;  %3828 = vmatpush3.bf16.msra.mxu1 %v5257_v46 }
 0xcf5   :  { %2845 = vmatprep.subr.bf16.mxu0 %v6046_v38  ;;  %3829 = vmatprep.subr.bf16.mxu1 %v6013_v37 }
 0xcf8   :  { %2846 = vmatpush1.bf16.msra.mxu0 %v6047_v52  ;;  %3830 = vmatpush3.bf16.msra.mxu1 %v6048_v33 }
 0xcf9   :  { %2847 = vmatprep.subr.bf16.mxu0 %v6049_v24  ;;  %3831 = vmatprep.subr.bf16.mxu1 %v6013_v37 }
 0xcfc   :  { %2848 = vmatpush1.bf16.msra.mxu0 %v6050_v19  ;;  %3832 = vmatpush3.bf16.msra.mxu1 %v6051_v28 }
 0xcfd   :  { %2969 = vmatprep.subr.bf16.mxu0 %v5759_v35  ;;  %3837 = vmatprep.subr.bf16.mxu1 %v6013_v37 }
 0xdb2   :  { %v2731_v6 = vpop.f32.mrb[56].mxu0  ;;  %v2772_v45 = vpop.f32.mrb[56].mxu1 }
 0xdb3   :  { %v2778_v47 = vadd.f32 %v2731_v6, %v5485_v18  ;;  %v2733_v58 = vpop.f32.mrb[57].mxu0  ;;  %v3815_v51 = vpop.f32.mrb[57].mxu1  ;;  %v2792_v38 = vadd.f32 %v5553_v30, %v2772_v45  ;;  %v5846_v6 = vld [vmem:[#allocation9 + $0x158] ss:$12 sps:$4 sm:$0xff]  }
 0xdb4   :  { %v2785_v56 = vadd.f32 %v2733_v58, %v5510_v14  ;;  %v2735_v49 = vpop.f32.mrb[58].mxu0  ;;  %v2775_v7 = vpop.f32.mrb[58].mxu1  ;;  %v5849_v45 = vld [vmem:[#allocation9 + $0x16c] ss:$12 sps:$4 sm:$0xff]   ;;  %v5856_v58 = vld [vmem:[#allocation9 + $0x170] ss:$12 sps:$4 sm:$0xff]  }
 0xdb5   :  { %v3365_v8 = vmul.f32 -1.442695, %v2778_v47  ;;  %v2736_v41 = vpop.f32.mrb[59].mxu0  ;;  %v3816_v15 = vpop.f32.mrb[59].mxu1  ;;  %v5853_v47 = vld [vmem:[#allocation9 + $0x168] ss:$12 sps:$4 sm:$0xff]  }
 0xdb6   :  { %v3366_v62 = vmul.f32 -1.442695, %v2785_v56 }
 0xdb7   :  { %4114 = vpow2.f32 %v3365_v8 }
 0xdb8   :  { %4116 = vpow2.f32 %v3366_v62 }
 0xdc1   :  { %v4115_v63 = vpop.eup %4114 }
 0xdc2   :  { %v2782_v31 = vadd.f32 1.0, %v4115_v63  ;;  %v4117_v9 = vpop.eup %4116 }
 0xdc3   :  { %v2789_v46 = vadd.f32 1.0, %v4117_v9 }
 0xdc4   :  { %4118 = vrcp.f32 %v2782_v31 }
 0xdc5   :  { %4120 = vrcp.f32 %v2789_v46 }
 0xdce   :  { %v4119_v18 = vpop.eup %4118 }
 0xdcf   :  { %v2793_v52 = vmul.f32 %v4119_v18, %v2792_v38  ;;  %v4121_v33 = vpop.eup %4120 }
 0xdd0   :  { %v2796_v24 = vsub.f32 1.0, %v4121_v33  ;;  %v2798_v26 = vmul.f32 %v4121_v33, %v5714_v3  ;;  %v5826_v3 = vld [vmem:[#allocation9 + $0x128] ss:$12 sps:$4 sm:$0xff]  }
 0xdd1   :  { %v2794_v14 = vadd.f32 %v2793_v52, %v5498_v32  ;;  %v5775_v32 = vld [vmem:[#allocation9 + $0xc0] ss:$12 sps:$4 sm:$0xff]  }
 0xdd3   :  { %4122 = vtanh.f32 %v2794_v14 }
 0xddd   :  { %v4123_v19 = vpop.eup %4122 }
 0xdde   :  { %v2797_v28 = vmul.f32 %v4123_v19, %v2796_v24 }
 0xde0   :  { %v5768_v60 = vadd.f32 %v2798_v26, %v2797_v28 }
 0xde2   :  { %v2807_v53 = vrot.slane %v5768_v60, %v4802_v1  ;;  %v2832_v59 = vpack.c.bf16 %v5768_v60, %v5768_v60 }
 0xde4   :  { %v2808_v55 = vcombine.high %v2807_v53, %v2807_v53  ;;  %v2815_v44 = vrot.slane %v2807_v53, %v4802_v1  ;;  %2866 = vmatmul.mubr.bf16.vlgmr.msra.gmra.mrb[60].mxu0 %v2832_v59  ;;  %3834 = vmatmul.mubr.bf16.vlgmr.msra.gmra.mrb[60].mxu1 %v2832_v59 }
 0xde5   :  { %2970 = vmatpush1.bf16.msra.mxu0 %v5775_v32  ;;  %3838 = vmatpush3.bf16.msra.mxu1 %v5778_v54 }
 0xde6   :  { %v2822_v10 = vrot.slane %v2808_v55, %v4802_v1  ;;  %2825 = vst.msk [vmem:[#allocation11 + $0x4] sm:$0x1] %vm590_vm6, %v2815_v44  ;;  %2971 = vmatprep.subr.bf16.mxu0 %v5784_v42  ;;  %3839 = vmatprep.subr.bf16.mxu1 %v6013_v37 }
 0xde7   :  { %2827 = vst.msk [vmem:[#allocation11 + $0x3] sm:$0x1] %vm593_vm7, %v2815_v44  ;;  %3001 = vmatprep.mubr.bf16.mxu0 %v6014_v4  ;;  %3853 = vmatprep.mubr.msk.bf16.mxu1 %vm4331_vm0, %v6013_v37 }
 0xde8   :  { %2826 = vst.msk [vmem:[#allocation11 + $0xc] sm:$0x1] %vm590_vm6, %v2822_v10 }
 0xde9   :  { %2828 = vst.msk [vmem:[#allocation11 + $0xb] sm:$0x1] %vm593_vm7, %v2822_v10  ;;  %2972 = vmatpush1.bf16.msra.mxu0 %v5793_v13  ;;  %3840 = vmatpush3.bf16.msra.mxu1 %v5796_v2 }
 0xdea   :  { %2973 = vmatprep.subr.bf16.mxu0 %v5799_v48  ;;  %3841 = vmatprep.subr.bf16.mxu1 %v6013_v37 }
 0xded   :  { %2974 = vmatpush1.bf16.msra.mxu0 %v5803_v17  ;;  %3842 = vmatpush3.bf16.msra.mxu1 %v5806_v34 }
 0xdee   :  { %2975 = vmatprep.subr.bf16.mxu0 %v5809_v5  ;;  %3843 = vmatprep.subr.bf16.mxu1 %v6013_v37 }
 0xdf1   :  { %2976 = vmatpush1.bf16.msra.mxu0 %v5813_v12  ;;  %3844 = vmatpush3.bf16.msra.mxu1 %v5816_v29 }
 0xdf2   :  { %2977 = vmatprep.subr.bf16.mxu0 %v5819_v23  ;;  %3845 = vmatprep.subr.bf16.mxu1 %v6013_v37 }
 0xdf5   :  { %2978 = vmatpush1.bf16.msra.mxu0 %v5823_v22  ;;  %3846 = vmatpush3.bf16.msra.mxu1 %v5826_v3 }
 0xdf6   :  { %2979 = vmatprep.subr.bf16.mxu0 %v5829_v39  ;;  %3847 = vmatprep.subr.bf16.mxu1 %v6013_v37 }
 0xdf9   :  { %2980 = vmatpush1.bf16.msra.mxu0 %v5833_v11  ;;  %3848 = vmatpush3.bf16.msra.mxu1 %v5836_v40 }
 0xdfa   :  { %2981 = vmatprep.subr.bf16.mxu0 %v5839_v43  ;;  %3849 = vmatprep.subr.bf16.mxu1 %v6013_v37 }
 0xdfd   :  { %2982 = vmatpush1.bf16.msra.mxu0 %v5843_v27  ;;  %3850 = vmatpush3.bf16.msra.mxu1 %v5846_v6 }
 0xdfe   :  { %2983 = vmatprep.subr.bf16.mxu0 %v5849_v45  ;;  %3851 = vmatprep.subr.bf16.mxu1 %v6013_v37 }
 0xe01   :  { %2984 = vmatpush1.bf16.msra.mxu0 %v5853_v47  ;;  %3852 = vmatpush3.bf16.msra.mxu1 %v5856_v58 }
 0xe02   :  { %3105 = vmatprep.subr.bf16.mxu0 %v5759_v35  ;;  %3857 = vmatprep.subr.bf16.mxu1 %v6013_v37 }
 0xeb7   :  { %v2867_v51 = vpop.f32.mrb[60].mxu0  ;;  %v2908_v56 = vpop.f32.mrb[60].mxu1 }
 0xeb8   :  { %v2914_v49 = vadd.f32 %v2867_v51, %v5489_v20  ;;  %v2869_v7 = vpop.f32.mrb[61].mxu0  ;;  %v3835_v8 = vpop.f32.mrb[61].mxu1  ;;  %v2928_v14 = vadd.f32 %v5553_v30, %v2908_v56 }
 0xeb9   :  { %v2921_v41 = vadd.f32 %v2869_v7, %v5514_v61  ;;  %v2871_v15 = vpop.f32.mrb[62].mxu0  ;;  %v2911_v62 = vpop.f32.mrb[62].mxu1 }
 0xeba   :  { %v3367_v63 = vmul.f32 -1.442695, %v2914_v49  ;;  %v2872_v31 = vpop.f32.mrb[63].mxu0  ;;  %v3836_v9 = vpop.f32.mrb[63].mxu1 }
 0xebb   :  { %v3368_v46 = vmul.f32 -1.442695, %v2921_v41 }
 0xebc   :  { %4124 = vpow2.f32 %v3367_v63 }
 0xebd   :  { %4126 = vpow2.f32 %v3368_v46 }
 0xec6   :  { %v4125_v38 = vpop.eup %4124 }
 0xec7   :  { %v2918_v35 = vadd.f32 1.0, %v4125_v38  ;;  %v4127_v18 = vpop.eup %4126 }
 0xec8   :  { %v2925_v52 = vadd.f32 1.0, %v4127_v18 }
 0xec9   :  { %4128 = vrcp.f32 %v2918_v35 }
 0xeca   :  { %4130 = vrcp.f32 %v2925_v52 }
 0xed3   :  { %v4129_v20 = vpop.eup %4128 }
 0xed4   :  { %v2929_v33 = vmul.f32 %v4129_v20, %v2928_v14  ;;  %v4131_v24 = vpop.eup %4130 }
 0xed5   :  { %v2932_v19 = vsub.f32 1.0, %v4131_v24  ;;  %v2934_v53 = vmul.f32 %v4131_v24, %v5768_v60 }
 0xed6   :  { %v2930_v61 = vadd.f32 %v2929_v33, %v5502_v21 }
 0xed8   :  { %4132 = vtanh.f32 %v2930_v61 }
 0xee2   :  { %v4133_v28 = vpop.eup %4132 }
 0xee3   :  { %v2933_v26 = vmul.f32 %v4133_v28, %v2932_v19 }
 0xee5   :  { %v5866_v59 = vadd.f32 %v2934_v53, %v2933_v26 }
 0xee7   :  { %v2943_v55 = vrot.slane %v5866_v59, %v4802_v1  ;;  %v2968_v44 = vpack.c.bf16 %v5866_v59, %v5866_v59 }
 0xee9   :  { %v2944_v10 = vcombine.high %v2943_v55, %v2943_v55  ;;  %v2951_v51 = vrot.slane %v2943_v55, %v4802_v1  ;;  %3002 = vmatmul.mubr.bf16.vlgmr.msra.gmra.mrb[64].mxu0 %v2968_v44  ;;  %3854 = vmatmul.mubr.bf16.vlgmr.msra.gmra.mrb[64].mxu1 %v2968_v44 }
 0xeea   :  { %3106 = vmatpush1.bf16.msra.mxu0 %v5775_v32  ;;  %3858 = vmatpush3.bf16.msra.mxu1 %v5778_v54 }
 0xeeb   :  { %v2958_v21 = vrot.slane %v2944_v10, %v4802_v1  ;;  %2961 = vst.msk [vmem:[#allocation11 + $0x5] sm:$0x1] %vm590_vm6, %v2951_v51  ;;  %3107 = vmatprep.subr.bf16.mxu0 %v5784_v42  ;;  %3859 = vmatprep.subr.bf16.mxu1 %v6013_v37 }
 0xeec   :  { %2963 = vst.msk [vmem:[#allocation11 + $0x2] sm:$0x1] %vm593_vm7, %v2951_v51  ;;  %3137 = vmatprep.mubr.bf16.mxu0 %v6014_v4  ;;  %3873 = vmatprep.mubr.msk.bf16.mxu1 %vm4331_vm0, %v6013_v37 }
 0xeed   :  { %2962 = vst.msk [vmem:[#allocation11 + $0xd] sm:$0x1] %vm590_vm6, %v2958_v21 }
 0xeee   :  { %2964 = vst.msk [vmem:[#allocation11 + $0xa] sm:$0x1] %vm593_vm7, %v2958_v21  ;;  %3108 = vmatpush1.bf16.msra.mxu0 %v5793_v13  ;;  %3860 = vmatpush3.bf16.msra.mxu1 %v5796_v2 }
 0xeef   :  { %3109 = vmatprep.subr.bf16.mxu0 %v5799_v48  ;;  %3861 = vmatprep.subr.bf16.mxu1 %v6013_v37 }
 0xef2   :  { %3110 = vmatpush1.bf16.msra.mxu0 %v5803_v17  ;;  %3862 = vmatpush3.bf16.msra.mxu1 %v5806_v34 }
 0xef3   :  { %3111 = vmatprep.subr.bf16.mxu0 %v5809_v5  ;;  %3863 = vmatprep.subr.bf16.mxu1 %v6013_v37 }
 0xef6   :  { %3112 = vmatpush1.bf16.msra.mxu0 %v5813_v12  ;;  %3864 = vmatpush3.bf16.msra.mxu1 %v5816_v29 }
 0xef7   :  { %3113 = vmatprep.subr.bf16.mxu0 %v5819_v23  ;;  %3865 = vmatprep.subr.bf16.mxu1 %v6013_v37 }
 0xefa   :  { %3114 = vmatpush1.bf16.msra.mxu0 %v5823_v22  ;;  %3866 = vmatpush3.bf16.msra.mxu1 %v5826_v3 }
 0xefb   :  { %3115 = vmatprep.subr.bf16.mxu0 %v5829_v39  ;;  %3867 = vmatprep.subr.bf16.mxu1 %v6013_v37 }
 0xefe   :  { %3116 = vmatpush1.bf16.msra.mxu0 %v5833_v11  ;;  %3868 = vmatpush3.bf16.msra.mxu1 %v5836_v40 }
 0xeff   :  { %3117 = vmatprep.subr.bf16.mxu0 %v5839_v43  ;;  %3869 = vmatprep.subr.bf16.mxu1 %v6013_v37 }
 0xf02   :  { %3118 = vmatpush1.bf16.msra.mxu0 %v5843_v27  ;;  %3870 = vmatpush3.bf16.msra.mxu1 %v5846_v6 }
 0xf03   :  { %3119 = vmatprep.subr.bf16.mxu0 %v5849_v45  ;;  %3871 = vmatprep.subr.bf16.mxu1 %v6013_v37 }
 0xf06   :  { %3120 = vmatpush1.bf16.msra.mxu0 %v5853_v47  ;;  %3872 = vmatpush3.bf16.msra.mxu1 %v5856_v58 }
 0xfbc   :  { %v3003_v4 = vpop.f32.mrb[64].mxu0  ;;  %v3044_v60 = vpop.f32.mrb[64].mxu1 }
 0xfbd   :  { %v3050_v32 = vadd.f32 %v3003_v4, %v5520_v57  ;;  %v3005_v54 = vpop.f32.mrb[65].mxu0  ;;  %v3855_v42 = vpop.f32.mrb[65].mxu1  ;;  %v3064_v3 = vadd.f32 %v5553_v30, %v3044_v60 }
 0xfbe   :  { %v3057_v13 = vadd.f32 %v3005_v54, %v5528_v0  ;;  %v3007_v2 = vpop.f32.mrb[66].mxu0  ;;  %v3047_v48 = vpop.f32.mrb[66].mxu1 }
 0xfbf   :  { %v3369_v17 = vmul.f32 -1.442695, %v3050_v32  ;;  %v3008_v34 = vpop.f32.mrb[67].mxu0  ;;  %v3856_v5 = vpop.f32.mrb[67].mxu1 }
 0xfc0   :  { %v3370_v12 = vmul.f32 -1.442695, %v3057_v13 }
 0xfc1   :  { %4134 = vpow2.f32 %v3369_v17 }
 0xfc2   :  { %4136 = vpow2.f32 %v3370_v12 }
 0xfcb   :  { %v4135_v37 = vpop.eup %4134 }
 0xfcc   :  { %v3054_v29 = vadd.f32 1.0, %v4135_v37  ;;  %v4137_v23 = vpop.eup %4136 }
 0xfcd   :  { %v3061_v22 = vadd.f32 1.0, %v4137_v23 }
 0xfce   :  { %4138 = vrcp.f32 %v3054_v29 }
 0xfcf   :  { %4140 = vrcp.f32 %v3061_v22 }
 0xfd8   :  { %v4139_v57 = vpop.eup %4138 }
 0xfd9   :  { %v3065_v39 = vmul.f32 %v4139_v57, %v3064_v3  ;;  %v4141_v11 = vpop.eup %4140 }
 0xfda   :  { %v3068_v40 = vsub.f32 1.0, %v4141_v11  ;;  %v3070_v6 = vmul.f32 %v4141_v11, %v5866_v59 }
 0xfdb   :  { %v3066_v0 = vadd.f32 %v3065_v39, %v5524_v16 }
 0xfdd   :  { %4142 = vtanh.f32 %v3066_v0 }
 0xfe7   :  { %v4143_v43 = vpop.eup %4142 }
 0xfe8   :  { %v3069_v27 = vmul.f32 %v4143_v43, %v3068_v40 }
 0xfea   :  { %v3071_v45 = vadd.f32 %v3070_v6, %v3069_v27 }
 0xfec   :  { %v3079_v47 = vrot.slane %v3071_v45, %v4802_v1  ;;  %v3104_v58 = vpack.c.bf16 %v3071_v45, %v3071_v45 }
 0xfee   :  { %v3080_v56 = vcombine.high %v3079_v47, %v3079_v47  ;;  %v3087_v49 = vrot.slane %v3079_v47, %v4802_v1  ;;  %3138 = vmatmul.mubr.bf16.vlgmr.msra.gmra.mrb[68].mxu0 %v3104_v58  ;;  %3874 = vmatmul.mubr.bf16.vlgmr.msra.gmra.mrb[68].mxu1 %v3104_v58 }
 0xff0   :  { %v3094_v7 = vrot.slane %v3080_v56, %v4802_v1  ;;  %3097 = vst.msk [vmem:[#allocation11 + $0x6] sm:$0x1] %vm590_vm6, %v3087_v49 }
 0xff1   :  { %3099 = vst.msk [vmem:[#allocation11 + $0x1] sm:$0x1] %vm593_vm7, %v3087_v49 }
 0xff2   :  { %3098 = vst.msk [vmem:[#allocation11 + $0xe] sm:$0x1] %vm590_vm6, %v3094_v7 }
 0xff3   :  { %3100 = vst.msk [vmem:[#allocation11 + $0x9] sm:$0x1] %vm593_vm7, %v3094_v7 }
0x10c1   :  { %v3139_v16 = vpop.f32.mrb[68].mxu0  ;;  %v3180_v8 = vpop.f32.mrb[68].mxu1 }
0x10c2   :  { %v3186_v41 = vadd.f32 %v3139_v16, %v5534_v50  ;;  %v3141_v15 = vpop.f32.mrb[69].mxu0  ;;  %v3875_v62 = vpop.f32.mrb[69].mxu1  ;;  %v3200_v61 = vadd.f32 %v5553_v30, %v3180_v8 }
0x10c3   :  { %v3193_v63 = vadd.f32 %v3141_v15, %v5546_v36  ;;  %v3143_v31 = vpop.f32.mrb[70].mxu0  ;;  %v3183_v9 = vpop.f32.mrb[70].mxu1 }
0x10c4   :  { %v3371_v46 = vmul.f32 -1.442695, %v3186_v41  ;;  %v3144_v38 = vpop.f32.mrb[71].mxu0  ;;  %v3876_v35 = vpop.f32.mrb[71].mxu1 }
0x10c5   :  { %v3372_v18 = vmul.f32 -1.442695, %v3193_v63 }
0x10c6   :  { %4144 = vpow2.f32 %v3371_v46 }
0x10c7   :  { %4146 = vpow2.f32 %v3372_v18 }
0x10d0   :  { %v4145_v52 = vpop.eup %4144 }
0x10d1   :  { %v3190_v14 = vadd.f32 1.0, %v4145_v52  ;;  %v4147_v20 = vpop.eup %4146 }
0x10d2   :  { %v3197_v33 = vadd.f32 1.0, %v4147_v20 }
0x10d3   :  { %4148 = vrcp.f32 %v3190_v14 }
0x10d4   :  { %4150 = vrcp.f32 %v3197_v33 }
0x10dd   :  { %v4149_v50 = vpop.eup %4148 }
0x10de   :  { %v3201_v24 = vmul.f32 %v4149_v50, %v3200_v61  ;;  %v4151_v19 = vpop.eup %4150 }
0x10df   :  { %v3204_v28 = vsub.f32 1.0, %v4151_v19  ;;  %v3206_v59 = vmul.f32 %v4151_v19, %v3071_v45 }
0x10e0   :  { %v3202_v36 = vadd.f32 %v3201_v24, %v5540_v25 }
0x10e2   :  { %4152 = vtanh.f32 %v3202_v36 }
0x10ec   :  { %v4153_v26 = vpop.eup %4152 }
0x10ed   :  { %v3205_v53 = vmul.f32 %v4153_v26, %v3204_v28 }
0x10ef   :  { %v3207_v55 = vadd.f32 %v3206_v59, %v3205_v53 }
0x10f1   :  { %v3215_v44 = vrot.slane %v3207_v55, %v4802_v1 }
0x10f3   :  { %v3216_v10 = vcombine.high %v3215_v44, %v3215_v44  ;;  %v3223_v51 = vrot.slane %v3215_v44, %v4802_v1 }
0x10f5   :  { %v3230_v30 = vrot.slane %v3216_v10, %v4802_v1  ;;  %3233 = vst.msk [vmem:[#allocation11 + $0x7] sm:$0x1] %vm590_vm6, %v3223_v51 }
0x10f6   :  { %3235 = vst.msk [vmem:[#allocation11] sm:$0x1] %vm593_vm7, %v3223_v51 }
0x10f7   :  { %3234 = vst.msk [vmem:[#allocation11 + $0xf] sm:$0x1] %vm590_vm6, %v3230_v30 }
0x10f8   :  { %3236 = vst.msk [vmem:[#allocation11 + $0x8] sm:$0x1] %vm593_vm7, %v3230_v30 }
0x10f9   :  { %4302 = shalt.err (!%p4299_p8)
}
0x10fa   :  { %s4303_s21 = scalar_lea.hbm %s5956_s7, 256 }
0x10fb   :  { %p4304_p9 = scmp.ne.s32.totalorder %s5956_s7, %s4303_s21  ;;  %p4307_p10 = scmp.lt.u32.totalorder %s4303_s21, %s5956_s7 }
0x10fd   :  { %p4309_p11 = pnand %p4307_p10, %p4304_p9 }
0x10ff   :  { %4312 = shalt.err (!%p4309_p11)
}
0x1100   :  { %3248 = dma.vmem_to_hbm [thread:$0]  %s3243_s0, 256, %s5956_s7, [#allocation5], %s4325_s1, %s4325_s1, %s4326_s25  }
0x1101   :  { %4319 = dma.done.wait [#allocation5], 256  }
0x1102   :  { %4320 = vsyncadd [#allocation5], 4294967040 }
0x1103   :  { %3252 = vsyncpa [#allocation4], 1 }
0x1104   :  { %3253 = vsyncpa [#allocation7], 1 }
0x1105   :  { %3254 = vsyncpa [#allocation10], 1 }
0x1106   :  { %3255 = vsyncpa [#allocation5], 1 }

</bundles_post_ra>
